<compile_context>
chip_gen: v5e
topology: v5e:2x2
jax: 0.10.0
libtpu: 0.0.40
codegen_flags: <defaults>
</compile_context>

<pallas_src>
import functools

import numpy as np
import jax
import jax.numpy as jnp
from jax import lax
from jax.experimental import pallas as pl
from jax.experimental.pallas import tpu as pltpu


# ---------------------------------------------------------------------------
# Pallas kernel: bf16 (M,K)x(K,C) matmul -> f32 + bias + PReLU
#                (+ optional fused residual subtract / add)
# ---------------------------------------------------------------------------
def _mm_bias_prelu_kernel(a_ref, w_ref, b_ref, alpha_ref, *rest, res_op):
    if res_op is None:
        (o_ref,) = rest
    else:
        res_ref, o_ref = rest
    acc = jnp.dot(a_ref[...], w_ref[...], preferred_element_type=jnp.float32)
    acc = acc + b_ref[...]                       # (tm, C_pad) + (1, C_pad)
    alpha = alpha_ref[0, 0]                      # runtime PReLU slope (SMEM)
    act = jnp.where(acc >= 0.0, acc, alpha * acc)
    if res_op == "sub":
        act = act - res_ref[...].astype(jnp.float32)
    elif res_op == "add":
        act = act + res_ref[...].astype(jnp.float32)
    o_ref[...] = act.astype(o_ref.dtype)


def _round_up(x, m):
    return ((x + m - 1) // m) * m


# Conservative double-buffered working-set budget (fits every TPU generation
# once the scoped VMEM limit below is applied).
_VMEM_BUDGET = 20 * 1024 * 1024


def _pick_tm(M, K, C_pad):
    """Largest M tile whose double-buffered working set fits the budget.

    Residual / f32-output terms are always counted so sibling calls
    (up_conv1 / up_conv3) pick identical tiles and padded shapes match.
    """
    tm = 8
    for cand in (1024, 512, 256, 128, 64, 32, 16, 8):
        need = (2 * cand * K * 2          # A tile (bf16), double buffered
                + 2 * K * C_pad * 2       # resident weights (bf16)
                + 2 * cand * C_pad * 4    # output tile (f32 worst case)
                + 2 * cand * C_pad * 2)   # residual tile (bf16)
        if need <= _VMEM_BUDGET:
            tm = cand
            break
    return min(tm, _round_up(M, 8))


def matmul_bias_prelu(a_bf16, w_bf16, bias, alpha, *, out_dtype=jnp.float32,
                      res=None, res_op=None):
    """out = PReLU(a @ w + bias) (-|+) res.  Returns the PADDED (M_pad, C_pad)."""
    M, K = a_bf16.shape
    Cout = w_bf16.shape[1]
    C_pad = _round_up(Cout, 128)                 # lane-dense output stores
    tm = _pick_tm(M, K, C_pad)
    M_pad = _round_up(M, tm)

    a_p = a_bf16 if M_pad == M else jnp.pad(a_bf16, ((0, M_pad - M), (0, 0)))
    w_p = w_bf16 if C_pad == Cout else jnp.pad(w_bf16, ((0, 0), (0, C_pad - Cout)))
    b_p = jnp.pad(bias.astype(jnp.float32).reshape(1, -1),
                  ((0, 0), (0, C_pad - Cout)))
    alpha_arr = jnp.asarray(alpha, jnp.float32).reshape(1, 1)

    inputs = [a_p, w_p, b_p, alpha_arr]
    in_specs = [
        pl.BlockSpec((tm, K), lambda i: (i, 0)),            # patches tile
        pl.BlockSpec((K, C_pad), lambda i: (0, 0)),         # weights (resident)
        pl.BlockSpec((1, C_pad), lambda i: (0, 0)),         # bias row (resident)
        pl.BlockSpec(memory_space=pltpu.MemorySpace.SMEM),  # PReLU alpha scalar
    ]
    if res_op is not None:
        res = res.astype(jnp.bfloat16)
        if res.shape != (M_pad, C_pad):
            res = res[:M_pad, :C_pad]
            res = jnp.pad(res, ((0, M_pad - res.shape[0]),
                                (0, C_pad - res.shape[1])))
        inputs.append(res)
        in_specs.append(pl.BlockSpec((tm, C_pad), lambda i: (i, 0)))

    kernel = functools.partial(_mm_bias_prelu_kernel, res_op=res_op)
    return pl.pallas_call(
        kernel,
        out_shape=jax.ShapeDtypeStruct((M_pad, C_pad), out_dtype),
        grid_spec=pltpu.PrefetchScalarGridSpec(
            num_scalar_prefetch=0,
            grid=(M_pad // tm,),
            in_specs=in_specs,
            out_specs=pl.BlockSpec((tm, C_pad), lambda i: (i, 0)),
        ),
        compiler_params=pltpu.CompilerParams(
            dimension_semantics=("parallel",),
            vmem_limit_bytes=32 * 1024 * 1024,
        ),
    )(*inputs)


# ---------------------------------------------------------------------------
# XLA-side glue: slice-based im2col, phase-space weight folding, pixel shuffle
# ---------------------------------------------------------------------------
def _im2col_s1(x_nhwc, win, pad):
    """win x win / stride-1 patch extraction via shifted static slices (no
    gather).  (N,H,W,C) -> (N*Ho*Wo, win*win*C) with channel order (dh,dw,c)."""
    N, H, W, C = x_nhwc.shape
    xp = jnp.pad(x_nhwc, ((0, 0), (pad, pad), (pad, pad), (0, 0)))
    Ho = H + 2 * pad - win + 1
    Wo = W + 2 * pad - win + 1
    slabs = [xp[:, i:i + Ho, j:j + Wo, :] for i in range(win) for j in range(win)]
    return jnp.concatenate(slabs, axis=-1).reshape(N * Ho * Wo, win * win * C)


def _build_deconv_phase_weight(wt, k, s, p):
    """Fold a (Cin,Cout,k,k) ConvTranspose2d kernel (stride s, padding p) into
    one (3*3*Cin, s*s*Cout) matrix: column block (rh,rw) holds the taps of
    output phase (rh,rw) over a 3x3 window of the ORIGINAL (low-res) input."""
    assert k == 2 * s and k - 2 * p == s, "phase decomposition needs k=2s, k-2p=s"
    Cin, Cout = wt.shape[0], wt.shape[1]
    d = np.arange(3) - 1                         # input offset relative to q
    r = np.arange(s)                             # output phases
    kk = -s * d[:, None] + r[None, :] + p        # kernel tap per (offset, phase)
    valid = (kk >= 0) & (kk < k)
    kkc = np.clip(kk, 0, k - 1)
    wg = wt[:, :, kkc[:, :, None, None], kkc[None, None, :, :]]  # (Ci,Co,3,s,3,s)
    mask = valid[:, :, None, None] & valid[None, None, :, :]
    wg = wg * jnp.asarray(mask, wt.dtype)[None, None]
    wg = jnp.transpose(wg, (2, 4, 0, 3, 5, 1))   # (dh, dw, Cin, rh, rw, Cout)
    return wg.reshape(3 * 3 * Cin, s * s * Cout)


def _build_conv_phase_weight(w_oihw, k, s, p):
    """Fold a (Cout,Cin,k,k) Conv2d kernel (stride s, padding p) applied to an
    s-times-upsampled tensor into a 3x3 stride-1 conv over its PHASE layout:
    returns (3*3*s*s*Cin, Cout) with row order (dh, dw, rh, rw, ci) matching
    the phase-major column layout of the deconv output."""
    assert k == 2 * s and k - 2 * p == s, "phase folding needs k=2s, k-2p=s"
    Cout, Cin = w_oihw.shape[0], w_oihw.shape[1]
    d = np.arange(3) - 1                         # phase-block offset
    r = np.arange(s)                             # input phases
    kk = s * d[:, None] + r[None, :] + p         # kernel tap per (offset, phase)
    valid = (kk >= 0) & (kk < k)
    kkc = np.clip(kk, 0, k - 1)
    wg = w_oihw[:, :, kkc[:, :, None, None], kkc[None, None, :, :]]  # (Co,Ci,3,s,3,s)
    mask = valid[:, :, None, None] & valid[None, None, :, :]
    wg = wg * jnp.asarray(mask, w_oihw.dtype)[None, None]
    wg = jnp.transpose(wg, (2, 4, 3, 5, 1, 0))   # (dh, dw, rh, rw, Cin, Cout)
    return wg.reshape(3 * 3 * s * s * Cin, Cout)


# ---------------------------------------------------------------------------
# UpBlock1 forward (public API is NCHW, matching PyTorch)
# ---------------------------------------------------------------------------
def upblock1_forward(x_nchw, params, *, k=8, s=4, p=2):
    x = jnp.transpose(x_nchw, (0, 2, 3, 1)).astype(jnp.bfloat16)     # -> NHWC
    N, H, W, Cin = x.shape
    C = Cin - 1                                   # num_filter
    M = N * H * W

    # up_conv1: ConvTranspose2d(C+1 -> C) + PReLU, kept in phase-major layout.
    w1_big = _build_deconv_phase_weight(params["w1"], k, s, p)       # (9*Cin, 16*C)
    b1_big = jnp.tile(params["b1"].astype(jnp.float32), s * s)
    patches1 = _im2col_s1(x, 3, 1)                                   # (M, 9*Cin)
    h0_pad = matmul_bias_prelu(patches1, w1_big.astype(jnp.bfloat16),
                               b1_big, params["a1"], out_dtype=jnp.bfloat16)

    # up_conv2: Conv2d(C -> C+1, k,s,p) on the 4x-upsampled h0, folded into a
    # 3x3 stride-1 conv over the phase tensor (no pixel shuffle, no high-res
    # im2col).  (l0 - x) fused into the kernel epilogue.
    phase = h0_pad[:M, :s * s * C].reshape(N, H, W, s * s * C)
    w2_big = _build_conv_phase_weight(params["w2"], k, s, p)         # (9*16*C, C+1)
    patches2 = _im2col_s1(phase, 3, 1)                               # (M, 9*16*C)
    x_flat = x.reshape(M, Cin)
    l0_pad = matmul_bias_prelu(patches2, w2_big.astype(jnp.bfloat16),
                               params["b2"], params["a2"],
                               out_dtype=jnp.bfloat16,
                               res=x_flat, res_op="sub")

    # up_conv3: ConvTranspose2d(C+1 -> C) + PReLU, with (h1 + h0) fused in the
    # kernel; h0 is reused directly in its padded phase layout (padded columns
    # are exactly zero, padded rows are sliced away afterwards).
    y = l0_pad[:M, :Cin].reshape(N, H, W, Cin)
    w3_big = _build_deconv_phase_weight(params["w3"], k, s, p)
    b3_big = jnp.tile(params["b3"].astype(jnp.float32), s * s)
    patches3 = _im2col_s1(y, 3, 1)
    out_pad = matmul_bias_prelu(patches3, w3_big.astype(jnp.bfloat16),
                                b3_big, params["a3"], out_dtype=jnp.float32,
                                res=h0_pad, res_op="add")

    # Final pixel shuffle straight to NCHW (single transpose).
    out = out_pad[:M, :s * s * C].reshape(N, H, W, s, s, C)
    return jnp.transpose(out, (0, 5, 1, 3, 2, 4)).reshape(N, C, H * s, W * s)


# ---------------------------------------------------------------------------
# Pure-JAX f32 reference (matches the PyTorch module), for self-check.
# ---------------------------------------------------------------------------
def _prelu(x, a):
    return jnp.where(x >= 0, x, a * x)


def upblock1_reference(x_nchw, params, *, k=8, s=4, p=2):
    def deconv(x, w, b, a):
        w_conv = jnp.transpose(w[:, :, ::-1, ::-1], (1, 0, 2, 3))    # (Cout,Cin,k,k)
        y = lax.conv_general_dilated(
            x, w_conv, window_strides=(1, 1),
            padding=[(k - 1 - p, k - 1 - p)] * 2, lhs_dilation=(s, s),
            dimension_numbers=("NCHW", "OIHW", "NCHW"),
            precision=lax.Precision.HIGHEST)
        return _prelu(y + b[None, :, None, None], a)

    def conv(x, w, b, a):
        y = lax.conv_general_dilated(
            x, w, window_strides=(s, s), padding=[(p, p)] * 2,
            dimension_numbers=("NCHW", "OIHW", "NCHW"),
            precision=lax.Precision.HIGHEST)
        return _prelu(y + b[None, :, None, None], a)

    h0 = deconv(x_nchw, params["w1"], params["b1"], params["a1"])
    l0 = conv(h0, params["w2"], params["b2"], params["a2"])
    h1 = deconv(l0 - x_nchw, params["w3"], params["b3"], params["a3"])
    return h1 + h0


def init_params(key, num_filter, k=8):
    c_in = num_filter + 1
    ks = jax.random.split(key, 6)
    scale = 0.05
    return {
        # DeconvBlock 1: ConvTranspose2d(C+1 -> C); weight (Cin, Cout, k, k)
        "w1": scale * jax.random.normal(ks[0], (c_in, num_filter, k, k), jnp.float32),
        "b1": scale * jax.random.normal(ks[1], (num_filter,), jnp.float32),
        "a1": 0.25,   # PReLU default init (single shared alpha)
        # ConvBlock: Conv2d(C -> C+1); weight (Cout, Cin, k, k)
        "w2": scale * jax.random.normal(ks[2], (c_in, num_filter, k, k), jnp.float32),
        "b2": scale * jax.random.normal(ks[3], (c_in,), jnp.float32),
        "a2": 0.25,
        # DeconvBlock 2: ConvTranspose2d(C+1 -> C)
        "w3": scale * jax.random.normal(ks[4], (c_in, num_filter, k, k), jnp.float32),
        "b3": scale * jax.random.normal(ks[5], (num_filter,), jnp.float32),
        "a3": 0.25,
    }


if __name__ == "__main__":
    num_filter = 4
    N, H, W = 2, 16, 16
    key = jax.random.PRNGKey(0)
    kx, kp = jax.random.split(key)

    # module input has num_filter + 1 channels (NCHW)
    x = jax.random.normal(kx, (N, num_filter + 1, H, W), jnp.float32)
    params = init_params(kp, num_filter)

    out = jax.jit(upblock1_forward)(x, params)
    out = jax.block_until_ready(out)

    expected = (N, num_filter, 4 * H, 4 * W)
    assert out.shape == expected, (out.shape, expected)
    assert bool(jnp.all(jnp.isfinite(out)))

    # loose tolerance: kernel uses bf16 operands with f32 accumulation
    ref = upblock1_reference(x, params)
    err = float(jnp.max(jnp.abs(out - ref)))
    tol = 0.05 * (float(jnp.max(jnp.abs(ref))) + 1.0)
    assert err <= tol, (err, tol)

    print("KERNEL_OK")
</pallas_src>

<mosaic_0001>
module attributes {stable_mosaic.version = 11 : i64} {
  func.func @_mm_bias_prelu_kernel(%arg0: i32, %arg1: memref<512x45xbf16, #tpu.memory_space<vmem>>, %arg2: memref<45x128xbf16, #tpu.memory_space<vmem>>, %arg3: memref<1x128xf32, #tpu.memory_space<vmem>>, %arg4: memref<1x1xf32, #tpu.memory_space<smem>>, %arg5: memref<512x128xbf16, #tpu.memory_space<vmem>>) attributes {dimension_semantics = [#tpu.dimension_semantics<parallel>], iteration_bounds = array<i64: 1>, scalar_prefetch = 0 : i64, scratch_operands = 0 : i64, tpu.core_type = #tpu.core_type<tc>, window_params = [{transform_indices = @transform_0, window_bounds = array<i64: 512, 45>}, {pipeline_mode = #tpu.pipeline_mode<synchronous>, transform_indices = @transform_1, window_bounds = array<i64: 45, 128>}, {pipeline_mode = #tpu.pipeline_mode<synchronous>, transform_indices = @transform_2, window_bounds = array<i64: 1, 128>}, {transform_indices = @transform_3, window_bounds = array<i64: 1, 1>}, {transform_indices = @transform_4, window_bounds = array<i64: 512, 128>}]} {
    %c0 = arith.constant 0 : index
    %c0_0 = arith.constant 0 : index
    %0 = vector.load %arg1[%c0, %c0_0] : memref<512x45xbf16, #tpu.memory_space<vmem>>, vector<512x45xbf16>
    %c0_1 = arith.constant 0 : index
    %c0_2 = arith.constant 0 : index
    %1 = vector.load %arg2[%c0_1, %c0_2] : memref<45x128xbf16, #tpu.memory_space<vmem>>, vector<45x128xbf16>
    %cst = arith.constant dense<0.000000e+00> : vector<512x128xf32>
    %2 = tpu.matmul %0, %1, %cst {dimension_numbers = #tpu.dot_dimension_numbers<[1], [0], [0], [1], [0, 0, 1, 1], [], []>} : vector<512x45xbf16>, vector<45x128xbf16>, vector<512x128xf32> -> vector<512x128xf32>
    %c0_3 = arith.constant 0 : index
    %c0_4 = arith.constant 0 : index
    %3 = vector.load %arg3[%c0_3, %c0_4] : memref<1x128xf32, #tpu.memory_space<vmem>>, vector<1x128xf32>
    %4 = vector.broadcast %3 : vector<1x128xf32> to vector<512x128xf32>
    %5 = arith.addf %2, %4 : vector<512x128xf32>
    %c0_5 = arith.constant 0 : index
    %c0_6 = arith.constant 0 : index
    %6 = memref.load %arg4[%c0_5, %c0_6] : memref<1x1xf32, #tpu.memory_space<smem>>
    %cst_7 = arith.constant 0.000000e+00 : f32
    %7 = vector.broadcast %cst_7 : f32 to vector<512x128xf32>
    %8 = arith.cmpf oge, %5, %7 : vector<512x128xf32>
    %9 = vector.broadcast %6 : f32 to vector<512x128xf32>
    %10 = arith.mulf %9, %5 : vector<512x128xf32>
    %11 = arith.select %8, %5, %10 : vector<512x128xi1>, vector<512x128xf32>
    %12 = arith.truncf %11 : vector<512x128xf32> to vector<512x128xbf16>
    %c0_8 = arith.constant 0 : index
    %c0_9 = arith.constant 0 : index
    %13 = vector.load %arg5[%c0_8, %c0_9] : memref<512x128xbf16, #tpu.memory_space<vmem>>, vector<512x128xbf16>
    tpu.vector_store %arg5[%c0_8, %c0_9], %12 {strides = array<i32>} : memref<512x128xbf16, #tpu.memory_space<vmem>>, vector<512x128xbf16>,
    return
  }
  func.func @transform_0(%arg0: i32) -> (i32, i32) {
    %c0_i32 = arith.constant 0 : i32
    %c0_i32_0 = arith.constant 0 : i32
    return %arg0, %c0_i32 : i32, i32
  }
  func.func @transform_1(%arg0: i32) -> (i32, i32) {
    %c0_i32 = arith.constant 0 : i32
    %c0_i32_0 = arith.constant 0 : i32
    %c0_i32_1 = arith.constant 0 : i32
    return %c0_i32, %c0_i32_0 : i32, i32
  }
  func.func @transform_2(%arg0: i32) -> (i32, i32) {
    %c0_i32 = arith.constant 0 : i32
    %c0_i32_0 = arith.constant 0 : i32
    %c0_i32_1 = arith.constant 0 : i32
    return %c0_i32, %c0_i32_0 : i32, i32
  }
  func.func @transform_3(%arg0: i32) -> (i32, i32) {
    %c0_i32 = arith.constant 0 : i32
    %c0_i32_0 = arith.constant 0 : i32
    %c0_i32_1 = arith.constant 0 : i32
    return %c0_i32, %c0_i32_0 : i32, i32
  }
  func.func @transform_4(%arg0: i32) -> (i32, i32) {
    %c0_i32 = arith.constant 0 : i32
    %c0_i32_0 = arith.constant 0 : i32
    return %arg0, %c0_i32 : i32, i32
  }
}

module attributes {stable_mosaic.version = 11 : i64} {
  func.func @_mm_bias_prelu_kernel(%arg0: i32, %arg1: memref<512x576xbf16, #tpu.memory_space<vmem>>, %arg2: memref<576x128xbf16, #tpu.memory_space<vmem>>, %arg3: memref<1x128xf32, #tpu.memory_space<vmem>>, %arg4: memref<1x1xf32, #tpu.memory_space<smem>>, %arg5: memref<512x128xbf16, #tpu.memory_space<vmem>>, %arg6: memref<512x128xbf16, #tpu.memory_space<vmem>>) attributes {dimension_semantics = [#tpu.dimension_semantics<parallel>], iteration_bounds = array<i64: 1>, scalar_prefetch = 0 : i64, scratch_operands = 0 : i64, tpu.core_type = #tpu.core_type<tc>, window_params = [{transform_indices = @transform_0, window_bounds = array<i64: 512, 576>}, {pipeline_mode = #tpu.pipeline_mode<synchronous>, transform_indices = @transform_1, window_bounds = array<i64: 576, 128>}, {pipeline_mode = #tpu.pipeline_mode<synchronous>, transform_indices = @transform_2, window_bounds = array<i64: 1, 128>}, {transform_indices = @transform_3, window_bounds = array<i64: 1, 1>}, {transform_indices = @transform_4, window_bounds = array<i64: 512, 128>}, {transform_indices = @transform_5, window_bounds = array<i64: 512, 128>}]} {
    %c0 = arith.constant 0 : index
    %c0_0 = arith.constant 0 : index
    %0 = vector.load %arg1[%c0, %c0_0] : memref<512x576xbf16, #tpu.memory_space<vmem>>, vector<512x576xbf16>
    %c0_1 = arith.constant 0 : index
    %c0_2 = arith.constant 0 : index
    %1 = vector.load %arg2[%c0_1, %c0_2] : memref<576x128xbf16, #tpu.memory_space<vmem>>, vector<576x128xbf16>
    %cst = arith.constant dense<0.000000e+00> : vector<512x128xf32>
    %2 = tpu.matmul %0, %1, %cst {dimension_numbers = #tpu.dot_dimension_numbers<[1], [0], [0], [1], [0, 0, 1, 1], [], []>} : vector<512x576xbf16>, vector<576x128xbf16>, vector<512x128xf32> -> vector<512x128xf32>
    %c0_3 = arith.constant 0 : index
    %c0_4 = arith.constant 0 : index
    %3 = vector.load %arg3[%c0_3, %c0_4] : memref<1x128xf32, #tpu.memory_space<vmem>>, vector<1x128xf32>
    %4 = vector.broadcast %3 : vector<1x128xf32> to vector<512x128xf32>
    %5 = arith.addf %2, %4 : vector<512x128xf32>
    %c0_5 = arith.constant 0 : index
    %c0_6 = arith.constant 0 : index
    %6 = memref.load %arg4[%c0_5, %c0_6] : memref<1x1xf32, #tpu.memory_space<smem>>
    %cst_7 = arith.constant 0.000000e+00 : f32
    %7 = vector.broadcast %cst_7 : f32 to vector<512x128xf32>
    %8 = arith.cmpf oge, %5, %7 : vector<512x128xf32>
    %9 = vector.broadcast %6 : f32 to vector<512x128xf32>
    %10 = arith.mulf %9, %5 : vector<512x128xf32>
    %11 = arith.select %8, %5, %10 : vector<512x128xi1>, vector<512x128xf32>
    %c0_8 = arith.constant 0 : index
    %c0_9 = arith.constant 0 : index
    %12 = vector.load %arg5[%c0_8, %c0_9] : memref<512x128xbf16, #tpu.memory_space<vmem>>, vector<512x128xbf16>
    %13 = arith.extf %12 : vector<512x128xbf16> to vector<512x128xf32>
    %14 = arith.subf %11, %13 : vector<512x128xf32>
    %15 = arith.truncf %14 : vector<512x128xf32> to vector<512x128xbf16>
    %c0_10 = arith.constant 0 : index
    %c0_11 = arith.constant 0 : index
    %16 = vector.load %arg6[%c0_10, %c0_11] : memref<512x128xbf16, #tpu.memory_space<vmem>>, vector<512x128xbf16>
    tpu.vector_store %arg6[%c0_10, %c0_11], %15 {strides = array<i32>} : memref<512x128xbf16, #tpu.memory_space<vmem>>, vector<512x128xbf16>,
    return
  }
  func.func @transform_0(%arg0: i32) -> (i32, i32) {
    %c0_i32 = arith.constant 0 : i32
    %c0_i32_0 = arith.constant 0 : i32
    return %arg0, %c0_i32 : i32, i32
  }
  func.func @transform_1(%arg0: i32) -> (i32, i32) {
    %c0_i32 = arith.constant 0 : i32
    %c0_i32_0 = arith.constant 0 : i32
    %c0_i32_1 = arith.constant 0 : i32
    return %c0_i32, %c0_i32_0 : i32, i32
  }
  func.func @transform_2(%arg0: i32) -> (i32, i32) {
    %c0_i32 = arith.constant 0 : i32
    %c0_i32_0 = arith.constant 0 : i32
    %c0_i32_1 = arith.constant 0 : i32
    return %c0_i32, %c0_i32_0 : i32, i32
  }
  func.func @transform_3(%arg0: i32) -> (i32, i32) {
    %c0_i32 = arith.constant 0 : i32
    %c0_i32_0 = arith.constant 0 : i32
    %c0_i32_1 = arith.constant 0 : i32
    return %c0_i32, %c0_i32_0 : i32, i32
  }
  func.func @transform_4(%arg0: i32) -> (i32, i32) {
    %c0_i32 = arith.constant 0 : i32
    %c0_i32_0 = arith.constant 0 : i32
    return %arg0, %c0_i32 : i32, i32
  }
  func.func @transform_5(%arg0: i32) -> (i32, i32) {
    %c0_i32 = arith.constant 0 : i32
    %c0_i32_0 = arith.constant 0 : i32
    return %arg0, %c0_i32 : i32, i32
  }
}

module attributes {stable_mosaic.version = 11 : i64} {
  func.func @_mm_bias_prelu_kernel(%arg0: i32, %arg1: memref<512x45xbf16, #tpu.memory_space<vmem>>, %arg2: memref<45x128xbf16, #tpu.memory_space<vmem>>, %arg3: memref<1x128xf32, #tpu.memory_space<vmem>>, %arg4: memref<1x1xf32, #tpu.memory_space<smem>>, %arg5: memref<512x128xbf16, #tpu.memory_space<vmem>>, %arg6: memref<512x128xf32, #tpu.memory_space<vmem>>) attributes {dimension_semantics = [#tpu.dimension_semantics<parallel>], iteration_bounds = array<i64: 1>, scalar_prefetch = 0 : i64, scratch_operands = 0 : i64, tpu.core_type = #tpu.core_type<tc>, window_params = [{transform_indices = @transform_0, window_bounds = array<i64: 512, 45>}, {pipeline_mode = #tpu.pipeline_mode<synchronous>, transform_indices = @transform_1, window_bounds = array<i64: 45, 128>}, {pipeline_mode = #tpu.pipeline_mode<synchronous>, transform_indices = @transform_2, window_bounds = array<i64: 1, 128>}, {transform_indices = @transform_3, window_bounds = array<i64: 1, 1>}, {transform_indices = @transform_4, window_bounds = array<i64: 512, 128>}, {transform_indices = @transform_5, window_bounds = array<i64: 512, 128>}]} {
    %c0 = arith.constant 0 : index
    %c0_0 = arith.constant 0 : index
    %0 = vector.load %arg1[%c0, %c0_0] : memref<512x45xbf16, #tpu.memory_space<vmem>>, vector<512x45xbf16>
    %c0_1 = arith.constant 0 : index
    %c0_2 = arith.constant 0 : index
    %1 = vector.load %arg2[%c0_1, %c0_2] : memref<45x128xbf16, #tpu.memory_space<vmem>>, vector<45x128xbf16>
    %cst = arith.constant dense<0.000000e+00> : vector<512x128xf32>
    %2 = tpu.matmul %0, %1, %cst {dimension_numbers = #tpu.dot_dimension_numbers<[1], [0], [0], [1], [0, 0, 1, 1], [], []>} : vector<512x45xbf16>, vector<45x128xbf16>, vector<512x128xf32> -> vector<512x128xf32>
    %c0_3 = arith.constant 0 : index
    %c0_4 = arith.constant 0 : index
    %3 = vector.load %arg3[%c0_3, %c0_4] : memref<1x128xf32, #tpu.memory_space<vmem>>, vector<1x128xf32>
    %4 = vector.broadcast %3 : vector<1x128xf32> to vector<512x128xf32>
    %5 = arith.addf %2, %4 : vector<512x128xf32>
    %c0_5 = arith.constant 0 : index
    %c0_6 = arith.constant 0 : index
    %6 = memref.load %arg4[%c0_5, %c0_6] : memref<1x1xf32, #tpu.memory_space<smem>>
    %cst_7 = arith.constant 0.000000e+00 : f32
    %7 = vector.broadcast %cst_7 : f32 to vector<512x128xf32>
    %8 = arith.cmpf oge, %5, %7 : vector<512x128xf32>
    %9 = vector.broadcast %6 : f32 to vector<512x128xf32>
    %10 = arith.mulf %9, %5 : vector<512x128xf32>
    %11 = arith.select %8, %5, %10 : vector<512x128xi1>, vector<512x128xf32>
    %c0_8 = arith.constant 0 : index
    %c0_9 = arith.constant 0 : index
    %12 = vector.load %arg5[%c0_8, %c0_9] : memref<512x128xbf16, #tpu.memory_space<vmem>>, vector<512x128xbf16>
    %13 = arith.extf %12 : vector<512x128xbf16> to vector<512x128xf32>
    %14 = arith.addf %11, %13 : vector<512x128xf32>
    %c0_10 = arith.constant 0 : index
    %c0_11 = arith.constant 0 : index
    %15 = vector.load %arg6[%c0_10, %c0_11] : memref<512x128xf32, #tpu.memory_space<vmem>>, vector<512x128xf32>
    tpu.vector_store %arg6[%c0_10, %c0_11], %14 {strides = array<i32>} : memref<512x128xf32, #tpu.memory_space<vmem>>, vector<512x128xf32>,
    return
  }
  func.func @transform_0(%arg0: i32) -> (i32, i32) {
    %c0_i32 = arith.constant 0 : i32
    %c0_i32_0 = arith.constant 0 : i32
    return %arg0, %c0_i32 : i32, i32
  }
  func.func @transform_1(%arg0: i32) -> (i32, i32) {
    %c0_i32 = arith.constant 0 : i32
    %c0_i32_0 = arith.constant 0 : i32
    %c0_i32_1 = arith.constant 0 : i32
    return %c0_i32, %c0_i32_0 : i32, i32
  }
  func.func @transform_2(%arg0: i32) -> (i32, i32) {
    %c0_i32 = arith.constant 0 : i32
    %c0_i32_0 = arith.constant 0 : i32
    %c0_i32_1 = arith.constant 0 : i32
    return %c0_i32, %c0_i32_0 : i32, i32
  }
  func.func @transform_3(%arg0: i32) -> (i32, i32) {
    %c0_i32 = arith.constant 0 : i32
    %c0_i32_0 = arith.constant 0 : i32
    %c0_i32_1 = arith.constant 0 : i32
    return %c0_i32, %c0_i32_0 : i32, i32
  }
  func.func @transform_4(%arg0: i32) -> (i32, i32) {
    %c0_i32 = arith.constant 0 : i32
    %c0_i32_0 = arith.constant 0 : i32
    return %arg0, %c0_i32 : i32, i32
  }
  func.func @transform_5(%arg0: i32) -> (i32, i32) {
    %c0_i32 = arith.constant 0 : i32
    %c0_i32_0 = arith.constant 0 : i32
    return %arg0, %c0_i32 : i32, i32
  }
}

</mosaic_0001>

<bundles_post_ra>
// kernel: tile.13
= control target key start
LH: loop header
LB: loop body
LE: loop exit
PB: predicated region body
PF: predicated region fallthrough
CT: control target
= control target key end

     0   :  { %2 = vsyncpa [#allocation1], 0  ;;  %s51_s8 = smov [#allocation0]   ;;  %s71_s0 = inlined_call_operand.hbm [shape: f32[4], index: 0, kind: input, shape index: {}]   ;;  %s72_s1 = inlined_call_operand.vmem [shape: f32[16,4], index: 1, kind: output, shape index: {}]  }
   0x1   :  { %s8_s0 = sshll.u32 %s71_s0, 4  ;;  %s10_s9 = sshll.u32 %s51_s8, 4  ;;  %s9_s0 = int_to_ptr.hbm [resolvable:$true] %s8_s0  ;;  %s11_s9 = int_to_ptr.vmem [resolvable:$true] %s10_s9 }
   0x2   :  { %13 = dma.hbm_to_vmem [thread:$0]  %s9_s0, 16, %s11_s9, [#allocation1]  }
   0x3   :  { %49 = dma.done.wait [#allocation1], 16  }
   0x4   :  { %50 = vsyncadd [#allocation1], 4294967280  ;;  %v18_v0 = vld [vmem:[#allocation0] ss:$0 sm:$0xff] }
   0x5   :  { %19 = vst [vmem:[%s72_s1] sm:$0xff] %v18_v0 }
   0x6   :  { %23 = vst [vmem:[%s72_s1 + $0x8] sm:$0xff] %v18_v0 }
   0x7   :  { %22 = vsyncpa [#allocation1], 1 }

// kernel: tile.14
= control target key start
LH: loop header
LB: loop body
LE: loop exit
PB: predicated region body
PF: predicated region fallthrough
CT: control target
= control target key end

     0   :  { %s131_s10 = smov 60   ;;  %s132_s11 = smov 52   ;;  %vm3_vm0 = vcmask 31744   ;;  %vm9_vm1 = vcmask 523744   ;;  %vm15_vm2 = vcmask 490944   ;;  %vm21_vm3 = vcmask 458144   ;;  %s207_s0 = inlined_call_operand.vmem [shape: f32[16,4], index: 0, kind: input, shape index: {}]   ;;  %s208_s1 = inlined_call_operand.vmem [shape: f32[1,64], index: 1, kind: output, shape index: {}]  }
   0x1   :  { %v101_v0 = vld [vmem:[%s207_s0 + $0xf] sm:$0x1]   ;;  %v103_v1 = vld [vmem:[%s207_s0 + $0xd] sm:$0x1]   ;;  %v105_v2 = vld [vmem:[%s207_s0 + $0xb] sm:$0x1]  }
   0x2   :  { %7 = vrot.lane.b32.xlu0 %v101_v0, %s131_s10  ;;  %19 = vrot.lane.b32.xlu1 %v103_v1, %s132_s11  ;;  %s133_s14 = smov 44   ;;  %v102_v3 = vld [vmem:[%s207_s0 + $0xe] sm:$0x1]   ;;  %v104_v4 = vld [vmem:[%s207_s0 + $0xc] sm:$0x1]   ;;  %s134_s19 = smov 56  }
   0x3   :  { %31 = vrot.lane.b32.xlu2 %v105_v2, %s133_s14  ;;  %s135_s20 = smov 48   ;;  %v106_v5 = vld [vmem:[%s207_s0 + $0xa] sm:$0x1]   ;;  %s136_s23 = smov 40   ;;  %v107_v6 = vld [vmem:[%s207_s0 + $0x9] sm:$0x1]  }
   0x4   :  { %v108_v7 = vld [vmem:[%s207_s0 + $0x8] sm:$0x1]   ;;  %s137_s28 = smov 36   ;;  %s138_s29 = smov 32   ;;  %v109_v8 = vld [vmem:[%s207_s0 + $0x7] sm:$0x1]  }
   0x5   :  { %s139_s3 = smov 28   ;;  %v110_v9 = vld [vmem:[%s207_s0 + $0x6] sm:$0x1]   ;;  %v111_v10 = vld [vmem:[%s207_s0 + $0x5] sm:$0x1]   ;;  %s140_s8 = smov 24  }
   0x6   :  { %s141_s9 = smov 20   ;;  %v112_v11 = vld [vmem:[%s207_s0 + $0x4] sm:$0x1]   ;;  %s142_s12 = smov 16   ;;  %v113_v12 = vld [vmem:[%s207_s0 + $0x3] sm:$0x1]  }
   0x7   :  { %v114_v13 = vld [vmem:[%s207_s0 + $0x2] sm:$0x1]   ;;  %s143_s17 = smov 12   ;;  %s144_s18 = smov 8   ;;  %v115_v14 = vld [vmem:[%s207_s0 + $0x1] sm:$0x1]  }
   0x8   :  { %s145_s21 = smov 4   ;;  %v2_v15 = vld [vmem:[%s207_s0] sm:$0x1]   ;;  %vm27_vm4 = vcmask 425344   ;;  %vm33_vm5 = vcmask 392544   ;;  %vm39_vm6 = vcmask 359744  }
   0x9   :  { %4 = vst.msk [vmem:[#allocation0] sm:$0x1] %vm3_vm0, %v2_v15   ;;  %vm45_vm7 = vcmask 326944   ;;  %vm51_vm8 = vcmask 294144   ;;  %vm57_vm9 = vcmask 261344   ;;  %vm63_vm10 = vcmask 228544  }
   0xa   :  { %13 = vrot.lane.b32.xlu0 %v102_v3, %s134_s19  ;;  %25 = vrot.lane.b32.xlu1 %v104_v4, %s135_s20  ;;  %vm69_vm11 = vcmask 195744   ;;  %vm75_vm12 = vcmask 162944   ;;  %vm81_vm13 = vcmask 130144   ;;  %vm87_vm14 = vcmask 97344  }
   0xb   :  { %37 = vrot.lane.b32.xlu2 %v106_v5, %s136_s23  ;;  %vm93_vm15 = vcmask 64544  }
  0x12   :  { %43 = vrot.lane.b32.xlu0 %v107_v6, %s137_s28  ;;  %49 = vrot.lane.b32.xlu1 %v108_v7, %s138_s29 }
  0x13   :  { %55 = vrot.lane.b32.xlu2 %v109_v8, %s139_s3 }
  0x1a   :  { %61 = vrot.lane.b32.xlu0 %v110_v9, %s140_s8  ;;  %67 = vrot.lane.b32.xlu1 %v111_v10, %s141_s9 }
  0x1b   :  { %73 = vrot.lane.b32.xlu2 %v112_v11, %s142_s12 }
  0x22   :  { %79 = vrot.lane.b32.xlu0 %v113_v12, %s143_s17  ;;  %85 = vrot.lane.b32.xlu1 %v114_v13, %s144_s18 }
  0x23   :  { %91 = vrot.lane.b32.xlu2 %v115_v14, %s145_s21 }
  0x5d   :  { %v32_v16 = vpop.permute.xlu2 %31  }
  0x65   :  { %v38_v17 = vpop.permute.xlu2 %37  }
  0x6d   :  { %v56_v18 = vpop.permute.xlu2 %55  }
  0x74   :  { %v8_v19 = vpop.permute.xlu0 %7   ;;  %v20_v20 = vpop.permute.xlu1 %19  }
  0x75   :  { %10 = vst.msk [vmem:[#allocation0] sm:$0x1] %vm9_vm1, %v8_v19   ;;  %v74_v21 = vpop.permute.xlu2 %73  }
  0x7c   :  { %v14_v22 = vpop.permute.xlu0 %13   ;;  %v26_v23 = vpop.permute.xlu1 %25  }
  0x7d   :  { %16 = vst.msk [vmem:[#allocation0] sm:$0x1] %vm15_vm2, %v14_v22   ;;  %v92_v24 = vpop.permute.xlu2 %91  }
  0x7e   :  { %22 = vst.msk [vmem:[#allocation0] sm:$0x1] %vm21_vm3, %v20_v20  }
  0x7f   :  { %28 = vst.msk [vmem:[#allocation0] sm:$0x1] %vm27_vm4, %v26_v23  }
  0x80   :  { %34 = vst.msk [vmem:[#allocation0] sm:$0x1] %vm33_vm5, %v32_v16  }
  0x81   :  { %40 = vst.msk [vmem:[#allocation0] sm:$0x1] %vm39_vm6, %v38_v17  }
  0x84   :  { %v44_v25 = vpop.permute.xlu0 %43   ;;  %v50_v26 = vpop.permute.xlu1 %49  }
  0x85   :  { %46 = vst.msk [vmem:[#allocation0] sm:$0x1] %vm45_vm7, %v44_v25  }
  0x86   :  { %52 = vst.msk [vmem:[#allocation0] sm:$0x1] %vm51_vm8, %v50_v26  }
  0x87   :  { %58 = vst.msk [vmem:[#allocation0] sm:$0x1] %vm57_vm9, %v56_v18  }
  0x8c   :  { %v62_v27 = vpop.permute.xlu0 %61   ;;  %v68_v28 = vpop.permute.xlu1 %67  }
  0x8d   :  { %64 = vst.msk [vmem:[#allocation0] sm:$0x1] %vm63_vm10, %v62_v27  }
  0x8e   :  { %70 = vst.msk [vmem:[#allocation0] sm:$0x1] %vm69_vm11, %v68_v28  }
  0x8f   :  { %76 = vst.msk [vmem:[#allocation0] sm:$0x1] %vm75_vm12, %v74_v21  }
  0x94   :  { %v80_v29 = vpop.permute.xlu0 %79   ;;  %v86_v30 = vpop.permute.xlu1 %85  }
  0x95   :  { %82 = vst.msk [vmem:[#allocation0] sm:$0x1] %vm81_vm13, %v80_v29  }
  0x96   :  { %88 = vst.msk [vmem:[#allocation0] sm:$0x1] %vm87_vm14, %v86_v30  }
  0x97   :  { %94 = vst.msk [vmem:[#allocation0] sm:$0x1] %vm93_vm15, %v92_v24  }
  0x9e   :  { %v97_v31 = vld [vmem:[#allocation0] sm:$0x1] }
  0x9f   :  { %100 = vst [vmem:[%s208_s1] sm:$0x1] %v97_v31 }

// kernel: upblock1_forward.3
= control target key start
LH: loop header
LB: loop body
LE: loop exit
PB: predicated region body
PF: predicated region fallthrough
CT: control target
= control target key end

     0   :  { %vm367_vm0 = vcmask 1045504   ;;  %vm368_vm1 = vcmask 1046528   ;;  %v1278_v2 = vmov 65535   ;;  %vm270_vm2 = vcmask 367616   ;;  %s1678_s1 = inlined_call_operand.vmem [shape: bf16[45,128], index: 1, kind: input, shape index: {}]   ;;  %s1679_s2 = inlined_call_operand.vmem [shape: f32[1,128], index: 2, kind: input, shape index: {}]   ;;  %s1680_s0 = inlined_call_operand.vmem [shape: bf16[512,45], index: 0, kind: input, shape index: {}]   ;;  %s1681_s3 = inlined_call_operand.<no memory space> [shape: f32[1,1], index: 3, kind: input, shape index: {}]   ;;  %s1682_s4 = inlined_call_operand.vmem [shape: bf16[512,128], index: 4, kind: output, shape index: {}]  }
   0x1   :  { %v1007_v0 = vld [vmem:[%s1678_s1 + $0x10] sm:$0xf]  ;;  %v1075_v1 = vld [vmem:[%s1678_s1 + $0x10] sm:$0x70]  ;;  %v369_v3 = vsel %vm367_vm0, 4294967295, %v1278_v2  ;;  %v1074_v7 = vld [vmem:[%s1678_s1 + $0x8] sm:$0xff]  ;;  %v1454_v46 = vstv %s1681_s3 }
   0x2   :  { %v1008_v4 = vor.u32 %v1075_v1, %v1007_v0  ;;  %v370_v5 = vsel %vm368_vm1, %v369_v3, 0  ;;  %v1073_v8 = vld [vmem:[%s1678_s1] sm:$0xff]  ;;  %v1042_v13 = vld [vmem:[%s1680_s0 + $0x8] sm:$0xff]  ;;  %v1043_v17 = vld [vmem:[%s1680_s0 + $0x10] sm:$0xff] }
   0x3   :  { %v1041_v9 = vld [vmem:[%s1680_s0] sm:$0xff]  ;;  %v1050_v14 = vld [vmem:[%s1680_s0 + $0x48] sm:$0xff]  ;;  %v1051_v18 = vld [vmem:[%s1680_s0 + $0x50] sm:$0xff] }
   0x4   :  { %v372_v6 = vand.u32 %v1008_v4, %v370_v5  ;;  %v1049_v10 = vld [vmem:[%s1680_s0 + $0x40] sm:$0xff]  ;;  %v1058_v15 = vld [vmem:[%s1680_s0 + $0x88] sm:$0xff]  ;;  %v1059_v19 = vld [vmem:[%s1680_s0 + $0x90] sm:$0xff] }
   0x5   :  { %v1057_v11 = vld [vmem:[%s1680_s0 + $0x80] sm:$0xff]  ;;  %v1066_v16 = vld [vmem:[%s1680_s0 + $0xc8] sm:$0xff]  ;;  %v1067_v20 = vld [vmem:[%s1680_s0 + $0xd0] sm:$0xff] }
   0x6   :  { %379 = vmatpush.bf16.msra.mxu0 %v372_v6  ;;  %1267 = vmatpush.bf16.msra.mxu1 %v372_v6  ;;  %v1065_v12 = vld [vmem:[%s1680_s0 + $0xc0] sm:$0xff]  ;;  %v1044_v21 = vld [vmem:[%s1680_s0 + $0x18] sm:$0xff]  ;;  %v1046_v29 = vld [vmem:[%s1680_s0 + $0x28] sm:$0xff] }
   0x7   :  { %1268 = vmatpush.bf16.msra.mxu2 %v372_v6  ;;  %1269 = vmatpush.bf16.msra.mxu3 %v372_v6  ;;  %v1052_v22 = vld [vmem:[%s1680_s0 + $0x58] sm:$0xff]  ;;  %v1045_v25 = vld [vmem:[%s1680_s0 + $0x20] sm:$0xff]  ;;  %v1054_v30 = vld [vmem:[%s1680_s0 + $0x68] sm:$0xff] }
   0x8   :  { %v1060_v23 = vld [vmem:[%s1680_s0 + $0x98] sm:$0xff]  ;;  %v1053_v26 = vld [vmem:[%s1680_s0 + $0x60] sm:$0xff]  ;;  %v1062_v31 = vld [vmem:[%s1680_s0 + $0xa8] sm:$0xff] }
   0x9   :  { %v1068_v24 = vld [vmem:[%s1680_s0 + $0xd8] sm:$0xff]  ;;  %v1061_v27 = vld [vmem:[%s1680_s0 + $0xa0] sm:$0xff]  ;;  %v1070_v32 = vld [vmem:[%s1680_s0 + $0xe8] sm:$0xff] }
   0xa   :  { %380 = vmatpush.bf16.msra.mxu0 %v1074_v7  ;;  %1270 = vmatpush.bf16.msra.mxu1 %v1074_v7  ;;  %v1069_v28 = vld [vmem:[%s1680_s0 + $0xe0] sm:$0xff]  ;;  %v1047_v33 = vld [vmem:[%s1680_s0 + $0x30] sm:$0xff]  ;;  %v1048_v37 = vld [vmem:[%s1680_s0 + $0x38] sm:$0xff] }
   0xb   :  { %1271 = vmatpush.bf16.msra.mxu2 %v1074_v7  ;;  %1272 = vmatpush.bf16.msra.mxu3 %v1074_v7  ;;  %v1055_v34 = vld [vmem:[%s1680_s0 + $0x70] sm:$0xff]  ;;  %v1056_v38 = vld [vmem:[%s1680_s0 + $0x78] sm:$0xff]  ;;  %v1447_v43 = vld [vmem:[%s1679_s2] ss:$0 sm:$0xff] }
   0xc   :  { %v1063_v35 = vld [vmem:[%s1680_s0 + $0xb0] sm:$0xff]  ;;  %v1064_v39 = vld [vmem:[%s1680_s0 + $0xb8] sm:$0xff] }
   0xd   :  { %v1071_v36 = vld [vmem:[%s1680_s0 + $0xf0] sm:$0xff]  ;;  %v1072_v40 = vld [vmem:[%s1680_s0 + $0xf8] sm:$0xff] }
   0xe   :  { %381 = vmatpush.bf16.msra.mxu0 %v1073_v8  ;;  %1273 = vmatpush.bf16.msra.mxu1 %v1073_v8 }
   0xf   :  { %1274 = vmatpush.bf16.msra.mxu2 %v1073_v8  ;;  %1275 = vmatpush.bf16.msra.mxu3 %v1073_v8 }
  0x11   :  { %1009 = vmatmul.msk.bf16.vlgmr.msra.gmra.mxu0 %vm270_vm2, %v1041_v9  ;;  %1017 = vmatmul.msk.bf16.vlgmr.msra.gmra.mxu1 %vm270_vm2, %v1049_v10 }
  0x12   :  { %1025 = vmatmul.msk.bf16.vlgmr.msra.gmra.mxu2 %vm270_vm2, %v1057_v11  ;;  %1033 = vmatmul.msk.bf16.vlgmr.msra.gmra.mxu3 %vm270_vm2, %v1065_v12 }
  0x21   :  { %1010 = vmatmul.msk.bf16.gmra.mxu0 %vm270_vm2, %v1042_v13  ;;  %1018 = vmatmul.msk.bf16.gmra.mxu1 %vm270_vm2, %v1050_v14 }
  0x22   :  { %1026 = vmatmul.msk.bf16.gmra.mxu2 %vm270_vm2, %v1058_v15  ;;  %1034 = vmatmul.msk.bf16.gmra.mxu3 %vm270_vm2, %v1066_v16 }
  0x31   :  { %1011 = vmatmul.msk.bf16.gmra.mxu0 %vm270_vm2, %v1043_v17  ;;  %1019 = vmatmul.msk.bf16.gmra.mxu1 %vm270_vm2, %v1051_v18 }
  0x32   :  { %1027 = vmatmul.msk.bf16.gmra.mxu2 %vm270_vm2, %v1059_v19  ;;  %1035 = vmatmul.msk.bf16.gmra.mxu3 %vm270_vm2, %v1067_v20 }
  0x41   :  { %1012 = vmatmul.msk.bf16.gmra.mxu0 %vm270_vm2, %v1044_v21  ;;  %1020 = vmatmul.msk.bf16.gmra.mxu1 %vm270_vm2, %v1052_v22 }
  0x42   :  { %1028 = vmatmul.msk.bf16.gmra.mxu2 %vm270_vm2, %v1060_v23  ;;  %1036 = vmatmul.msk.bf16.gmra.mxu3 %vm270_vm2, %v1068_v24 }
  0x51   :  { %1013 = vmatmul.msk.bf16.gmra.mxu0 %vm270_vm2, %v1045_v25  ;;  %1021 = vmatmul.msk.bf16.gmra.mxu1 %vm270_vm2, %v1053_v26 }
  0x52   :  { %1029 = vmatmul.msk.bf16.gmra.mxu2 %vm270_vm2, %v1061_v27  ;;  %1037 = vmatmul.msk.bf16.gmra.mxu3 %vm270_vm2, %v1069_v28 }
  0x61   :  { %1014 = vmatmul.msk.bf16.gmra.mxu0 %vm270_vm2, %v1046_v29  ;;  %1022 = vmatmul.msk.bf16.gmra.mxu1 %vm270_vm2, %v1054_v30 }
  0x62   :  { %1030 = vmatmul.msk.bf16.gmra.mxu2 %vm270_vm2, %v1062_v31  ;;  %1038 = vmatmul.msk.bf16.gmra.mxu3 %vm270_vm2, %v1070_v32 }
  0x71   :  { %1015 = vmatmul.msk.bf16.gmra.mxu0 %vm270_vm2, %v1047_v33  ;;  %1023 = vmatmul.msk.bf16.gmra.mxu1 %vm270_vm2, %v1055_v34 }
  0x72   :  { %1031 = vmatmul.msk.bf16.gmra.mxu2 %vm270_vm2, %v1063_v35  ;;  %1039 = vmatmul.msk.bf16.gmra.mxu3 %vm270_vm2, %v1071_v36 }
  0x81   :  { %1016 = vmatmul.msk.bf16.gmra.mxu0 %vm270_vm2, %v1048_v37  ;;  %1024 = vmatmul.msk.bf16.gmra.mxu1 %vm270_vm2, %v1056_v38 }
  0x82   :  { %1032 = vmatmul.msk.bf16.gmra.mxu2 %vm270_vm2, %v1064_v39  ;;  %1040 = vmatmul.msk.bf16.gmra.mxu3 %vm270_vm2, %v1072_v40 }
  0x8e   :  { %v383_v41 = vpop.f32.mrf.mxu0  ;;  %v423_v42 = vpop.f32.mrf.mxu1 }
  0x8f   :  { %v384_v44 = vadd.f32 %v1447_v43, %v383_v41  ;;  %v424_v45 = vadd.f32 %v1447_v43, %v423_v42 }
  0x91   :  { %v609_v51 = vmul.f32 %v1454_v46, %v384_v44  ;;  %v625_v52 = vmul.f32 %v1454_v46, %v424_v45  ;;  %vm544_vm3 = vcmp.ge.f32.partialorder %v384_v44, 0.0  ;;  %vm560_vm4 = vcmp.ge.f32.partialorder %v424_v45, 0.0 }
  0x93   :  { %v673_v59 = vsel %vm544_vm3, %v384_v44, %v609_v51  ;;  %v689_v60 = vsel %vm560_vm4, %v424_v45, %v625_v52 }
  0x95   :  { %v463_v47 = vpop.f32.mrf.mxu2  ;;  %v503_v48 = vpop.f32.mrf.mxu3 }
  0x96   :  { %v385_v49 = vpop.f32.mrf.mxu0  ;;  %v425_v50 = vpop.f32.mrf.mxu1  ;;  %v464_v57 = vadd.f32 %v1447_v43, %v463_v47  ;;  %v504_v58 = vadd.f32 %v1447_v43, %v503_v48 }
  0x97   :  { %v386_v53 = vadd.f32 %v1447_v43, %v385_v49  ;;  %v426_v54 = vadd.f32 %v1447_v43, %v425_v50 }
  0x98   :  { %v641_v3 = vmul.f32 %v1454_v46, %v464_v57  ;;  %v657_v4 = vmul.f32 %v1454_v46, %v504_v58  ;;  %vm576_vm7 = vcmp.ge.f32.partialorder %v464_v57, 0.0  ;;  %vm592_vm8 = vcmp.ge.f32.partialorder %v504_v58, 0.0 }
  0x99   :  { %vm545_vm5 = vcmp.ge.f32.partialorder %v386_v53, 0.0  ;;  %v610_v55 = vmul.f32 %v1454_v46, %v386_v53  ;;  %vm561_vm6 = vcmp.ge.f32.partialorder %v426_v54, 0.0  ;;  %v626_v56 = vmul.f32 %v1454_v46, %v426_v54 }
  0x9a   :  { %v705_v11 = vsel %vm576_vm7, %v464_v57, %v641_v3  ;;  %v721_v12 = vsel %vm592_vm8, %v504_v58, %v657_v4 }
  0x9b   :  { %v674_v61 = vsel %vm545_vm5, %v386_v53, %v610_v55  ;;  %v690_v62 = vsel %vm561_vm6, %v426_v54, %v626_v56 }
  0x9c   :  { %v1079_v63 = vpack.c.bf16 %v674_v61, %v673_v59  ;;  %v1119_v0 = vpack.c.bf16 %v690_v62, %v689_v60 }
  0x9d   :  { %v465_v1 = vpop.f32.mrf.mxu2  ;;  %v505_v2 = vpop.f32.mrf.mxu3 }
  0x9e   :  { %1080 = vst [vmem:[%s1682_s4] sm:$0xff] %v1079_v63   ;;  %v466_v5 = vadd.f32 %v1447_v43, %v465_v1  ;;  %v506_v6 = vadd.f32 %v1447_v43, %v505_v2  ;;  %v388_v7 = vpop.f32.mrf.mxu0  ;;  %v428_v8 = vpop.f32.mrf.mxu1 }
  0x9f   :  { %1243 = vst [vmem:[%s1682_s4 + $0x40] sm:$0xff] %v1119_v0   ;;  %v389_v17 = vadd.f32 %v1447_v43, %v388_v7  ;;  %v429_v18 = vadd.f32 %v1447_v43, %v428_v8 }
  0xa0   :  { %vm577_vm9 = vcmp.ge.f32.partialorder %v466_v5, 0.0  ;;  %v642_v9 = vmul.f32 %v1454_v46, %v466_v5  ;;  %vm593_vm10 = vcmp.ge.f32.partialorder %v506_v6, 0.0  ;;  %v658_v10 = vmul.f32 %v1454_v46, %v506_v6 }
  0xa1   :  { %v611_v23 = vmul.f32 %v1454_v46, %v389_v17  ;;  %v627_v24 = vmul.f32 %v1454_v46, %v429_v18  ;;  %vm546_vm11 = vcmp.ge.f32.partialorder %v389_v17, 0.0  ;;  %vm562_vm12 = vcmp.ge.f32.partialorder %v429_v18, 0.0 }
  0xa2   :  { %v706_v13 = vsel %vm577_vm9, %v466_v5, %v642_v9  ;;  %v722_v14 = vsel %vm593_vm10, %v506_v6, %v658_v10 }
  0xa3   :  { %v1159_v15 = vpack.c.bf16 %v706_v13, %v705_v11  ;;  %v1199_v16 = vpack.c.bf16 %v722_v14, %v721_v12  ;;  %v675_v31 = vsel %vm546_vm11, %v389_v17, %v611_v23  ;;  %v691_v32 = vsel %vm562_vm12, %v429_v18, %v627_v24 }
  0xa5   :  { %1251 = vst [vmem:[%s1682_s4 + $0x80] sm:$0xff] %v1159_v15   ;;  %v468_v19 = vpop.f32.mrf.mxu2  ;;  %v508_v20 = vpop.f32.mrf.mxu3 }
  0xa6   :  { %1259 = vst [vmem:[%s1682_s4 + $0xc0] sm:$0xff] %v1199_v16   ;;  %v390_v21 = vpop.f32.mrf.mxu0  ;;  %v430_v22 = vpop.f32.mrf.mxu1  ;;  %v469_v29 = vadd.f32 %v1447_v43, %v468_v19  ;;  %v509_v30 = vadd.f32 %v1447_v43, %v508_v20 }
  0xa7   :  { %v391_v25 = vadd.f32 %v1447_v43, %v390_v21  ;;  %v431_v26 = vadd.f32 %v1447_v43, %v430_v22 }
  0xa8   :  { %v643_v39 = vmul.f32 %v1454_v46, %v469_v29  ;;  %v659_v40 = vmul.f32 %v1454_v46, %v509_v30  ;;  %vm578_vm15 = vcmp.ge.f32.partialorder %v469_v29, 0.0  ;;  %vm594_vm0 = vcmp.ge.f32.partialorder %v509_v30, 0.0 }
  0xa9   :  { %vm547_vm13 = vcmp.ge.f32.partialorder %v391_v25, 0.0  ;;  %v612_v27 = vmul.f32 %v1454_v46, %v391_v25  ;;  %vm563_vm14 = vcmp.ge.f32.partialorder %v431_v26, 0.0  ;;  %v628_v28 = vmul.f32 %v1454_v46, %v431_v26 }
  0xaa   :  { %v707_v49 = vsel %vm578_vm15, %v469_v29, %v643_v39  ;;  %v723_v50 = vsel %vm594_vm0, %v509_v30, %v659_v40 }
  0xab   :  { %v676_v33 = vsel %vm547_vm13, %v391_v25, %v612_v27  ;;  %v692_v34 = vsel %vm563_vm14, %v431_v26, %v628_v28 }
  0xac   :  { %v1084_v35 = vpack.c.bf16 %v676_v33, %v675_v31  ;;  %v1124_v36 = vpack.c.bf16 %v692_v34, %v691_v32 }
  0xad   :  { %v470_v37 = vpop.f32.mrf.mxu2  ;;  %v510_v38 = vpop.f32.mrf.mxu3 }
  0xae   :  { %1236 = vst [vmem:[%s1682_s4 + $0x8] sm:$0xff] %v1084_v35   ;;  %v471_v41 = vadd.f32 %v1447_v43, %v470_v37  ;;  %v511_v42 = vadd.f32 %v1447_v43, %v510_v38  ;;  %v393_v44 = vpop.f32.mrf.mxu0  ;;  %v433_v45 = vpop.f32.mrf.mxu1 }
  0xaf   :  { %1244 = vst [vmem:[%s1682_s4 + $0x48] sm:$0xff] %v1124_v36   ;;  %v394_v55 = vadd.f32 %v1447_v43, %v393_v44  ;;  %v434_v56 = vadd.f32 %v1447_v43, %v433_v45 }
  0xb0   :  { %vm579_vm1 = vcmp.ge.f32.partialorder %v471_v41, 0.0  ;;  %v644_v47 = vmul.f32 %v1454_v46, %v471_v41  ;;  %vm595_vm2 = vcmp.ge.f32.partialorder %v511_v42, 0.0  ;;  %v660_v48 = vmul.f32 %v1454_v46, %v511_v42 }
  0xb1   :  { %v613_v61 = vmul.f32 %v1454_v46, %v394_v55  ;;  %v629_v62 = vmul.f32 %v1454_v46, %v434_v56  ;;  %vm548_vm3 = vcmp.ge.f32.partialorder %v394_v55, 0.0  ;;  %vm564_vm4 = vcmp.ge.f32.partialorder %v434_v56, 0.0 }
  0xb2   :  { %v708_v51 = vsel %vm579_vm1, %v471_v41, %v644_v47  ;;  %v724_v52 = vsel %vm595_vm2, %v511_v42, %v660_v48 }
  0xb3   :  { %v1164_v53 = vpack.c.bf16 %v708_v51, %v707_v49  ;;  %v1204_v54 = vpack.c.bf16 %v724_v52, %v723_v50  ;;  %v677_v5 = vsel %vm548_vm3, %v394_v55, %v613_v61  ;;  %v693_v6 = vsel %vm564_vm4, %v434_v56, %v629_v62 }
  0xb5   :  { %1252 = vst [vmem:[%s1682_s4 + $0x88] sm:$0xff] %v1164_v53   ;;  %v473_v57 = vpop.f32.mrf.mxu2  ;;  %v513_v58 = vpop.f32.mrf.mxu3 }
  0xb6   :  { %1260 = vst [vmem:[%s1682_s4 + $0xc8] sm:$0xff] %v1204_v54   ;;  %v395_v59 = vpop.f32.mrf.mxu0  ;;  %v435_v60 = vpop.f32.mrf.mxu1  ;;  %v474_v3 = vadd.f32 %v1447_v43, %v473_v57  ;;  %v514_v4 = vadd.f32 %v1447_v43, %v513_v58 }
  0xb7   :  { %v396_v63 = vadd.f32 %v1447_v43, %v395_v59  ;;  %v436_v0 = vadd.f32 %v1447_v43, %v435_v60 }
  0xb8   :  { %v645_v13 = vmul.f32 %v1454_v46, %v474_v3  ;;  %v661_v14 = vmul.f32 %v1454_v46, %v514_v4  ;;  %vm580_vm7 = vcmp.ge.f32.partialorder %v474_v3, 0.0  ;;  %vm596_vm8 = vcmp.ge.f32.partialorder %v514_v4, 0.0 }
  0xb9   :  { %vm549_vm5 = vcmp.ge.f32.partialorder %v396_v63, 0.0  ;;  %v614_v1 = vmul.f32 %v1454_v46, %v396_v63  ;;  %vm565_vm6 = vcmp.ge.f32.partialorder %v436_v0, 0.0  ;;  %v630_v2 = vmul.f32 %v1454_v46, %v436_v0 }
  0xba   :  { %v709_v21 = vsel %vm580_vm7, %v474_v3, %v645_v13  ;;  %v725_v22 = vsel %vm596_vm8, %v514_v4, %v661_v14 }
  0xbb   :  { %v678_v7 = vsel %vm549_vm5, %v396_v63, %v614_v1  ;;  %v694_v8 = vsel %vm565_vm6, %v436_v0, %v630_v2 }
  0xbc   :  { %v1089_v9 = vpack.c.bf16 %v678_v7, %v677_v5  ;;  %v1129_v10 = vpack.c.bf16 %v694_v8, %v693_v6 }
  0xbd   :  { %v475_v11 = vpop.f32.mrf.mxu2  ;;  %v515_v12 = vpop.f32.mrf.mxu3 }
  0xbe   :  { %1237 = vst [vmem:[%s1682_s4 + $0x10] sm:$0xff] %v1089_v9   ;;  %v476_v15 = vadd.f32 %v1447_v43, %v475_v11  ;;  %v516_v16 = vadd.f32 %v1447_v43, %v515_v12  ;;  %v398_v17 = vpop.f32.mrf.mxu0  ;;  %v438_v18 = vpop.f32.mrf.mxu1 }
  0xbf   :  { %1245 = vst [vmem:[%s1682_s4 + $0x50] sm:$0xff] %v1129_v10   ;;  %v399_v27 = vadd.f32 %v1447_v43, %v398_v17  ;;  %v439_v28 = vadd.f32 %v1447_v43, %v438_v18 }
  0xc0   :  { %vm581_vm9 = vcmp.ge.f32.partialorder %v476_v15, 0.0  ;;  %v646_v19 = vmul.f32 %v1454_v46, %v476_v15  ;;  %vm597_vm10 = vcmp.ge.f32.partialorder %v516_v16, 0.0  ;;  %v662_v20 = vmul.f32 %v1454_v46, %v516_v16 }
  0xc1   :  { %v615_v33 = vmul.f32 %v1454_v46, %v399_v27  ;;  %v631_v34 = vmul.f32 %v1454_v46, %v439_v28  ;;  %vm550_vm11 = vcmp.ge.f32.partialorder %v399_v27, 0.0  ;;  %vm566_vm12 = vcmp.ge.f32.partialorder %v439_v28, 0.0 }
  0xc2   :  { %v710_v23 = vsel %vm581_vm9, %v476_v15, %v646_v19  ;;  %v726_v24 = vsel %vm597_vm10, %v516_v16, %v662_v20 }
  0xc3   :  { %v1169_v25 = vpack.c.bf16 %v710_v23, %v709_v21  ;;  %v1209_v26 = vpack.c.bf16 %v726_v24, %v725_v22  ;;  %v679_v41 = vsel %vm550_vm11, %v399_v27, %v615_v33  ;;  %v695_v42 = vsel %vm566_vm12, %v439_v28, %v631_v34 }
  0xc5   :  { %1253 = vst [vmem:[%s1682_s4 + $0x90] sm:$0xff] %v1169_v25   ;;  %v478_v29 = vpop.f32.mrf.mxu2  ;;  %v518_v30 = vpop.f32.mrf.mxu3 }
  0xc6   :  { %1261 = vst [vmem:[%s1682_s4 + $0xd0] sm:$0xff] %v1209_v26   ;;  %v400_v31 = vpop.f32.mrf.mxu0  ;;  %v440_v32 = vpop.f32.mrf.mxu1  ;;  %v479_v39 = vadd.f32 %v1447_v43, %v478_v29  ;;  %v519_v40 = vadd.f32 %v1447_v43, %v518_v30 }
  0xc7   :  { %v401_v35 = vadd.f32 %v1447_v43, %v400_v31  ;;  %v441_v36 = vadd.f32 %v1447_v43, %v440_v32 }
  0xc8   :  { %v647_v51 = vmul.f32 %v1454_v46, %v479_v39  ;;  %v663_v52 = vmul.f32 %v1454_v46, %v519_v40  ;;  %vm582_vm15 = vcmp.ge.f32.partialorder %v479_v39, 0.0  ;;  %vm598_vm0 = vcmp.ge.f32.partialorder %v519_v40, 0.0 }
  0xc9   :  { %vm551_vm13 = vcmp.ge.f32.partialorder %v401_v35, 0.0  ;;  %v616_v37 = vmul.f32 %v1454_v46, %v401_v35  ;;  %vm567_vm14 = vcmp.ge.f32.partialorder %v441_v36, 0.0  ;;  %v632_v38 = vmul.f32 %v1454_v46, %v441_v36 }
  0xca   :  { %v711_v59 = vsel %vm582_vm15, %v479_v39, %v647_v51  ;;  %v727_v60 = vsel %vm598_vm0, %v519_v40, %v663_v52 }
  0xcb   :  { %v680_v44 = vsel %vm551_vm13, %v401_v35, %v616_v37  ;;  %v696_v45 = vsel %vm567_vm14, %v441_v36, %v632_v38 }
  0xcc   :  { %v1094_v47 = vpack.c.bf16 %v680_v44, %v679_v41  ;;  %v1134_v48 = vpack.c.bf16 %v696_v45, %v695_v42 }
  0xcd   :  { %v480_v49 = vpop.f32.mrf.mxu2  ;;  %v520_v50 = vpop.f32.mrf.mxu3 }
  0xce   :  { %1238 = vst [vmem:[%s1682_s4 + $0x18] sm:$0xff] %v1094_v47   ;;  %v481_v53 = vadd.f32 %v1447_v43, %v480_v49  ;;  %v521_v54 = vadd.f32 %v1447_v43, %v520_v50  ;;  %v403_v55 = vpop.f32.mrf.mxu0  ;;  %v443_v56 = vpop.f32.mrf.mxu1 }
  0xcf   :  { %1246 = vst [vmem:[%s1682_s4 + $0x58] sm:$0xff] %v1134_v48   ;;  %v404_v1 = vadd.f32 %v1447_v43, %v403_v55  ;;  %v444_v2 = vadd.f32 %v1447_v43, %v443_v56 }
  0xd0   :  { %vm583_vm1 = vcmp.ge.f32.partialorder %v481_v53, 0.0  ;;  %v648_v57 = vmul.f32 %v1454_v46, %v481_v53  ;;  %vm599_vm2 = vcmp.ge.f32.partialorder %v521_v54, 0.0  ;;  %v664_v58 = vmul.f32 %v1454_v46, %v521_v54 }
  0xd1   :  { %v617_v7 = vmul.f32 %v1454_v46, %v404_v1  ;;  %v633_v8 = vmul.f32 %v1454_v46, %v444_v2  ;;  %vm552_vm3 = vcmp.ge.f32.partialorder %v404_v1, 0.0  ;;  %vm568_vm4 = vcmp.ge.f32.partialorder %v444_v2, 0.0 }
  0xd2   :  { %v712_v61 = vsel %vm583_vm1, %v481_v53, %v648_v57  ;;  %v728_v62 = vsel %vm599_vm2, %v521_v54, %v664_v58 }
  0xd3   :  { %v1174_v63 = vpack.c.bf16 %v712_v61, %v711_v59  ;;  %v1214_v0 = vpack.c.bf16 %v728_v62, %v727_v60  ;;  %v681_v15 = vsel %vm552_vm3, %v404_v1, %v617_v7  ;;  %v697_v16 = vsel %vm568_vm4, %v444_v2, %v633_v8 }
  0xd5   :  { %1254 = vst [vmem:[%s1682_s4 + $0x98] sm:$0xff] %v1174_v63   ;;  %v483_v3 = vpop.f32.mrf.mxu2  ;;  %v523_v4 = vpop.f32.mrf.mxu3 }
  0xd6   :  { %1262 = vst [vmem:[%s1682_s4 + $0xd8] sm:$0xff] %v1214_v0   ;;  %v405_v5 = vpop.f32.mrf.mxu0  ;;  %v445_v6 = vpop.f32.mrf.mxu1  ;;  %v484_v13 = vadd.f32 %v1447_v43, %v483_v3  ;;  %v524_v14 = vadd.f32 %v1447_v43, %v523_v4 }
  0xd7   :  { %v406_v9 = vadd.f32 %v1447_v43, %v405_v5  ;;  %v446_v10 = vadd.f32 %v1447_v43, %v445_v6 }
  0xd8   :  { %v649_v23 = vmul.f32 %v1454_v46, %v484_v13  ;;  %v665_v24 = vmul.f32 %v1454_v46, %v524_v14  ;;  %vm584_vm7 = vcmp.ge.f32.partialorder %v484_v13, 0.0  ;;  %vm600_vm8 = vcmp.ge.f32.partialorder %v524_v14, 0.0 }
  0xd9   :  { %vm553_vm5 = vcmp.ge.f32.partialorder %v406_v9, 0.0  ;;  %v618_v11 = vmul.f32 %v1454_v46, %v406_v9  ;;  %vm569_vm6 = vcmp.ge.f32.partialorder %v446_v10, 0.0  ;;  %v634_v12 = vmul.f32 %v1454_v46, %v446_v10 }
  0xda   :  { %v713_v31 = vsel %vm584_vm7, %v484_v13, %v649_v23  ;;  %v729_v32 = vsel %vm600_vm8, %v524_v14, %v665_v24 }
  0xdb   :  { %v682_v17 = vsel %vm553_vm5, %v406_v9, %v618_v11  ;;  %v698_v18 = vsel %vm569_vm6, %v446_v10, %v634_v12 }
  0xdc   :  { %v1099_v19 = vpack.c.bf16 %v682_v17, %v681_v15  ;;  %v1139_v20 = vpack.c.bf16 %v698_v18, %v697_v16 }
  0xdd   :  { %v485_v21 = vpop.f32.mrf.mxu2  ;;  %v525_v22 = vpop.f32.mrf.mxu3 }
  0xde   :  { %1239 = vst [vmem:[%s1682_s4 + $0x20] sm:$0xff] %v1099_v19   ;;  %v486_v25 = vadd.f32 %v1447_v43, %v485_v21  ;;  %v526_v26 = vadd.f32 %v1447_v43, %v525_v22  ;;  %v408_v27 = vpop.f32.mrf.mxu0  ;;  %v448_v28 = vpop.f32.mrf.mxu1 }
  0xdf   :  { %1247 = vst [vmem:[%s1682_s4 + $0x60] sm:$0xff] %v1139_v20   ;;  %v409_v37 = vadd.f32 %v1447_v43, %v408_v27  ;;  %v449_v38 = vadd.f32 %v1447_v43, %v448_v28 }
  0xe0   :  { %vm585_vm9 = vcmp.ge.f32.partialorder %v486_v25, 0.0  ;;  %v650_v29 = vmul.f32 %v1454_v46, %v486_v25  ;;  %vm601_vm10 = vcmp.ge.f32.partialorder %v526_v26, 0.0  ;;  %v666_v30 = vmul.f32 %v1454_v46, %v526_v26 }
  0xe1   :  { %v619_v44 = vmul.f32 %v1454_v46, %v409_v37  ;;  %v635_v45 = vmul.f32 %v1454_v46, %v449_v38  ;;  %vm554_vm11 = vcmp.ge.f32.partialorder %v409_v37, 0.0  ;;  %vm570_vm12 = vcmp.ge.f32.partialorder %v449_v38, 0.0 }
  0xe2   :  { %v714_v33 = vsel %vm585_vm9, %v486_v25, %v650_v29  ;;  %v730_v34 = vsel %vm601_vm10, %v526_v26, %v666_v30 }
  0xe3   :  { %v1179_v35 = vpack.c.bf16 %v714_v33, %v713_v31  ;;  %v1219_v36 = vpack.c.bf16 %v730_v34, %v729_v32  ;;  %v683_v53 = vsel %vm554_vm11, %v409_v37, %v619_v44  ;;  %v699_v54 = vsel %vm570_vm12, %v449_v38, %v635_v45 }
  0xe5   :  { %1255 = vst [vmem:[%s1682_s4 + $0xa0] sm:$0xff] %v1179_v35   ;;  %v488_v39 = vpop.f32.mrf.mxu2  ;;  %v528_v40 = vpop.f32.mrf.mxu3 }
  0xe6   :  { %1263 = vst [vmem:[%s1682_s4 + $0xe0] sm:$0xff] %v1219_v36   ;;  %v410_v41 = vpop.f32.mrf.mxu0  ;;  %v450_v42 = vpop.f32.mrf.mxu1  ;;  %v489_v51 = vadd.f32 %v1447_v43, %v488_v39  ;;  %v529_v52 = vadd.f32 %v1447_v43, %v528_v40 }
  0xe7   :  { %v411_v47 = vadd.f32 %v1447_v43, %v410_v41  ;;  %v451_v48 = vadd.f32 %v1447_v43, %v450_v42 }
  0xe8   :  { %v651_v61 = vmul.f32 %v1454_v46, %v489_v51  ;;  %v667_v62 = vmul.f32 %v1454_v46, %v529_v52  ;;  %vm586_vm15 = vcmp.ge.f32.partialorder %v489_v51, 0.0  ;;  %vm602_vm0 = vcmp.ge.f32.partialorder %v529_v52, 0.0 }
  0xe9   :  { %vm555_vm13 = vcmp.ge.f32.partialorder %v411_v47, 0.0  ;;  %v620_v49 = vmul.f32 %v1454_v46, %v411_v47  ;;  %vm571_vm14 = vcmp.ge.f32.partialorder %v451_v48, 0.0  ;;  %v636_v50 = vmul.f32 %v1454_v46, %v451_v48 }
  0xea   :  { %v715_v5 = vsel %vm586_vm15, %v489_v51, %v651_v61  ;;  %v731_v6 = vsel %vm602_vm0, %v529_v52, %v667_v62 }
  0xeb   :  { %v684_v55 = vsel %vm555_vm13, %v411_v47, %v620_v49  ;;  %v700_v56 = vsel %vm571_vm14, %v451_v48, %v636_v50 }
  0xec   :  { %v1104_v57 = vpack.c.bf16 %v684_v55, %v683_v53  ;;  %v1144_v58 = vpack.c.bf16 %v700_v56, %v699_v54 }
  0xed   :  { %v490_v59 = vpop.f32.mrf.mxu2  ;;  %v530_v60 = vpop.f32.mrf.mxu3 }
  0xee   :  { %1240 = vst [vmem:[%s1682_s4 + $0x28] sm:$0xff] %v1104_v57   ;;  %v491_v63 = vadd.f32 %v1447_v43, %v490_v59  ;;  %v531_v0 = vadd.f32 %v1447_v43, %v530_v60  ;;  %v413_v1 = vpop.f32.mrf.mxu0  ;;  %v453_v2 = vpop.f32.mrf.mxu1 }
  0xef   :  { %1248 = vst [vmem:[%s1682_s4 + $0x68] sm:$0xff] %v1144_v58   ;;  %v414_v11 = vadd.f32 %v1447_v43, %v413_v1  ;;  %v454_v12 = vadd.f32 %v1447_v43, %v453_v2 }
  0xf0   :  { %vm587_vm1 = vcmp.ge.f32.partialorder %v491_v63, 0.0  ;;  %v652_v3 = vmul.f32 %v1454_v46, %v491_v63  ;;  %vm603_vm2 = vcmp.ge.f32.partialorder %v531_v0, 0.0  ;;  %v668_v4 = vmul.f32 %v1454_v46, %v531_v0 }
  0xf1   :  { %v621_v17 = vmul.f32 %v1454_v46, %v414_v11  ;;  %v637_v18 = vmul.f32 %v1454_v46, %v454_v12  ;;  %vm556_vm3 = vcmp.ge.f32.partialorder %v414_v11, 0.0  ;;  %vm572_vm4 = vcmp.ge.f32.partialorder %v454_v12, 0.0 }
  0xf2   :  { %v716_v7 = vsel %vm587_vm1, %v491_v63, %v652_v3  ;;  %v732_v8 = vsel %vm603_vm2, %v531_v0, %v668_v4 }
  0xf3   :  { %v1184_v9 = vpack.c.bf16 %v716_v7, %v715_v5  ;;  %v1224_v10 = vpack.c.bf16 %v732_v8, %v731_v6  ;;  %v685_v25 = vsel %vm556_vm3, %v414_v11, %v621_v17  ;;  %v701_v26 = vsel %vm572_vm4, %v454_v12, %v637_v18 }
  0xf5   :  { %1256 = vst [vmem:[%s1682_s4 + $0xa8] sm:$0xff] %v1184_v9   ;;  %v493_v13 = vpop.f32.mrf.mxu2  ;;  %v533_v14 = vpop.f32.mrf.mxu3 }
  0xf6   :  { %1264 = vst [vmem:[%s1682_s4 + $0xe8] sm:$0xff] %v1224_v10   ;;  %v415_v15 = vpop.f32.mrf.mxu0  ;;  %v455_v16 = vpop.f32.mrf.mxu1  ;;  %v494_v23 = vadd.f32 %v1447_v43, %v493_v13  ;;  %v534_v24 = vadd.f32 %v1447_v43, %v533_v14 }
  0xf7   :  { %v416_v19 = vadd.f32 %v1447_v43, %v415_v15  ;;  %v456_v20 = vadd.f32 %v1447_v43, %v455_v16 }
  0xf8   :  { %v653_v33 = vmul.f32 %v1454_v46, %v494_v23  ;;  %v669_v34 = vmul.f32 %v1454_v46, %v534_v24  ;;  %vm588_vm7 = vcmp.ge.f32.partialorder %v494_v23, 0.0  ;;  %vm604_vm8 = vcmp.ge.f32.partialorder %v534_v24, 0.0 }
  0xf9   :  { %vm557_vm5 = vcmp.ge.f32.partialorder %v416_v19, 0.0  ;;  %v622_v21 = vmul.f32 %v1454_v46, %v416_v19  ;;  %vm573_vm6 = vcmp.ge.f32.partialorder %v456_v20, 0.0  ;;  %v638_v22 = vmul.f32 %v1454_v46, %v456_v20 }
  0xfa   :  { %v717_v41 = vsel %vm588_vm7, %v494_v23, %v653_v33  ;;  %v733_v42 = vsel %vm604_vm8, %v534_v24, %v669_v34 }
  0xfb   :  { %v686_v27 = vsel %vm557_vm5, %v416_v19, %v622_v21  ;;  %v702_v28 = vsel %vm573_vm6, %v456_v20, %v638_v22 }
  0xfc   :  { %v1109_v29 = vpack.c.bf16 %v686_v27, %v685_v25  ;;  %v1149_v30 = vpack.c.bf16 %v702_v28, %v701_v26 }
  0xfd   :  { %v495_v31 = vpop.f32.mrf.mxu2  ;;  %v535_v32 = vpop.f32.mrf.mxu3 }
  0xfe   :  { %1241 = vst [vmem:[%s1682_s4 + $0x30] sm:$0xff] %v1109_v29   ;;  %v496_v35 = vadd.f32 %v1447_v43, %v495_v31  ;;  %v536_v36 = vadd.f32 %v1447_v43, %v535_v32  ;;  %v418_v37 = vpop.f32.mrf.mxu0  ;;  %v458_v38 = vpop.f32.mrf.mxu1 }
  0xff   :  { %1249 = vst [vmem:[%s1682_s4 + $0x70] sm:$0xff] %v1149_v30   ;;  %v419_v49 = vadd.f32 %v1447_v43, %v418_v37  ;;  %v459_v50 = vadd.f32 %v1447_v43, %v458_v38 }
 0x100   :  { %vm589_vm9 = vcmp.ge.f32.partialorder %v496_v35, 0.0  ;;  %v654_v39 = vmul.f32 %v1454_v46, %v496_v35  ;;  %vm605_vm10 = vcmp.ge.f32.partialorder %v536_v36, 0.0  ;;  %v670_v40 = vmul.f32 %v1454_v46, %v536_v36 }
 0x101   :  { %v623_v55 = vmul.f32 %v1454_v46, %v419_v49  ;;  %v639_v56 = vmul.f32 %v1454_v46, %v459_v50  ;;  %vm558_vm11 = vcmp.ge.f32.partialorder %v419_v49, 0.0  ;;  %vm574_vm12 = vcmp.ge.f32.partialorder %v459_v50, 0.0 }
 0x102   :  { %v718_v44 = vsel %vm589_vm9, %v496_v35, %v654_v39  ;;  %v734_v45 = vsel %vm605_vm10, %v536_v36, %v670_v40 }
 0x103   :  { %v1189_v47 = vpack.c.bf16 %v718_v44, %v717_v41  ;;  %v1229_v48 = vpack.c.bf16 %v734_v45, %v733_v42  ;;  %v687_v63 = vsel %vm558_vm11, %v419_v49, %v623_v55  ;;  %v703_v0 = vsel %vm574_vm12, %v459_v50, %v639_v56 }
 0x105   :  { %1257 = vst [vmem:[%s1682_s4 + $0xb0] sm:$0xff] %v1189_v47   ;;  %v498_v51 = vpop.f32.mrf.mxu2  ;;  %v538_v52 = vpop.f32.mrf.mxu3 }
 0x106   :  { %1265 = vst [vmem:[%s1682_s4 + $0xf0] sm:$0xff] %v1229_v48   ;;  %v420_v53 = vpop.f32.mrf.mxu0  ;;  %v460_v54 = vpop.f32.mrf.mxu1  ;;  %v499_v61 = vadd.f32 %v1447_v43, %v498_v51  ;;  %v539_v62 = vadd.f32 %v1447_v43, %v538_v52 }
 0x107   :  { %v421_v57 = vadd.f32 %v1447_v43, %v420_v53  ;;  %v461_v58 = vadd.f32 %v1447_v43, %v460_v54 }
 0x108   :  { %v655_v7 = vmul.f32 %v1454_v46, %v499_v61  ;;  %v671_v8 = vmul.f32 %v1454_v46, %v539_v62  ;;  %vm590_vm15 = vcmp.ge.f32.partialorder %v499_v61, 0.0  ;;  %vm606_vm0 = vcmp.ge.f32.partialorder %v539_v62, 0.0 }
 0x109   :  { %vm559_vm13 = vcmp.ge.f32.partialorder %v421_v57, 0.0  ;;  %v624_v59 = vmul.f32 %v1454_v46, %v421_v57  ;;  %vm575_vm14 = vcmp.ge.f32.partialorder %v461_v58, 0.0  ;;  %v640_v60 = vmul.f32 %v1454_v46, %v461_v58 }
 0x10a   :  { %v719_v13 = vsel %vm590_vm15, %v499_v61, %v655_v7  ;;  %v735_v14 = vsel %vm606_vm0, %v539_v62, %v671_v8 }
 0x10b   :  { %v688_v1 = vsel %vm559_vm13, %v421_v57, %v624_v59  ;;  %v704_v2 = vsel %vm575_vm14, %v461_v58, %v640_v60 }
 0x10c   :  { %v1114_v3 = vpack.c.bf16 %v688_v1, %v687_v63  ;;  %v1154_v4 = vpack.c.bf16 %v704_v2, %v703_v0 }
 0x10d   :  { %v500_v5 = vpop.f32.mrf.mxu2  ;;  %v540_v6 = vpop.f32.mrf.mxu3 }
 0x10e   :  { %1242 = vst [vmem:[%s1682_s4 + $0x38] sm:$0xff] %v1114_v3   ;;  %v501_v9 = vadd.f32 %v1447_v43, %v500_v5  ;;  %v541_v10 = vadd.f32 %v1447_v43, %v540_v6 }
 0x10f   :  { %1250 = vst [vmem:[%s1682_s4 + $0x78] sm:$0xff] %v1154_v4  }
 0x110   :  { %vm591_vm1 = vcmp.ge.f32.partialorder %v501_v9, 0.0  ;;  %v656_v11 = vmul.f32 %v1454_v46, %v501_v9  ;;  %vm607_vm2 = vcmp.ge.f32.partialorder %v541_v10, 0.0  ;;  %v672_v12 = vmul.f32 %v1454_v46, %v541_v10 }
 0x112   :  { %v720_v15 = vsel %vm591_vm1, %v501_v9, %v656_v11  ;;  %v736_v16 = vsel %vm607_vm2, %v541_v10, %v672_v12 }
 0x113   :  { %v1194_v17 = vpack.c.bf16 %v720_v15, %v719_v13  ;;  %v1234_v18 = vpack.c.bf16 %v736_v16, %v735_v14 }
 0x115   :  { %1258 = vst [vmem:[%s1682_s4 + $0xb8] sm:$0xff] %v1194_v17  }
 0x116   :  { %1266 = vst [vmem:[%s1682_s4 + $0xf8] sm:$0xff] %v1234_v18  }

// kernel: upblock1_forward.4
= control target key start
LH: loop header
LB: loop body
LE: loop exit
PB: predicated region body
PF: predicated region fallthrough
CT: control target
= control target key end

     0   :  { %vm1306_vm0 = vcmask 523264   ;;  %s5817_s1 = inlined_call_operand.vmem [shape: bf16[576,128], index: 1, kind: input, shape index: {}]   ;;  %s5818_s2 = inlined_call_operand.vmem [shape: f32[1,128], index: 2, kind: input, shape index: {}]   ;;  %s5819_s0 = inlined_call_operand.vmem [shape: bf16[512,576], index: 0, kind: input, shape index: {}]   ;;  %s5820_s3 = inlined_call_operand.<no memory space> [shape: f32[1,1], index: 3, kind: input, shape index: {}]   ;;  %s5821_s4 = inlined_call_operand.vmem [shape: bf16[512,128], index: 4, kind: input, shape index: {}]   ;;  %s5822_s5 = inlined_call_operand.vmem [shape: bf16[512,128], index: 5, kind: output, shape index: {}]  }
   0x1   :  { %v3749_v0 = vld [vmem:[%s5817_s1 + $0x38] sm:$0xff]  ;;  %v3748_v1 = vld [vmem:[%s5817_s1 + $0x30] sm:$0xff]  ;;  %v3747_v2 = vld [vmem:[%s5817_s1 + $0x28] sm:$0xff] }
   0x2   :  { %4128 = vmatpush.bf16.msra.mxu1 %v3749_v0  ;;  %4129 = vmatpush.bf16.msra.mxu2 %v3749_v0  ;;  %v3746_v3 = vld [vmem:[%s5817_s1 + $0x20] sm:$0xff]  ;;  %v3745_v4 = vld [vmem:[%s5817_s1 + $0x18] sm:$0xff]  ;;  %v3744_v5 = vld [vmem:[%s5817_s1 + $0x10] sm:$0xff] }
   0x3   :  { %4130 = vmatpush.bf16.msra.mxu3 %v3749_v0  ;;  %1403 = vmatpush.bf16.msra.mxu0 %v3749_v0  ;;  %v3743_v6 = vld [vmem:[%s5817_s1 + $0x8] sm:$0xff]  ;;  %v3742_v7 = vld [vmem:[%s5817_s1] sm:$0xff]  ;;  %v3624_v9 = vld [vmem:[%s5819_s0 + $0x150] sm:$0xf0] }
   0x4   :  { %v2928_v8 = vld [vmem:[%s5819_s0 + $0x140] sm:$0xf]  ;;  %v3664_v11 = vld [vmem:[%s5819_s0 + $0x290] sm:$0xf0]  ;;  %v3765_v16 = vld [vmem:[%s5817_s1 + $0xb8] sm:$0xff] }
   0x5   :  { %v3088_v10 = vld [vmem:[%s5819_s0 + $0x280] sm:$0xf]  ;;  %v3704_v13 = vld [vmem:[%s5819_s0 + $0x3d0] sm:$0xf0]  ;;  %v3773_v17 = vld [vmem:[%s5817_s1 + $0xf8] sm:$0xff]  ;;  %v2929_v18 = vor.u32 %v3624_v9, %v2928_v8 }
   0x6   :  { %4131 = vmatpush.bf16.msra.mxu1 %v3748_v1  ;;  %4132 = vmatpush.bf16.msra.mxu2 %v3748_v1  ;;  %v3248_v12 = vld [vmem:[%s5819_s0 + $0x3c0] sm:$0xf]  ;;  %v3584_v15 = vld [vmem:[%s5819_s0 + $0x10] sm:$0xf0]  ;;  %v3089_v19 = vor.u32 %v3664_v11, %v3088_v10  ;;  %v3757_v22 = vld [vmem:[%s5817_s1 + $0x78] sm:$0xff] }
   0x7   :  { %4133 = vmatpush.bf16.msra.mxu3 %v3748_v1  ;;  %1404 = vmatpush.bf16.msra.mxu0 %v3748_v1  ;;  %v2768_v14 = vld [vmem:[%s5819_s0] sm:$0xf]  ;;  %v3249_v20 = vor.u32 %v3704_v13, %v3248_v12  ;;  %v3777_v23 = vld [vmem:[%s5817_s1 + $0x118] sm:$0xff]  ;;  %v3764_v24 = vld [vmem:[%s5817_s1 + $0xb0] sm:$0xff] }
   0x8   :  { %v2769_v21 = vor.u32 %v3584_v15, %v2768_v14  ;;  %v3772_v25 = vld [vmem:[%s5817_s1 + $0xf0] sm:$0xff]  ;;  %v3763_v28 = vld [vmem:[%s5817_s1 + $0xa8] sm:$0xff]  ;;  %v3629_v32 = vld [vmem:[%s5819_s0 + $0x178] sm:$0xf0] }
   0x9   :  { %v3756_v26 = vld [vmem:[%s5817_s1 + $0x70] sm:$0xff]  ;;  %v3771_v29 = vld [vmem:[%s5817_s1 + $0xe8] sm:$0xff]  ;;  %v3669_v34 = vld [vmem:[%s5819_s0 + $0x2b8] sm:$0xf0] }
   0xa   :  { %4134 = vmatpush.bf16.msra.mxu1 %v3747_v2  ;;  %4135 = vmatpush.bf16.msra.mxu2 %v3747_v2  ;;  %v3776_v27 = vld [vmem:[%s5817_s1 + $0x110] sm:$0xff]  ;;  %v3755_v30 = vld [vmem:[%s5817_s1 + $0x68] sm:$0xff]  ;;  %v3709_v36 = vld [vmem:[%s5819_s0 + $0x3f8] sm:$0xf0] }
   0xb   :  { %4136 = vmatpush.bf16.msra.mxu3 %v3747_v2  ;;  %1405 = vmatpush.bf16.msra.mxu0 %v3747_v2  ;;  %v2948_v31 = vld [vmem:[%s5819_s0 + $0x168] sm:$0xf]  ;;  %v3589_v38 = vld [vmem:[%s5819_s0 + $0x38] sm:$0xf0]  ;;  %v3762_v43 = vld [vmem:[%s5817_s1 + $0xa0] sm:$0xff] }
   0xc   :  { %v3108_v33 = vld [vmem:[%s5819_s0 + $0x2a8] sm:$0xf]  ;;  %v2949_v39 = vor.u32 %v3629_v32, %v2948_v31  ;;  %v3770_v44 = vld [vmem:[%s5817_s1 + $0xe0] sm:$0xff]  ;;  %v2968_v46 = vld [vmem:[%s5819_s0 + $0x190] sm:$0xf] }
   0xd   :  { %v3268_v35 = vld [vmem:[%s5819_s0 + $0x3e8] sm:$0xf]  ;;  %v3109_v40 = vor.u32 %v3669_v34, %v3108_v33  ;;  %v3754_v45 = vld [vmem:[%s5817_s1 + $0x60] sm:$0xff]  ;;  %v3128_v48 = vld [vmem:[%s5819_s0 + $0x2d0] sm:$0xf] }
   0xe   :  { %4137 = vmatpush.bf16.msra.mxu1 %v3746_v3  ;;  %4138 = vmatpush.bf16.msra.mxu2 %v3746_v3  ;;  %v2788_v37 = vld [vmem:[%s5819_s0 + $0x28] sm:$0xf]  ;;  %v3269_v41 = vor.u32 %v3709_v36, %v3268_v35  ;;  %v3634_v47 = vld [vmem:[%s5819_s0 + $0x1a0] sm:$0xf0]  ;;  %v3288_v50 = vld [vmem:[%s5819_s0 + $0x410] sm:$0xf] }
   0xf   :  { %4139 = vmatpush.bf16.msra.mxu3 %v3746_v3  ;;  %1406 = vmatpush.bf16.msra.mxu0 %v3746_v3  ;;  %v2789_v42 = vor.u32 %v3589_v38, %v2788_v37  ;;  %v3674_v49 = vld [vmem:[%s5819_s0 + $0x2e0] sm:$0xf0]  ;;  %v2808_v52 = vld [vmem:[%s5819_s0 + $0x50] sm:$0xf]  ;;  %v2969_v54 = vor.u32 %v3634_v47, %v2968_v46  ;;  %v3761_v58 = vld [vmem:[%s5817_s1 + $0x98] sm:$0xff] }
  0x10   :  { %v3714_v51 = vld [vmem:[%s5819_s0 + $0x420] sm:$0xf0]  ;;  %v3129_v55 = vor.u32 %v3674_v49, %v3128_v48  ;;  %v3769_v59 = vld [vmem:[%s5817_s1 + $0xd8] sm:$0xff]  ;;  %v3775_v61 = vld [vmem:[%s5817_s1 + $0x108] sm:$0xff] }
  0x11   :  { %v3594_v53 = vld [vmem:[%s5819_s0 + $0x60] sm:$0xf0]  ;;  %v3289_v56 = vor.u32 %v3714_v51, %v3288_v50  ;;  %v3753_v60 = vld [vmem:[%s5817_s1 + $0x58] sm:$0xff]  ;;  %v3639_v63 = vld [vmem:[%s5819_s0 + $0x1c8] sm:$0xf0] }
  0x12   :  { %4140 = vmatpush.bf16.msra.mxu1 %v3745_v4  ;;  %4141 = vmatpush.bf16.msra.mxu2 %v3745_v4  ;;  %v2809_v57 = vor.u32 %v3594_v53, %v2808_v52  ;;  %v2988_v62 = vld [vmem:[%s5819_s0 + $0x1b8] sm:$0xf]  ;;  %v3679_v1 = vld [vmem:[%s5819_s0 + $0x308] sm:$0xf0]  ;;  %v3760_v10 = vld [vmem:[%s5817_s1 + $0x90] sm:$0xff] }
  0x13   :  { %4142 = vmatpush.bf16.msra.mxu3 %v3745_v4  ;;  %1407 = vmatpush.bf16.msra.mxu0 %v3745_v4  ;;  %v3148_v0 = vld [vmem:[%s5819_s0 + $0x2f8] sm:$0xf]  ;;  %v3719_v3 = vld [vmem:[%s5819_s0 + $0x448] sm:$0xf0]  ;;  %v3768_v11 = vld [vmem:[%s5817_s1 + $0xd0] sm:$0xff] }
  0x14   :  { %v3308_v2 = vld [vmem:[%s5819_s0 + $0x438] sm:$0xf]  ;;  %v3752_v12 = vld [vmem:[%s5817_s1 + $0x50] sm:$0xff]  ;;  %v3008_v13 = vld [vmem:[%s5819_s0 + $0x1e0] sm:$0xf] }
  0x15   :  { %v2828_v4 = vld [vmem:[%s5819_s0 + $0x78] sm:$0xf]  ;;  %v3309_v8 = vor.u32 %v3719_v3, %v3308_v2  ;;  %v3644_v14 = vld [vmem:[%s5819_s0 + $0x1f0] sm:$0xf0]  ;;  %v3168_v15 = vld [vmem:[%s5819_s0 + $0x320] sm:$0xf] }
  0x16   :  { %4143 = vmatpush.bf16.msra.mxu1 %v3744_v5  ;;  %4144 = vmatpush.bf16.msra.mxu2 %v3744_v5  ;;  %v3188_v31 = vld [vmem:[%s5819_s0 + $0x348] sm:$0xf]  ;;  %v3689_v32 = vld [vmem:[%s5819_s0 + $0x358] sm:$0xf0]  ;;  %v3208_v46 = vld [vmem:[%s5819_s0 + $0x370] sm:$0xf] }
  0x17   :  { %4145 = vmatpush.bf16.msra.mxu3 %v3744_v5  ;;  %1408 = vmatpush.bf16.msra.mxu0 %v3744_v5  ;;  %v3599_v5 = vld [vmem:[%s5819_s0 + $0x88] sm:$0xf0]  ;;  %v3348_v33 = vld [vmem:[%s5819_s0 + $0x488] sm:$0xf]  ;;  %v3729_v34 = vld [vmem:[%s5819_s0 + $0x498] sm:$0xf0]  ;;  %v3189_v38 = vor.u32 %v3689_v32, %v3188_v31 }
  0x18   :  { %v2829_v9 = vor.u32 %v3599_v5, %v2828_v4  ;;  %v2868_v35 = vld [vmem:[%s5819_s0 + $0xc8] sm:$0xf]  ;;  %v3609_v36 = vld [vmem:[%s5819_s0 + $0xd8] sm:$0xf0]  ;;  %v3694_v47 = vld [vmem:[%s5819_s0 + $0x380] sm:$0xf0] }
  0x19   :  { %v3368_v48 = vld [vmem:[%s5819_s0 + $0x4b0] sm:$0xf]  ;;  %v3734_v49 = vld [vmem:[%s5819_s0 + $0x4c0] sm:$0xf0]  ;;  %v3209_v53 = vor.u32 %v3694_v47, %v3208_v46  ;;  %v2770_v5 = vld [vmem:[%s5819_s0 + $0x14] sm:$0xf0] }
  0x1a   :  { %4146 = vmatpush.bf16.msra.mxu1 %v3743_v6  ;;  %4147 = vmatpush.bf16.msra.mxu2 %v3743_v6  ;;  %v2888_v50 = vld [vmem:[%s5819_s0 + $0xf0] sm:$0xf]  ;;  %v3614_v51 = vld [vmem:[%s5819_s0 + $0x100] sm:$0xf0]  ;;  %v3593_v46 = vld [vmem:[%s5819_s0 + $0x5c] sm:$0xf] }
  0x1b   :  { %4148 = vmatpush.bf16.msra.mxu3 %v3743_v6  ;;  %1409 = vmatpush.bf16.msra.mxu0 %v3743_v6  ;;  %v2989_v6 = vor.u32 %v3639_v63, %v2988_v62  ;;  %v2908_v62 = vld [vmem:[%s5819_s0 + $0x118] sm:$0xf]  ;;  %v3619_v63 = vld [vmem:[%s5819_s0 + $0x128] sm:$0xf0]  ;;  %v3582_v4 = vld [vmem:[%s5819_s0 + $0x4] sm:$0xf] }
  0x1c   :  { %v2909_v3 = vor.u32 %v3619_v63, %v2908_v62  ;;  %v2818_v47 = vld [vmem:[%s5819_s0 + $0x6c] sm:$0xf0]  ;;  %v3597_v62 = vld [vmem:[%s5819_s0 + $0x7c] sm:$0xf] }
  0x1d   :  { %v2830_v63 = vld [vmem:[%s5819_s0 + $0x8c] sm:$0xf0] }
  0x1e   :  { %4149 = vmatpush.bf16.msra.mxu1 %v3742_v7  ;;  %4150 = vmatpush.bf16.msra.mxu2 %v3742_v7 }
  0x1f   :  { %4151 = vmatpush.bf16.msra.mxu3 %v3742_v7  ;;  %1410 = vmatpush.bf16.msra.mxu0 %v3742_v7  ;;  %v3149_v7 = vor.u32 %v3679_v1, %v3148_v0 }
  0x21   :  { %1451 = vmatmul.bf16.vlgmr.msra.gmra.mxu1 %v2929_v18  ;;  %1491 = vmatmul.bf16.vlgmr.msra.gmra.mxu2 %v3089_v19  ;;  %v3724_v18 = vld [vmem:[%s5819_s0 + $0x470] sm:$0xf0]  ;;  %v2848_v19 = vld [vmem:[%s5819_s0 + $0xa0] sm:$0xf] }
  0x22   :  { %1741 = vmatpush.bf16.msrb.mxu2 %v3765_v16  ;;  %1531 = vmatmul.bf16.vlgmr.msra.gmra.mxu3 %v3249_v20  ;;  %v3684_v16 = vld [vmem:[%s5819_s0 + $0x330] sm:$0xf0] }
  0x23   :  { %1910 = vmatpush.bf16.msrb.mxu3 %v3773_v17  ;;  %1411 = vmatmul.bf16.vlgmr.msra.gmra.mxu0 %v2769_v21  ;;  %v3328_v17 = vld [vmem:[%s5819_s0 + $0x460] sm:$0xf]  ;;  %v3604_v20 = vld [vmem:[%s5819_s0 + $0xb0] sm:$0xf0]  ;;  %v3009_v21 = vor.u32 %v3644_v14, %v3008_v13 }
  0x24   :  { %1572 = vmatpush.bf16.msrb.mxu1 %v3757_v22  ;;  %2083 = vmatpush.bf16.msrb.mxu0 %v3777_v23  ;;  %v3169_v22 = vor.u32 %v3684_v16, %v3168_v15  ;;  %v3329_v23 = vor.u32 %v3724_v18, %v3328_v17 }
  0x26   :  { %1742 = vmatpush.bf16.msrb.mxu2 %v3764_v24  ;;  %v2849_v24 = vor.u32 %v3604_v20, %v2848_v19 }
  0x27   :  { %1911 = vmatpush.bf16.msrb.mxu3 %v3772_v25  ;;  %v3759_v25 = vld [vmem:[%s5817_s1 + $0x88] sm:$0xff] }
  0x28   :  { %1573 = vmatpush.bf16.msrb.mxu1 %v3756_v26  ;;  %2084 = vmatpush.bf16.msrb.mxu0 %v3776_v27  ;;  %v3767_v26 = vld [vmem:[%s5817_s1 + $0xc8] sm:$0xff] }
  0x29   :  { %v3751_v27 = vld [vmem:[%s5817_s1 + $0x48] sm:$0xff] }
  0x2a   :  { %1743 = vmatpush.bf16.msrb.mxu2 %v3763_v28  ;;  %v3774_v28 = vld [vmem:[%s5817_s1 + $0x100] sm:$0xff] }
  0x2b   :  { %1912 = vmatpush.bf16.msrb.mxu3 %v3771_v29  ;;  %v3028_v29 = vld [vmem:[%s5819_s0 + $0x208] sm:$0xf] }
  0x2c   :  { %1574 = vmatpush.bf16.msrb.mxu1 %v3755_v30  ;;  %2085 = vmatpush.bf16.msrb.mxu0 %v3775_v61  ;;  %v3649_v30 = vld [vmem:[%s5819_s0 + $0x218] sm:$0xf0]  ;;  %v3739_v61 = vld [vmem:[%s5819_s0 + $0x4e8] sm:$0xf0] }
  0x2d   :  { %v3029_v37 = vor.u32 %v3649_v30, %v3028_v29  ;;  %v3591_v29 = vld [vmem:[%s5819_s0 + $0x48] sm:$0xf0] }
  0x2e   :  { %1744 = vmatpush.bf16.msrb.mxu2 %v3762_v43  ;;  %v3750_v43 = vld [vmem:[%s5817_s1 + $0x40] sm:$0xff] }
  0x2f   :  { %1913 = vmatpush.bf16.msrb.mxu3 %v3770_v44  ;;  %v3048_v44 = vld [vmem:[%s5819_s0 + $0x230] sm:$0xf] }
  0x30   :  { %1575 = vmatpush.bf16.msrb.mxu1 %v3754_v45  ;;  %2086 = vmatpush.bf16.msrb.mxu0 %v3774_v28  ;;  %v3654_v45 = vld [vmem:[%s5819_s0 + $0x240] sm:$0xf0]  ;;  %v2804_v28 = vld [vmem:[%s5819_s0 + $0x38] sm:$0xf] }
  0x31   :  { %1456 = vmatmul.bf16.gmra.mxu1 %v2949_v39  ;;  %1496 = vmatmul.bf16.gmra.mxu2 %v3109_v40  ;;  %v3349_v39 = vor.u32 %v3729_v34, %v3348_v33  ;;  %v2869_v40 = vor.u32 %v3609_v36, %v2868_v35  ;;  %v3049_v52 = vor.u32 %v3654_v45, %v3048_v44  ;;  %v2816_v44 = vld [vmem:[%s5819_s0 + $0x58] sm:$0xf]  ;;  %v3595_v45 = vld [vmem:[%s5819_s0 + $0x68] sm:$0xf0] }
  0x32   :  { %1536 = vmatmul.bf16.gmra.mxu3 %v3269_v41  ;;  %1745 = vmatpush.bf16.msrb.mxu2 %v3761_v58  ;;  %v3758_v41 = vld [vmem:[%s5817_s1 + $0x80] sm:$0xff]  ;;  %v3228_v58 = vld [vmem:[%s5819_s0 + $0x398] sm:$0xf]  ;;  %v2805_v36 = vor.u32 %v3591_v29, %v2804_v28  ;;  %v3603_v28 = vld [vmem:[%s5819_s0 + $0xac] sm:$0xf] }
  0x33   :  { %1416 = vmatmul.bf16.gmra.mxu0 %v2789_v42  ;;  %1914 = vmatpush.bf16.msrb.mxu3 %v3769_v59  ;;  %v3766_v42 = vld [vmem:[%s5817_s1 + $0xc0] sm:$0xff]  ;;  %v3699_v59 = vld [vmem:[%s5819_s0 + $0x3a8] sm:$0xf0] }
  0x34   :  { %1576 = vmatpush.bf16.msrb.mxu1 %v3753_v60  ;;  %v3388_v60 = vld [vmem:[%s5819_s0 + $0x4d8] sm:$0xf]  ;;  %v3229_v1 = vor.u32 %v3699_v59, %v3228_v58  ;;  %v2858_v29 = vld [vmem:[%s5819_s0 + $0xbc] sm:$0xf0] }
  0x35   :  { %v3389_v2 = vor.u32 %v3739_v61, %v3388_v60 }
  0x36   :  { %1746 = vmatpush.bf16.msrb.mxu2 %v3760_v10  ;;  %v2784_v10 = vld [vmem:[%s5819_s0 + $0x10] sm:$0xf] }
  0x37   :  { %1915 = vmatpush.bf16.msrb.mxu3 %v3768_v11  ;;  %v3586_v11 = vld [vmem:[%s5819_s0 + $0x20] sm:$0xf0] }
  0x38   :  { %1577 = vmatpush.bf16.msrb.mxu1 %v3752_v12  ;;  %v2773_v12 = vor.u32 %v3582_v4, %v2770_v5  ;;  %v2785_v16 = vor.u32 %v3586_v11, %v2784_v10  ;;  %v2844_v4 = vld [vmem:[%s5819_s0 + $0x88] sm:$0xf]  ;;  %v3601_v5 = vld [vmem:[%s5819_s0 + $0x98] sm:$0xf0] }
  0x3a   :  { %1747 = vmatpush.bf16.msrb.mxu2 %v3759_v25  ;;  %v3590_v25 = vld [vmem:[%s5819_s0 + $0x40] sm:$0xf0] }
  0x3b   :  { %1916 = vmatpush.bf16.msrb.mxu3 %v3767_v26  ;;  %v3588_v26 = vld [vmem:[%s5819_s0 + $0x34] sm:$0xf] }
  0x3c   :  { %1578 = vmatpush.bf16.msrb.mxu1 %v3751_v27  ;;  %v2798_v27 = vld [vmem:[%s5819_s0 + $0x44] sm:$0xf0] }
  0x3d   :  { %v2801_v35 = vor.u32 %v3588_v26, %v2798_v27  ;;  %v2856_v26 = vld [vmem:[%s5819_s0 + $0xa8] sm:$0xf]  ;;  %v3605_v27 = vld [vmem:[%s5819_s0 + $0xb8] sm:$0xf0] }
  0x3e   :  { %1748 = vmatpush.bf16.msrb.mxu2 %v3758_v41 }
  0x3f   :  { %1917 = vmatpush.bf16.msrb.mxu3 %v3766_v42  ;;  %v3592_v42 = vld [vmem:[%s5819_s0 + $0x54] sm:$0xf] }
  0x40   :  { %1579 = vmatpush.bf16.msrb.mxu1 %v3750_v43  ;;  %v2810_v43 = vld [vmem:[%s5819_s0 + $0x64] sm:$0xf0] }
  0x41   :  { %1461 = vmatmul.bf16.gmra.mxu1 %v2969_v54  ;;  %1501 = vmatmul.bf16.gmra.mxu2 %v3129_v55  ;;  %v3369_v54 = vor.u32 %v3734_v49, %v3368_v48  ;;  %v2889_v55 = vor.u32 %v3614_v51, %v2888_v50  ;;  %v2824_v48 = vld [vmem:[%s5819_s0 + $0x60] sm:$0xf]  ;;  %v3596_v49 = vld [vmem:[%s5819_s0 + $0x70] sm:$0xf0] }
  0x42   :  { %1541 = vmatmul.bf16.gmra.mxu3 %v3289_v56  ;;  %v3068_v56 = vld [vmem:[%s5819_s0 + $0x258] sm:$0xf] }
  0x43   :  { %1421 = vmatmul.bf16.gmra.mxu0 %v2809_v57  ;;  %v3659_v57 = vld [vmem:[%s5819_s0 + $0x268] sm:$0xf0] }
  0x44   :  { %v3069_v0 = vor.u32 %v3659_v57, %v3068_v56  ;;  %v2825_v56 = vor.u32 %v3596_v49, %v2824_v48 }
  0x51   :  { %1466 = vmatmul.bf16.gmra.mxu1 %v2989_v6  ;;  %1506 = vmatmul.bf16.gmra.mxu2 %v3149_v7  ;;  %v2776_v6 = vld [vmem:[%s5819_s0 + $0x8] sm:$0xf]  ;;  %v3585_v7 = vld [vmem:[%s5819_s0 + $0x18] sm:$0xf0] }
  0x52   :  { %1546 = vmatmul.bf16.gmra.mxu3 %v3309_v8  ;;  %v3583_v8 = vld [vmem:[%s5819_s0 + $0xc] sm:$0xf]  ;;  %v2777_v13 = vor.u32 %v3585_v7, %v2776_v6 }
  0x53   :  { %1426 = vmatmul.bf16.gmra.mxu0 %v2829_v9  ;;  %v2778_v9 = vld [vmem:[%s5819_s0 + $0x1c] sm:$0xf0] }
  0x54   :  { %v2781_v15 = vor.u32 %v3583_v8, %v2778_v9  ;;  %v2833_v8 = vor.u32 %v3597_v62, %v2830_v63  ;;  %v2876_v62 = vld [vmem:[%s5819_s0 + $0xd0] sm:$0xf]  ;;  %v3610_v63 = vld [vmem:[%s5819_s0 + $0xe0] sm:$0xf0] }
  0x61   :  { %1471 = vmatmul.bf16.gmra.mxu1 %v3009_v21  ;;  %1511 = vmatmul.bf16.gmra.mxu2 %v3169_v22  ;;  %v3587_v22 = vld [vmem:[%s5819_s0 + $0x2c] sm:$0xf] }
  0x62   :  { %1551 = vmatmul.bf16.gmra.mxu3 %v3329_v23  ;;  %v2790_v23 = vld [vmem:[%s5819_s0 + $0x3c] sm:$0xf0] }
  0x63   :  { %1431 = vmatmul.bf16.gmra.mxu0 %v2849_v24  ;;  %v2796_v24 = vld [vmem:[%s5819_s0 + $0x30] sm:$0xf]  ;;  %v2793_v32 = vor.u32 %v3587_v22, %v2790_v23 }
  0x64   :  { %v2797_v33 = vor.u32 %v3590_v25, %v2796_v24  ;;  %v3602_v24 = vld [vmem:[%s5819_s0 + $0xa4] sm:$0xf]  ;;  %v2850_v25 = vld [vmem:[%s5819_s0 + $0xb4] sm:$0xf0] }
  0x71   :  { %1476 = vmatmul.bf16.gmra.mxu1 %v3029_v37  ;;  %1516 = vmatmul.bf16.gmra.mxu2 %v3189_v38 }
  0x72   :  { %1556 = vmatmul.bf16.gmra.mxu3 %v3349_v39 }
  0x73   :  { %1436 = vmatmul.bf16.gmra.mxu0 %v2869_v40 }
  0x81   :  { %1481 = vmatmul.bf16.gmra.mxu1 %v3049_v52  ;;  %1521 = vmatmul.bf16.gmra.mxu2 %v3209_v53  ;;  %v2813_v52 = vor.u32 %v3592_v42, %v2810_v43  ;;  %v2817_v53 = vor.u32 %v3595_v45, %v2816_v44  ;;  %v2853_v42 = vor.u32 %v3602_v24, %v2850_v25 }
  0x82   :  { %1561 = vmatmul.bf16.gmra.mxu3 %v3369_v54  ;;  %v2857_v43 = vor.u32 %v3605_v27, %v2856_v26  ;;  %v2861_v45 = vor.u32 %v3603_v28, %v2858_v29 }
  0x83   :  { %1441 = vmatmul.bf16.gmra.mxu0 %v2889_v55  ;;  %v2821_v55 = vor.u32 %v3593_v46, %v2818_v47 }
  0x91   :  { %1486 = vmatmul.bf16.gmra.mxu1 %v3069_v0  ;;  %1526 = vmatmul.bf16.gmra.mxu2 %v3229_v1  ;;  %v2836_v0 = vld [vmem:[%s5819_s0 + $0x80] sm:$0xf]  ;;  %v3600_v1 = vld [vmem:[%s5819_s0 + $0x90] sm:$0xf0] }
  0x92   :  { %1566 = vmatmul.bf16.gmra.mxu3 %v3389_v2  ;;  %v3598_v2 = vld [vmem:[%s5819_s0 + $0x84] sm:$0xf]  ;;  %v2837_v9 = vor.u32 %v3600_v1, %v2836_v0  ;;  %v3608_v0 = vld [vmem:[%s5819_s0 + $0xd4] sm:$0xf]  ;;  %v2878_v1 = vld [vmem:[%s5819_s0 + $0xe4] sm:$0xf0] }
  0x93   :  { %1446 = vmatmul.bf16.gmra.mxu0 %v2909_v3  ;;  %v2838_v3 = vld [vmem:[%s5819_s0 + $0x94] sm:$0xf0] }
  0x94   :  { %v2841_v11 = vor.u32 %v3598_v2, %v2838_v3  ;;  %v2884_v2 = vld [vmem:[%s5819_s0 + $0xd8] sm:$0xf]  ;;  %v3611_v3 = vld [vmem:[%s5819_s0 + $0xe8] sm:$0xf0] }
  0x95   :  { %v2885_v24 = vor.u32 %v3611_v3, %v2884_v2 }
  0x9e   :  { %v4509_v14 = vpop.f32.mrf.mxu1 }
  0xa0   :  { %v4511_v17 = vpop.f32.mrf.mxu0 }
  0xa1   :  { %1580 = vmatmul.bf16.vlgmr.msrb.gmra.mxu1 %v2773_v12  ;;  %1749 = vmatmul.bf16.vlgmr.msrb.gmra.mxu2 %v2777_v13  ;;  %v2845_v12 = vor.u32 %v3601_v5, %v2844_v4 }
  0xa2   :  { %1918 = vmatmul.bf16.vlgmr.msrb.gmra.mxu3 %v2781_v15 }
  0xa3   :  { %3550 = vmatmul.msk.bf16.vlgmr.msrb.gmra.mxu0 %vm1306_vm0, %v2785_v16 }
  0xa4   :  { %v4514_v18 = vpop.f32.mrf.mxu2 }
  0xa5   :  { %v4516_v19 = vpop.f32.mrf.mxu3 }
  0xa6   :  { %5823 = vst [vmem:[#allocation3_spill] sm:$0xff] %v4516_v19  ;;  %v4518_v20 = vpop.f32.mrf.mxu1 }
  0xa8   :  { %v4520_v21 = vpop.f32.mrf.mxu0 }
  0xac   :  { %v4546_v30 = vpop.f32.mrf.mxu2 }
  0xad   :  { %v4548_v31 = vpop.f32.mrf.mxu3 }
  0xae   :  { %5824 = vst [vmem:[#allocation4_spill] sm:$0xff] %v4548_v31  ;;  %v4550_v34 = vpop.f32.mrf.mxu1  ;;  %v4840_v31 = vld [vmem:[%s5818_s2] ss:$0 sm:$0xff] }
  0xb0   :  { %v4552_v37 = vpop.f32.mrf.mxu0 }
  0xb1   :  { %1585 = vmatmul.bf16.gmra.mxu1 %v2793_v32  ;;  %1754 = vmatmul.bf16.gmra.mxu2 %v2797_v33  ;;  %v2864_v32 = vld [vmem:[%s5819_s0 + $0xb0] sm:$0xf]  ;;  %v3606_v33 = vld [vmem:[%s5819_s0 + $0xc0] sm:$0xf0] }
  0xb2   :  { %1923 = vmatmul.bf16.gmra.mxu3 %v2801_v35  ;;  %v2865_v46 = vor.u32 %v3606_v33, %v2864_v32  ;;  %v3612_v32 = vld [vmem:[%s5819_s0 + $0xf4] sm:$0xf]  ;;  %v2890_v33 = vld [vmem:[%s5819_s0 + $0x104] sm:$0xf0] }
  0xb3   :  { %3551 = vmatmul.msk.bf16.gmra.mxu0 %vm1306_vm0, %v2805_v36 }
  0xb4   :  { %v4555_v38 = vpop.f32.mrf.mxu2 }
  0xb5   :  { %v4557_v39 = vpop.f32.mrf.mxu3 }
  0xb6   :  { %5825 = vst [vmem:[#allocation5_spill] sm:$0xff] %v4557_v39  ;;  %v4559_v40 = vpop.f32.mrf.mxu1 }
  0xb8   :  { %v4561_v41 = vpop.f32.mrf.mxu0 }
  0xbc   :  { %v4587_v50 = vpop.f32.mrf.mxu2 }
  0xbd   :  { %v4589_v51 = vpop.f32.mrf.mxu3 }
  0xbe   :  { %5826 = vst [vmem:[#allocation6_spill] sm:$0xff] %v4589_v51  ;;  %v4591_v54 = vpop.f32.mrf.mxu1 }
  0xc0   :  { %v4593_v57 = vpop.f32.mrf.mxu0 }
  0xc1   :  { %1590 = vmatmul.bf16.gmra.mxu1 %v2813_v52  ;;  %1759 = vmatmul.bf16.gmra.mxu2 %v2817_v53 }
  0xc2   :  { %1928 = vmatmul.bf16.gmra.mxu3 %v2821_v55  ;;  %v3607_v55 = vld [vmem:[%s5819_s0 + $0xcc] sm:$0xf] }
  0xc3   :  { %3552 = vmatmul.msk.bf16.gmra.mxu0 %vm1306_vm0, %v2825_v56  ;;  %v2870_v56 = vld [vmem:[%s5819_s0 + $0xdc] sm:$0xf0] }
  0xc4   :  { %v4596_v58 = vpop.f32.mrf.mxu2 }
  0xc5   :  { %v4598_v59 = vpop.f32.mrf.mxu3 }
  0xc6   :  { %5827 = vst [vmem:[#allocation7_spill] sm:$0xff] %v4598_v59  ;;  %v4600_v60 = vpop.f32.mrf.mxu1 }
  0xc8   :  { %v4602_v61 = vpop.f32.mrf.mxu0 }
  0xcc   :  { %v4628_v6 = vpop.f32.mrf.mxu2 }
  0xcd   :  { %v4630_v7 = vpop.f32.mrf.mxu3 }
  0xce   :  { %5828 = vst [vmem:[#allocation8_spill] sm:$0xff] %v4630_v7  ;;  %v4632_v10 = vpop.f32.mrf.mxu1 }
  0xd0   :  { %v4634_v13 = vpop.f32.mrf.mxu0 }
  0xd1   :  { %1595 = vmatmul.bf16.gmra.mxu1 %v2833_v8  ;;  %1764 = vmatmul.bf16.gmra.mxu2 %v2837_v9  ;;  %v2873_v8 = vor.u32 %v3607_v55, %v2870_v56  ;;  %v2877_v9 = vor.u32 %v3610_v63, %v2876_v62  ;;  %v2904_v55 = vld [vmem:[%s5819_s0 + $0x100] sm:$0xf]  ;;  %v3616_v56 = vld [vmem:[%s5819_s0 + $0x110] sm:$0xf0] }
  0xd2   :  { %1933 = vmatmul.bf16.gmra.mxu3 %v2841_v11 }
  0xd3   :  { %3553 = vmatmul.msk.bf16.gmra.mxu0 %vm1306_vm0, %v2845_v12  ;;  %v2881_v12 = vor.u32 %v3608_v0, %v2878_v1  ;;  %v2893_v0 = vor.u32 %v3612_v32, %v2890_v33  ;;  %v3617_v32 = vld [vmem:[%s5819_s0 + $0x11c] sm:$0xf]  ;;  %v2910_v33 = vld [vmem:[%s5819_s0 + $0x12c] sm:$0xf0] }
  0xd4   :  { %v4637_v15 = vpop.f32.mrf.mxu2 }
  0xd5   :  { %v4639_v16 = vpop.f32.mrf.mxu3 }
  0xd6   :  { %5829 = vst [vmem:[#allocation9_spill] sm:$0xff] %v4639_v16  ;;  %v4641_v22 = vpop.f32.mrf.mxu1 }
  0xd8   :  { %v4643_v23 = vpop.f32.mrf.mxu0 }
  0xdc   :  { %v4669_v35 = vpop.f32.mrf.mxu2 }
  0xdd   :  { %5830 = vst [vmem:[#allocation10_spill] sm:$0xff] %v4669_v35  ;;  %v4671_v36 = vpop.f32.mrf.mxu3 }
  0xde   :  { %5831 = vst [vmem:[#allocation11_spill] sm:$0xff] %v4671_v36  ;;  %v4673_v44 = vpop.f32.mrf.mxu1 }
  0xe0   :  { %v4675_v47 = vpop.f32.mrf.mxu0 }
  0xe1   :  { %1600 = vmatmul.bf16.gmra.mxu1 %v2853_v42  ;;  %1769 = vmatmul.bf16.gmra.mxu2 %v2857_v43  ;;  %v2896_v42 = vld [vmem:[%s5819_s0 + $0xf8] sm:$0xf]  ;;  %v3615_v43 = vld [vmem:[%s5819_s0 + $0x108] sm:$0xf0] }
  0xe2   :  { %1938 = vmatmul.bf16.gmra.mxu3 %v2861_v45  ;;  %v3613_v45 = vld [vmem:[%s5819_s0 + $0xfc] sm:$0xf]  ;;  %v2897_v1 = vor.u32 %v3615_v43, %v2896_v42  ;;  %v2916_v42 = vld [vmem:[%s5819_s0 + $0x120] sm:$0xf]  ;;  %v3620_v43 = vld [vmem:[%s5819_s0 + $0x130] sm:$0xf0] }
  0xe3   :  { %3554 = vmatmul.msk.bf16.gmra.mxu0 %vm1306_vm0, %v2865_v46  ;;  %v2898_v46 = vld [vmem:[%s5819_s0 + $0x10c] sm:$0xf0] }
  0xe4   :  { %v4678_v48 = vpop.f32.mrf.mxu2  ;;  %v2901_v3 = vor.u32 %v3613_v45, %v2898_v46  ;;  %v3618_v45 = vld [vmem:[%s5819_s0 + $0x124] sm:$0xf]  ;;  %v2918_v46 = vld [vmem:[%s5819_s0 + $0x134] sm:$0xf0] }
  0xe5   :  { %5832 = vst [vmem:[#allocation12_spill] sm:$0xff] %v4678_v48  ;;  %v4680_v49 = vpop.f32.mrf.mxu3  ;;  %v1418_v48 = vadd.f32 %v4840_v31, %v4552_v37 }
  0xe6   :  { %5833 = vst [vmem:[#allocation13_spill] sm:$0xff] %v4680_v49  ;;  %v4682_v52 = vpop.f32.mrf.mxu1 }
  0xe8   :  { %v4684_v53 = vpop.f32.mrf.mxu0 }
  0xec   :  { %v4710_v4 = vpop.f32.mrf.mxu2 }
  0xed   :  { %5834 = vst [vmem:[#allocation14_spill] sm:$0xff] %v4710_v4  ;;  %v4712_v5 = vpop.f32.mrf.mxu3 }
  0xee   :  { %5835 = vst [vmem:[#allocation15_spill] sm:$0xff] %v4712_v5  ;;  %v4714_v11 = vpop.f32.mrf.mxu1  ;;  %v2921_v5 = vor.u32 %v3618_v45, %v2918_v46  ;;  %v2944_v45 = vld [vmem:[%s5819_s0 + $0x150] sm:$0xf]  ;;  %v3626_v46 = vld [vmem:[%s5819_s0 + $0x160] sm:$0xf0] }
  0xef   :  { %v2945_v39 = vor.u32 %v3626_v46, %v2944_v45  ;;  %v1415_v45 = vadd.f32 %v4840_v31, %v4520_v21  ;;  %v3627_v46 = vld [vmem:[%s5819_s0 + $0x16c] sm:$0xf]  ;;  %v3628_v21 = vld [vmem:[%s5819_s0 + $0x174] sm:$0xf] }
  0xf0   :  { %v4716_v25 = vpop.f32.mrf.mxu0 }
  0xf1   :  { %1605 = vmatmul.bf16.gmra.mxu1 %v2873_v8  ;;  %1774 = vmatmul.bf16.gmra.mxu2 %v2877_v9  ;;  %v2905_v8 = vor.u32 %v3616_v56, %v2904_v55  ;;  %v2924_v55 = vld [vmem:[%s5819_s0 + $0x128] sm:$0xf]  ;;  %v3621_v56 = vld [vmem:[%s5819_s0 + $0x138] sm:$0xf0] }
  0xf2   :  { %1943 = vmatmul.bf16.gmra.mxu3 %v2881_v12  ;;  %v2925_v49 = vor.u32 %v3621_v56, %v2924_v55 }
  0xf3   :  { %3555 = vmatmul.msk.bf16.gmra.mxu0 %vm1306_vm0, %v2885_v24 }
  0xf4   :  { %v4719_v26 = vpop.f32.mrf.mxu2 }
  0xf5   :  { %5836 = vst [vmem:[#allocation16_spill] sm:$0xff] %v4719_v26  ;;  %v4721_v27 = vpop.f32.mrf.mxu3 }
  0xf6   :  { %5837 = vst [vmem:[#allocation17_spill] sm:$0xff] %v4721_v27  ;;  %v4723_v28 = vpop.f32.mrf.mxu1 }
  0xf8   :  { %v4725_v29 = vpop.f32.mrf.mxu0 }
  0xfc   :  { %v4751_v62 = vpop.f32.mrf.mxu2 }
  0xfd   :  { %5838 = vst [vmem:[#allocation18_spill] sm:$0xff] %v4751_v62  ;;  %v4753_v63 = vpop.f32.mrf.mxu3  ;;  %v3779_v62 = vld [vmem:[%s5821_s4] sm:$0xff]  }
  0xfe   :  { %5839 = vst [vmem:[#allocation19_spill] sm:$0xff] %v4753_v63  ;;  %v4755_v2 = vpop.f32.mrf.mxu1 }
 0x100   :  { %v4757_v9 = vpop.f32.mrf.mxu0 }
 0x101   :  { %1610 = vmatmul.bf16.gmra.mxu1 %v2893_v0  ;;  %1779 = vmatmul.bf16.gmra.mxu2 %v2897_v1 }
 0x102   :  { %1948 = vmatmul.bf16.gmra.mxu3 %v2901_v3  ;;  %v2913_v3 = vor.u32 %v3617_v32, %v2910_v33  ;;  %v3622_v32 = vld [vmem:[%s5819_s0 + $0x144] sm:$0xf]  ;;  %v2930_v33 = vld [vmem:[%s5819_s0 + $0x154] sm:$0xf0] }
 0x103   :  { %3556 = vmatmul.msk.bf16.gmra.mxu0 %vm1306_vm0, %v2905_v8  ;;  %v2917_v8 = vor.u32 %v3620_v43, %v2916_v42  ;;  %v3623_v42 = vld [vmem:[%s5819_s0 + $0x14c] sm:$0xf]  ;;  %v2938_v43 = vld [vmem:[%s5819_s0 + $0x15c] sm:$0xf0] }
 0x104   :  { %v4760_v12 = vpop.f32.mrf.mxu2  ;;  %v2941_v51 = vor.u32 %v3623_v42, %v2938_v43 }
 0x105   :  { %5840 = vst [vmem:[#allocation20_spill] sm:$0xff] %v4760_v12  ;;  %v4762_v24 = vpop.f32.mrf.mxu3 }
 0x106   :  { %5841 = vst [vmem:[#allocation21_spill] sm:$0xff] %v4762_v24  ;;  %v4764_v27 = vpop.f32.mrf.mxu1 }
 0x108   :  { %v4766_v63 = vpop.f32.mrf.mxu0 }
 0x10c   :  { %v4792_v0 = vpop.f32.mrf.mxu2 }
 0x10d   :  { %5842 = vst [vmem:[#allocation22_spill] sm:$0xff] %v4792_v0  ;;  %v4794_v1 = vpop.f32.mrf.mxu3 }
 0x10e   :  { %5843 = vst [vmem:[#allocation23_spill] sm:$0xff] %v4794_v1  ;;  %v4796_v24 = vpop.f32.mrf.mxu1 }
 0x110   :  { %v4798_v36 = vpop.f32.mrf.mxu0 }
 0x111   :  { %1615 = vmatmul.bf16.gmra.mxu1 %v2913_v3  ;;  %1784 = vmatmul.bf16.gmra.mxu2 %v2917_v8  ;;  %v2933_v3 = vor.u32 %v3622_v32, %v2930_v33 }
 0x112   :  { %1953 = vmatmul.bf16.gmra.mxu3 %v2921_v5  ;;  %v3625_v5 = vld [vmem:[%s5819_s0 + $0x158] sm:$0xf0] }
 0x113   :  { %3557 = vmatmul.msk.bf16.gmra.mxu0 %vm1306_vm0, %v2925_v49  ;;  %v2936_v49 = vld [vmem:[%s5819_s0 + $0x148] sm:$0xf] }
 0x114   :  { %v4801_v16 = vpop.f32.mrf.mxu2  ;;  %v2937_v8 = vor.u32 %v3625_v5, %v2936_v49 }
 0x115   :  { %5844 = vst [vmem:[#allocation24_spill] sm:$0xff] %v4801_v16  ;;  %v4803_v7 = vpop.f32.mrf.mxu3  ;;  %v1413_v16 = vadd.f32 %v4840_v31, %v4511_v17  ;;  %v2950_v17 = vld [vmem:[%s5819_s0 + $0x17c] sm:$0xf0] }
 0x116   :  { %5845 = vst [vmem:[#allocation25_spill] sm:$0xff] %v4803_v7  ;;  %v4805_v59 = vpop.f32.mrf.mxu1 }
 0x118   :  { %v4807_v1 = vpop.f32.mrf.mxu0 }
 0x11c   :  { %v4833_v55 = vpop.f32.mrf.mxu2 }
 0x11d   :  { %5846 = vst [vmem:[#allocation26_spill] sm:$0xff] %v4833_v55  ;;  %v4835_v56 = vpop.f32.mrf.mxu3 }
 0x11e   :  { %5847 = vst [vmem:[#allocation27_spill] sm:$0xff] %v4835_v56  ;;  %v1581_v7 = vpop.f32.mrf.mxu1 }
 0x11f   :  { %v1582_v56 = vadd.f32 %v1581_v7, %v1413_v16 }
 0x120   :  { %v2088_v19 = vpop.f32.mrf.mxu0 }
 0x121   :  { %1620 = vmatmul.bf16.gmra.mxu1 %v2933_v3  ;;  %1789 = vmatmul.bf16.gmra.mxu2 %v2937_v8  ;;  %v2964_v3 = vld [vmem:[%s5819_s0 + $0x178] sm:$0xf]  ;;  %v3631_v8 = vld [vmem:[%s5819_s0 + $0x188] sm:$0xf0] }
 0x122   :  { %1958 = vmatmul.bf16.gmra.mxu3 %v2941_v51  ;;  %v3630_v51 = vld [vmem:[%s5819_s0 + $0x180] sm:$0xf0]  ;;  %v2965_v0 = vor.u32 %v3631_v8, %v2964_v3 }
 0x123   :  { %3558 = vmatmul.msk.bf16.gmra.mxu0 %vm1306_vm0, %v2945_v39  ;;  %v2956_v39 = vld [vmem:[%s5819_s0 + $0x170] sm:$0xf] }
 0x124   :  { %v1750_v32 = vpop.f32.mrf.mxu2 }
 0x125   :  { %v1751_v33 = vadd.f32 %v1750_v32, %v1582_v56  ;;  %v1919_v49 = vpop.f32.mrf.mxu3  ;;  %v2958_v56 = vld [vmem:[%s5819_s0 + $0x184] sm:$0xf0]  ;;  %v4874_v32 = vstv %s5820_s3 }
 0x126   :  { %v1583_v5 = vpop.f32.mrf.mxu1  ;;  %v2961_v55 = vor.u32 %v3628_v21, %v2958_v56 }
 0x127   :  { %v1920_v42 = vadd.f32 %v1919_v49, %v1751_v33  ;;  %v1584_v16 = vadd.f32 %v1583_v5, %v1415_v45  ;;  %v2953_v5 = vor.u32 %v3627_v46, %v2950_v17  ;;  %v3780_v46 = vunpack.c.l.bf16 %v3779_v62 }
 0x128   :  { %v2090_v43 = vpop.f32.mrf.mxu0  ;;  %v3781_v17 = vunpack.c.h.bf16 %v3779_v62  ;;  %v1420_v62 = vadd.f32 %v4840_v31, %v4561_v41  ;;  %v3635_v41 = vld [vmem:[%s5819_s0 + $0x1a8] sm:$0xf0] }
 0x129   :  { %v2089_v7 = vadd.f32 %v2088_v19, %v1920_v42  ;;  %v2957_v42 = vor.u32 %v3630_v51, %v2956_v39 }
 0x12b   :  { %v2314_v12 = vmul.f32 %v4874_v32, %v2089_v7  ;;  %vm2249_vm1 = vcmp.ge.f32.partialorder %v2089_v7, 0.0 }
 0x12c   :  { %v1752_v33 = vpop.f32.mrf.mxu2 }
 0x12d   :  { %v1753_v19 = vadd.f32 %v1752_v33, %v1584_v16  ;;  %v1921_v49 = vpop.f32.mrf.mxu3  ;;  %v2378_v39 = vsel %vm2249_vm1, %v2089_v7, %v2314_v12  ;;  %v3632_v12 = vld [vmem:[%s5819_s0 + $0x194] sm:$0xf] }
 0x12e   :  { %v1586_v45 = vpop.f32.mrf.mxu1  ;;  %v2570_v33 = vsub.f32 %v2378_v39, %v3780_v46 }
 0x12f   :  { %v1922_v26 = vadd.f32 %v1921_v49, %v1753_v19  ;;  %v1587_v21 = vadd.f32 %v1586_v45, %v1418_v48  ;;  %v2970_v48 = vld [vmem:[%s5819_s0 + $0x1a4] sm:$0xf0]  ;;  %v3636_v45 = vld [vmem:[%s5819_s0 + $0x1b0] sm:$0xf0] }
 0x130   :  { %v2093_v4 = vpop.f32.mrf.mxu0 }
 0x131   :  { %v2091_v35 = vadd.f32 %v2090_v43, %v1922_v26  ;;  %1625 = vmatmul.bf16.gmra.mxu1 %v2953_v5  ;;  %1794 = vmatmul.bf16.gmra.mxu2 %v2957_v42  ;;  %v2978_v5 = vld [vmem:[%s5819_s0 + $0x1ac] sm:$0xf0]  ;;  %v2984_v42 = vld [vmem:[%s5819_s0 + $0x1a0] sm:$0xf] }
 0x132   :  { %1963 = vmatmul.bf16.gmra.mxu3 %v2961_v55 }
 0x133   :  { %3559 = vmatmul.msk.bf16.gmra.mxu0 %vm1306_vm0, %v2965_v0  ;;  %vm2250_vm2 = vcmp.ge.f32.partialorder %v2091_v35, 0.0  ;;  %v2315_v51 = vmul.f32 %v4874_v32, %v2091_v35  ;;  %v3633_v0 = vld [vmem:[%s5819_s0 + $0x19c] sm:$0xf] }
 0x134   :  { %v1755_v16 = vpop.f32.mrf.mxu2 }
 0x135   :  { %v2379_v56 = vsel %vm2250_vm2, %v2091_v35, %v2315_v51  ;;  %v1756_v3 = vadd.f32 %v1755_v16, %v1587_v21  ;;  %v1924_v8 = vpop.f32.mrf.mxu3  ;;  %v2976_v35 = vld [vmem:[%s5819_s0 + $0x198] sm:$0xf]  ;;  %v2973_v51 = vor.u32 %v3632_v12, %v2970_v48 }
 0x136   :  { %v2571_v19 = vsub.f32 %v2379_v56, %v3781_v17  ;;  %v1588_v37 = vpop.f32.mrf.mxu1  ;;  %v2977_v21 = vor.u32 %v3635_v41, %v2976_v35  ;;  %v2985_v56 = vor.u32 %v3636_v45, %v2984_v42 }
 0x137   :  { %v1925_v26 = vadd.f32 %v1924_v8, %v1756_v3  ;;  %v1589_v7 = vadd.f32 %v1588_v37, %v1420_v62  ;;  %v4066_v8 = vld [vmem:[%s5821_s4 + $0x8] sm:$0xff]   ;;  %v1423_v37 = vadd.f32 %v4840_v31, %v4593_v57 }
 0x138   :  { %v2095_v43 = vpop.f32.mrf.mxu0  ;;  %v3909_v49 = vpack.c.bf16 %v2571_v19, %v2570_v33  ;;  %v3785_v62 = vunpack.c.h.bf16 %v4066_v8 }
 0x139   :  { %v2094_v55 = vadd.f32 %v2093_v4, %v1925_v26  ;;  %v2981_v4 = vor.u32 %v3633_v0, %v2978_v5 }
 0x13a   :  { %3910 = vst [vmem:[%s5822_s5] sm:$0xff] %v3909_v49   ;;  %v3784_v49 = vunpack.c.l.bf16 %v4066_v8  ;;  %v3004_v8 = vld [vmem:[%s5819_s0 + $0x1c8] sm:$0xf] }
 0x13b   :  { %v2316_v3 = vmul.f32 %v4874_v32, %v2094_v55  ;;  %vm2251_vm3 = vcmp.ge.f32.partialorder %v2094_v55, 0.0 }
 0x13c   :  { %v1757_v46 = vpop.f32.mrf.mxu2 }
 0x13d   :  { %v1758_v17 = vadd.f32 %v1757_v46, %v1589_v7  ;;  %v1926_v39 = vpop.f32.mrf.mxu3  ;;  %v2380_v12 = vsel %vm2251_vm3, %v2094_v55, %v2316_v3  ;;  %v3637_v55 = vld [vmem:[%s5819_s0 + $0x1bc] sm:$0xf]  ;;  %v2998_v3 = vld [vmem:[%s5819_s0 + $0x1d4] sm:$0xf0] }
 0x13e   :  { %v1591_v16 = vpop.f32.mrf.mxu1  ;;  %v2572_v42 = vsub.f32 %v2380_v12, %v3784_v49 }
 0x13f   :  { %v1927_v33 = vadd.f32 %v1926_v39, %v1758_v17  ;;  %v1592_v35 = vadd.f32 %v1591_v16, %v1423_v37  ;;  %v1425_v39 = vadd.f32 %v4840_v31, %v4602_v61  ;;  %v3640_v61 = vld [vmem:[%s5819_s0 + $0x1d0] sm:$0xf0]  ;;  %v3638_v16 = vld [vmem:[%s5819_s0 + $0x1c4] sm:$0xf] }
 0x140   :  { %v2098_v19 = vpop.f32.mrf.mxu0 }
 0x141   :  { %v2096_v26 = vadd.f32 %v2095_v43, %v1927_v33  ;;  %1630 = vmatmul.bf16.gmra.mxu1 %v2973_v51  ;;  %1799 = vmatmul.bf16.gmra.mxu2 %v2977_v21  ;;  %v2990_v51 = vld [vmem:[%s5819_s0 + $0x1cc] sm:$0xf0]  ;;  %v2996_v21 = vld [vmem:[%s5819_s0 + $0x1c0] sm:$0xf]  ;;  %v3641_v33 = vld [vmem:[%s5819_s0 + $0x1d8] sm:$0xf0] }
 0x142   :  { %1968 = vmatmul.bf16.gmra.mxu3 %v2981_v4  ;;  %v2997_v12 = vor.u32 %v3640_v61, %v2996_v21 }
 0x143   :  { %3560 = vmatmul.msk.bf16.gmra.mxu0 %vm1306_vm0, %v2985_v56  ;;  %vm2252_vm4 = vcmp.ge.f32.partialorder %v2096_v26, 0.0  ;;  %v2317_v48 = vmul.f32 %v4874_v32, %v2096_v26 }
 0x144   :  { %v1760_v41 = vpop.f32.mrf.mxu2 }
 0x145   :  { %v2381_v0 = vsel %vm2252_vm4, %v2096_v26, %v2317_v48  ;;  %v1761_v7 = vadd.f32 %v1760_v41, %v1592_v35  ;;  %v1929_v5 = vpop.f32.mrf.mxu3  ;;  %v3005_v35 = vor.u32 %v3641_v33, %v3004_v8 }
 0x146   :  { %v2573_v45 = vsub.f32 %v2381_v0, %v3785_v62  ;;  %v1593_v57 = vpop.f32.mrf.mxu1  ;;  %v2993_v62 = vor.u32 %v3637_v55, %v2990_v51  ;;  %v4067_v0 = vld [vmem:[%s5821_s4 + $0x10] sm:$0xff]  }
 0x147   :  { %v1930_v43 = vadd.f32 %v1929_v5, %v1761_v7  ;;  %v1594_v56 = vadd.f32 %v1593_v57, %v1425_v39  ;;  %v3788_v57 = vunpack.c.l.bf16 %v4067_v0 }
 0x148   :  { %v2100_v46 = vpop.f32.mrf.mxu0  ;;  %v3914_v17 = vpack.c.bf16 %v2573_v45, %v2572_v42  ;;  %v1428_v42 = vadd.f32 %v4840_v31, %v4634_v13 }
 0x149   :  { %v2099_v4 = vadd.f32 %v2098_v19, %v1930_v43  ;;  %v3001_v19 = vor.u32 %v3638_v16, %v2998_v3  ;;  %v3789_v43 = vunpack.c.h.bf16 %v4067_v0 }
 0x14a   :  { %4097 = vst [vmem:[%s5822_s5 + $0x8] sm:$0xff] %v3914_v17  }
 0x14b   :  { %v2318_v41 = vmul.f32 %v4874_v32, %v2099_v4  ;;  %vm2253_vm5 = vcmp.ge.f32.partialorder %v2099_v4, 0.0 }
 0x14c   :  { %v1762_v37 = vpop.f32.mrf.mxu2 }
 0x14d   :  { %v1763_v26 = vadd.f32 %v1762_v37, %v1594_v56  ;;  %v1931_v49 = vpop.f32.mrf.mxu3  ;;  %v2382_v17 = vsel %vm2253_vm5, %v2099_v4, %v2318_v41  ;;  %v1430_v37 = vadd.f32 %v4840_v31, %v4643_v23  ;;  %v3642_v4 = vld [vmem:[%s5819_s0 + $0x1e4] sm:$0xf]  ;;  %v3645_v23 = vld [vmem:[%s5819_s0 + $0x1f8] sm:$0xf0] }
 0x14e   :  { %v1596_v48 = vpop.f32.mrf.mxu1  ;;  %v2574_v56 = vsub.f32 %v2382_v17, %v3788_v57  ;;  %v3646_v41 = vld [vmem:[%s5819_s0 + $0x200] sm:$0xf0] }
 0x14f   :  { %v1932_v7 = vadd.f32 %v1931_v49, %v1763_v26  ;;  %v1597_v55 = vadd.f32 %v1596_v48, %v1428_v42  ;;  %v3010_v26 = vld [vmem:[%s5819_s0 + $0x1f4] sm:$0xf0]  ;;  %v3016_v49 = vld [vmem:[%s5819_s0 + $0x1e8] sm:$0xf] }
 0x150   :  { %v2103_v5 = vpop.f32.mrf.mxu0  ;;  %v3017_v57 = vor.u32 %v3645_v23, %v3016_v49 }
 0x151   :  { %v2101_v45 = vadd.f32 %v2100_v46, %v1932_v7  ;;  %1635 = vmatmul.bf16.gmra.mxu1 %v2993_v62  ;;  %1804 = vmatmul.bf16.gmra.mxu2 %v2997_v12  ;;  %v3643_v62 = vld [vmem:[%s5819_s0 + $0x1ec] sm:$0xf] }
 0x152   :  { %1973 = vmatmul.bf16.gmra.mxu3 %v3001_v19  ;;  %v3018_v19 = vld [vmem:[%s5819_s0 + $0x1fc] sm:$0xf0] }
 0x153   :  { %3561 = vmatmul.msk.bf16.gmra.mxu0 %vm1306_vm0, %v3005_v35  ;;  %vm2254_vm6 = vcmp.ge.f32.partialorder %v2101_v45, 0.0  ;;  %v2319_v39 = vmul.f32 %v4874_v32, %v2101_v45  ;;  %v3024_v35 = vld [vmem:[%s5819_s0 + $0x1f0] sm:$0xf] }
 0x154   :  { %v1765_v51 = vpop.f32.mrf.mxu2  ;;  %v3025_v17 = vor.u32 %v3646_v41, %v3024_v35  ;;  %v1435_v35 = vadd.f32 %v4840_v31, %v4684_v53  ;;  %v3030_v41 = vld [vmem:[%s5819_s0 + $0x21c] sm:$0xf0]  ;;  %v3650_v53 = vld [vmem:[%s5819_s0 + $0x220] sm:$0xf0] }
 0x155   :  { %v2383_v21 = vsel %vm2254_vm6, %v2101_v45, %v2319_v39  ;;  %v1766_v61 = vadd.f32 %v1765_v51, %v1597_v55  ;;  %v1934_v16 = vpop.f32.mrf.mxu3  ;;  %v3013_v45 = vor.u32 %v3642_v4, %v3010_v26  ;;  %v4068_v55 = vld [vmem:[%s5821_s4 + $0x18] sm:$0xff]  }
 0x156   :  { %v2575_v3 = vsub.f32 %v2383_v21, %v3789_v43  ;;  %v1598_v13 = vpop.f32.mrf.mxu1 }
 0x157   :  { %v1935_v46 = vadd.f32 %v1934_v16, %v1766_v61  ;;  %v1599_v48 = vadd.f32 %v1598_v13, %v1430_v37  ;;  %v1433_v61 = vadd.f32 %v4840_v31, %v4675_v47 }
 0x158   :  { %v2105_v8 = vpop.f32.mrf.mxu0  ;;  %v3919_v33 = vpack.c.bf16 %v2575_v3, %v2574_v56  ;;  %v3792_v56 = vunpack.c.l.bf16 %v4068_v55  ;;  %v3793_v3 = vunpack.c.h.bf16 %v4068_v55 }
 0x159   :  { %v2104_v12 = vadd.f32 %v2103_v5, %v1935_v46  ;;  %v3021_v5 = vor.u32 %v3643_v62, %v3018_v19 }
 0x15a   :  { %4098 = vst [vmem:[%s5822_s5 + $0x10] sm:$0xff] %v3919_v33  }
 0x15b   :  { %v2320_v39 = vmul.f32 %v4874_v32, %v2104_v12  ;;  %vm2255_vm7 = vcmp.ge.f32.partialorder %v2104_v12, 0.0 }
 0x15c   :  { %v1767_v0 = vpop.f32.mrf.mxu2 }
 0x15d   :  { %v1768_v7 = vadd.f32 %v1767_v0, %v1599_v48  ;;  %v1936_v42 = vpop.f32.mrf.mxu3  ;;  %v2384_v13 = vsel %vm2255_vm7, %v2104_v12, %v2320_v39  ;;  %v3647_v12 = vld [vmem:[%s5819_s0 + $0x20c] sm:$0xf]  ;;  %v3036_v0 = vld [vmem:[%s5819_s0 + $0x210] sm:$0xf] }
 0x15e   :  { %v1601_v43 = vpop.f32.mrf.mxu1  ;;  %v2576_v23 = vsub.f32 %v2384_v13, %v3792_v56  ;;  %v4069_v13 = vld [vmem:[%s5821_s4 + $0x20] sm:$0xff]  }
 0x15f   :  { %v1937_v51 = vadd.f32 %v1936_v42, %v1768_v7  ;;  %v1602_v33 = vadd.f32 %v1601_v43, %v1433_v61  ;;  %v3648_v7 = vld [vmem:[%s5819_s0 + $0x214] sm:$0xf]  ;;  %v3044_v43 = vld [vmem:[%s5819_s0 + $0x218] sm:$0xf]  ;;  %v3037_v61 = vor.u32 %v3650_v53, %v3036_v0 }
 0x160   :  { %v2108_v21 = vpop.f32.mrf.mxu0 }
 0x161   :  { %v2106_v16 = vadd.f32 %v2105_v8, %v1937_v51  ;;  %1640 = vmatmul.bf16.gmra.mxu1 %v3013_v45  ;;  %1809 = vmatmul.bf16.gmra.mxu2 %v3017_v57  ;;  %v3038_v57 = vld [vmem:[%s5819_s0 + $0x224] sm:$0xf0]  ;;  %v3033_v51 = vor.u32 %v3647_v12, %v3030_v41 }
 0x162   :  { %1978 = vmatmul.bf16.gmra.mxu3 %v3021_v5  ;;  %v3651_v5 = vld [vmem:[%s5819_s0 + $0x228] sm:$0xf0] }
 0x163   :  { %3562 = vmatmul.msk.bf16.gmra.mxu0 %vm1306_vm0, %v3025_v17  ;;  %vm2256_vm8 = vcmp.ge.f32.partialorder %v2106_v16, 0.0  ;;  %v2321_v46 = vmul.f32 %v4874_v32, %v2106_v16  ;;  %v3045_v56 = vor.u32 %v3651_v5, %v3044_v43  ;;  %v3056_v43 = vld [vmem:[%s5819_s0 + $0x238] sm:$0xf]  ;;  %v3653_v5 = vld [vmem:[%s5819_s0 + $0x23c] sm:$0xf] }
 0x164   :  { %v1770_v37 = vpop.f32.mrf.mxu2 }
 0x165   :  { %v2385_v4 = vsel %vm2256_vm8, %v2106_v16, %v2321_v46  ;;  %v1771_v26 = vadd.f32 %v1770_v37, %v1602_v33  ;;  %v1939_v49 = vpop.f32.mrf.mxu3  ;;  %v1438_v37 = vadd.f32 %v4840_v31, %v4716_v25 }
 0x166   :  { %v2577_v62 = vsub.f32 %v2385_v4, %v3793_v3  ;;  %v1603_v47 = vpop.f32.mrf.mxu1 }
 0x167   :  { %v1940_v8 = vadd.f32 %v1939_v49, %v1771_v26  ;;  %v1604_v45 = vadd.f32 %v1603_v47, %v1435_v35  ;;  %v3796_v26 = vunpack.c.l.bf16 %v4069_v13  ;;  %v3797_v49 = vunpack.c.h.bf16 %v4069_v13 }
 0x168   :  { %v2110_v48 = vpop.f32.mrf.mxu0  ;;  %v3924_v19 = vpack.c.bf16 %v2577_v62, %v2576_v23 }
 0x169   :  { %v2109_v42 = vadd.f32 %v2108_v21, %v1940_v8  ;;  %v3041_v21 = vor.u32 %v3648_v7, %v3038_v57  ;;  %v3050_v57 = vld [vmem:[%s5819_s0 + $0x244] sm:$0xf0] }
 0x16a   :  { %4099 = vst [vmem:[%s5822_s5 + $0x18] sm:$0xff] %v3924_v19  }
 0x16b   :  { %v2322_v3 = vmul.f32 %v4874_v32, %v2109_v42  ;;  %vm2257_vm9 = vcmp.ge.f32.partialorder %v2109_v42, 0.0 }
 0x16c   :  { %v1772_v17 = vpop.f32.mrf.mxu2 }
 0x16d   :  { %v1773_v39 = vadd.f32 %v1772_v17, %v1604_v45  ;;  %v1941_v55 = vpop.f32.mrf.mxu3  ;;  %v2386_v23 = vsel %vm2257_vm9, %v2109_v42, %v2322_v3  ;;  %v1440_v45 = vadd.f32 %v4840_v31, %v4725_v29  ;;  %v3652_v42 = vld [vmem:[%s5819_s0 + $0x234] sm:$0xf]  ;;  %v3655_v29 = vld [vmem:[%s5819_s0 + $0x248] sm:$0xf0] }
 0x16e   :  { %v1606_v16 = vpop.f32.mrf.mxu1  ;;  %v2578_v41 = vsub.f32 %v2386_v23, %v3796_v26  ;;  %v3053_v3 = vor.u32 %v3652_v42, %v3050_v57  ;;  %v3057_v13 = vor.u32 %v3655_v29, %v3056_v43  ;;  %v4070_v26 = vld [vmem:[%s5821_s4 + $0x28] sm:$0xff]   ;;  %v1445_v29 = vadd.f32 %v4840_v31, %v4766_v63  ;;  %v3660_v63 = vld [vmem:[%s5819_s0 + $0x270] sm:$0xf0] }
 0x16f   :  { %v1942_v46 = vadd.f32 %v1941_v55, %v1773_v39  ;;  %v1607_v47 = vadd.f32 %v1606_v16, %v1438_v37  ;;  %v3058_v55 = vld [vmem:[%s5819_s0 + $0x24c] sm:$0xf0] }
 0x170   :  { %v2113_v33 = vpop.f32.mrf.mxu0 }
 0x171   :  { %v2111_v4 = vadd.f32 %v2110_v48, %v1942_v46  ;;  %1645 = vmatmul.bf16.gmra.mxu1 %v3033_v51  ;;  %1814 = vmatmul.bf16.gmra.mxu2 %v3037_v61  ;;  %v3064_v51 = vld [vmem:[%s5819_s0 + $0x240] sm:$0xf]  ;;  %v3656_v61 = vld [vmem:[%s5819_s0 + $0x250] sm:$0xf0] }
 0x172   :  { %1983 = vmatmul.bf16.gmra.mxu3 %v3041_v21  ;;  %v3065_v37 = vor.u32 %v3656_v61, %v3064_v51 }
 0x173   :  { %3563 = vmatmul.msk.bf16.gmra.mxu0 %vm1306_vm0, %v3045_v56  ;;  %vm2258_vm10 = vcmp.ge.f32.partialorder %v2111_v4, 0.0  ;;  %v2323_v62 = vmul.f32 %v4874_v32, %v2111_v4 }
 0x174   :  { %v1775_v8 = vpop.f32.mrf.mxu2 }
 0x175   :  { %v2387_v19 = vsel %vm2258_vm10, %v2111_v4, %v2323_v62  ;;  %v1776_v35 = vadd.f32 %v1775_v8, %v1607_v47  ;;  %v1944_v12 = vpop.f32.mrf.mxu3  ;;  %v1443_v62 = vadd.f32 %v4840_v31, %v4757_v9  ;;  %v3800_v8 = vunpack.c.l.bf16 %v4070_v26 }
 0x176   :  { %v2579_v0 = vsub.f32 %v2387_v19, %v3797_v49  ;;  %v1608_v25 = vpop.f32.mrf.mxu1  ;;  %v3801_v19 = vunpack.c.h.bf16 %v4070_v26 }
 0x177   :  { %v1945_v48 = vadd.f32 %v1944_v12, %v1776_v35  ;;  %v1609_v39 = vadd.f32 %v1608_v25, %v1440_v45 }
 0x178   :  { %v2115_v53 = vpop.f32.mrf.mxu0  ;;  %v3929_v7 = vpack.c.bf16 %v2579_v0, %v2578_v41 }
 0x179   :  { %v2114_v17 = vadd.f32 %v2113_v33, %v1945_v48  ;;  %v3061_v33 = vor.u32 %v3653_v5, %v3058_v55  ;;  %v3657_v5 = vld [vmem:[%s5819_s0 + $0x25c] sm:$0xf]  ;;  %v3658_v55 = vld [vmem:[%s5819_s0 + $0x264] sm:$0xf] }
 0x17a   :  { %4100 = vst [vmem:[%s5822_s5 + $0x20] sm:$0xff] %v3929_v7  }
 0x17b   :  { %v2324_v4 = vmul.f32 %v4874_v32, %v2114_v17  ;;  %vm2259_vm11 = vcmp.ge.f32.partialorder %v2114_v17, 0.0 }
 0x17c   :  { %v1777_v16 = vpop.f32.mrf.mxu2 }
 0x17d   :  { %v1778_v21 = vadd.f32 %v1777_v16, %v1609_v39  ;;  %v1946_v56 = vpop.f32.mrf.mxu3  ;;  %v2388_v35 = vsel %vm2259_vm11, %v2114_v17, %v2324_v4  ;;  %v3070_v17 = vld [vmem:[%s5819_s0 + $0x26c] sm:$0xf0]  ;;  %v3076_v39 = vld [vmem:[%s5819_s0 + $0x260] sm:$0xf]  ;;  %v3078_v16 = vld [vmem:[%s5819_s0 + $0x274] sm:$0xf0] }
 0x17e   :  { %v1611_v46 = vpop.f32.mrf.mxu1  ;;  %v2580_v45 = vsub.f32 %v2388_v35, %v3800_v8  ;;  %v3081_v26 = vor.u32 %v3658_v55, %v3078_v16  ;;  %v3096_v55 = vld [vmem:[%s5819_s0 + $0x288] sm:$0xf] }
 0x17f   :  { %v1947_v49 = vadd.f32 %v1946_v56, %v1778_v21  ;;  %v1612_v41 = vadd.f32 %v1611_v46, %v1443_v62  ;;  %v3084_v21 = vld [vmem:[%s5819_s0 + $0x268] sm:$0xf]  ;;  %v3661_v56 = vld [vmem:[%s5819_s0 + $0x278] sm:$0xf0]  ;;  %v4071_v62 = vld [vmem:[%s5821_s4 + $0x30] sm:$0xff]  }
 0x180   :  { %v2118_v23 = vpop.f32.mrf.mxu0 }
 0x181   :  { %v2116_v47 = vadd.f32 %v2115_v53, %v1947_v49  ;;  %1650 = vmatmul.bf16.gmra.mxu1 %v3053_v3  ;;  %1819 = vmatmul.bf16.gmra.mxu2 %v3057_v13  ;;  %v3085_v49 = vor.u32 %v3661_v56, %v3084_v21  ;;  %v3098_v21 = vld [vmem:[%s5819_s0 + $0x29c] sm:$0xf0]  ;;  %v3104_v56 = vld [vmem:[%s5819_s0 + $0x290] sm:$0xf] }
 0x182   :  { %1988 = vmatmul.bf16.gmra.mxu3 %v3061_v33  ;;  %v3073_v33 = vor.u32 %v3657_v5, %v3070_v17  ;;  %v1450_v17 = vadd.f32 %v4840_v31, %v4807_v1  ;;  %v3665_v1 = vld [vmem:[%s5819_s0 + $0x298] sm:$0xf0] }
 0x183   :  { %3564 = vmatmul.msk.bf16.gmra.mxu0 %vm1306_vm0, %v3065_v37  ;;  %vm2260_vm12 = vcmp.ge.f32.partialorder %v2116_v47, 0.0  ;;  %v2325_v12 = vmul.f32 %v4874_v32, %v2116_v47  ;;  %v3077_v37 = vor.u32 %v3660_v63, %v3076_v39  ;;  %v3662_v39 = vld [vmem:[%s5819_s0 + $0x284] sm:$0xf]  ;;  %v3090_v63 = vld [vmem:[%s5819_s0 + $0x294] sm:$0xf0] }
 0x184   :  { %v1780_v0 = vpop.f32.mrf.mxu2 }
 0x185   :  { %v2389_v25 = vsel %vm2260_vm12, %v2116_v47, %v2325_v12  ;;  %v1781_v48 = vadd.f32 %v1780_v0, %v1612_v41  ;;  %v1949_v7 = vpop.f32.mrf.mxu3  ;;  %v3804_v12 = vunpack.c.l.bf16 %v4071_v62  ;;  %v3805_v41 = vunpack.c.h.bf16 %v4071_v62 }
 0x186   :  { %v2581_v42 = vsub.f32 %v2389_v25, %v3801_v19  ;;  %v1613_v9 = vpop.f32.mrf.mxu1  ;;  %v1448_v19 = vadd.f32 %v4840_v31, %v4798_v36 }
 0x187   :  { %v1950_v53 = vadd.f32 %v1949_v7, %v1781_v48  ;;  %v1614_v61 = vadd.f32 %v1613_v9, %v1445_v29 }
 0x188   :  { %v2120_v57 = vpop.f32.mrf.mxu0  ;;  %v3934_v43 = vpack.c.bf16 %v2581_v42, %v2580_v45 }
 0x189   :  { %v2119_v51 = vadd.f32 %v2118_v23, %v1950_v53 }
 0x18a   :  { %4101 = vst [vmem:[%s5822_s5 + $0x28] sm:$0xff] %v3934_v43  }
 0x18b   :  { %v2326_v23 = vmul.f32 %v4874_v32, %v2119_v51  ;;  %vm2261_vm13 = vcmp.ge.f32.partialorder %v2119_v51, 0.0 }
 0x18c   :  { %v1782_v3 = vpop.f32.mrf.mxu2 }
 0x18d   :  { %v1783_v13 = vadd.f32 %v1782_v3, %v1614_v61  ;;  %v1951_v46 = vpop.f32.mrf.mxu3  ;;  %v2390_v0 = vsel %vm2261_vm13, %v2119_v51, %v2326_v23  ;;  %v3663_v51 = vld [vmem:[%s5819_s0 + $0x28c] sm:$0xf]  ;;  %v3666_v3 = vld [vmem:[%s5819_s0 + $0x2a0] sm:$0xf0] }
 0x18e   :  { %v1616_v4 = vpop.f32.mrf.mxu1  ;;  %v2582_v53 = vsub.f32 %v2390_v0, %v3804_v12  ;;  %v3105_v23 = vor.u32 %v3666_v3, %v3104_v56  ;;  %v3671_v56 = vld [vmem:[%s5819_s0 + $0x2c8] sm:$0xf0] }
 0x18f   :  { %v1952_v47 = vadd.f32 %v1951_v46, %v1783_v13  ;;  %v1617_v48 = vadd.f32 %v1616_v4, %v1448_v19  ;;  %v3097_v4 = vor.u32 %v3665_v1, %v3096_v55  ;;  %v3116_v55 = vld [vmem:[%s5819_s0 + $0x2b0] sm:$0xf]  ;;  %v3668_v1 = vld [vmem:[%s5819_s0 + $0x2b4] sm:$0xf] }
 0x190   :  { %v2123_v8 = vpop.f32.mrf.mxu0 }
 0x191   :  { %v2121_v35 = vadd.f32 %v2120_v57, %v1952_v47  ;;  %1655 = vmatmul.bf16.gmra.mxu1 %v3073_v33  ;;  %1824 = vmatmul.bf16.gmra.mxu2 %v3077_v37  ;;  %v3093_v37 = vor.u32 %v3662_v39, %v3090_v63  ;;  %v4072_v47 = vld [vmem:[%s5821_s4 + $0x38] sm:$0xff]   ;;  %v3667_v39 = vld [vmem:[%s5819_s0 + $0x2ac] sm:$0xf]  ;;  %v3110_v63 = vld [vmem:[%s5819_s0 + $0x2bc] sm:$0xf0] }
 0x192   :  { %1993 = vmatmul.bf16.gmra.mxu3 %v3081_v26  ;;  %v3809_v0 = vunpack.c.h.bf16 %v4072_v47 }
 0x193   :  { %3565 = vmatmul.msk.bf16.gmra.mxu0 %vm1306_vm0, %v3085_v49  ;;  %vm2262_vm14 = vcmp.ge.f32.partialorder %v2121_v35, 0.0  ;;  %v2327_v25 = vmul.f32 %v4874_v32, %v2121_v35  ;;  %v3101_v49 = vor.u32 %v3663_v51, %v3098_v21  ;;  %v3124_v21 = vld [vmem:[%s5819_s0 + $0x2b8] sm:$0xf] }
 0x194   :  { %v1785_v7 = vpop.f32.mrf.mxu2 }
 0x195   :  { %v2391_v45 = vsel %vm2262_vm14, %v2121_v35, %v2327_v25  ;;  %v1786_v42 = vadd.f32 %v1785_v7, %v1617_v48  ;;  %v1954_v9 = vpop.f32.mrf.mxu3  ;;  %v1453_v35 = vadd.f32 %v4840_v31, %v4509_v14 }
 0x196   :  { %v2583_v43 = vsub.f32 %v2391_v45, %v3805_v41  ;;  %v1618_v36 = vpop.f32.mrf.mxu1  ;;  %v3808_v41 = vunpack.c.l.bf16 %v4072_v47 }
 0x197   :  { %v1955_v57 = vadd.f32 %v1954_v9, %v1786_v42  ;;  %v1619_v16 = vadd.f32 %v1618_v36, %v1450_v17  ;;  %v1455_v17 = vadd.f32 %v4840_v31, %v4518_v20  ;;  %v3670_v20 = vld [vmem:[%s5819_s0 + $0x2c0] sm:$0xf0] }
 0x198   :  { %v2125_v29 = vpop.f32.mrf.mxu0  ;;  %v3939_v5 = vpack.c.bf16 %v2583_v43, %v2582_v53 }
 0x199   :  { %v2124_v61 = vadd.f32 %v2123_v8, %v1955_v57 }
 0x19a   :  { %4102 = vst [vmem:[%s5822_s5 + $0x30] sm:$0xff] %v3939_v5  }
 0x19b   :  { %v2328_v62 = vmul.f32 %v4874_v32, %v2124_v61  ;;  %vm2263_vm15 = vcmp.ge.f32.partialorder %v2124_v61, 0.0 }
 0x19c   :  { %v1787_v13 = vpop.f32.mrf.mxu2 }
 0x19d   :  { %v1788_v46 = vadd.f32 %v1787_v13, %v1619_v16  ;;  %v1956_v33 = vpop.f32.mrf.mxu3  ;;  %v2392_v25 = vsel %vm2263_vm15, %v2124_v61, %v2328_v62  ;;  %v3118_v16 = vld [vmem:[%s5819_s0 + $0x2c4] sm:$0xf0]  ;;  %v4073_v62 = vld [vmem:[%s5821_s4 + $0x40] sm:$0xff]  }
 0x19e   :  { %v1621_v26 = vpop.f32.mrf.mxu1  ;;  %v2584_v43 = vsub.f32 %v2392_v25, %v3808_v41  ;;  %v3813_v41 = vunpack.c.h.bf16 %v4073_v62 }
 0x19f   :  { %v1957_v8 = vadd.f32 %v1956_v33, %v1788_v46  ;;  %v1622_v7 = vadd.f32 %v1621_v26, %v1453_v35  ;;  %v3113_v33 = vor.u32 %v3667_v39, %v3110_v63  ;;  %v3121_v26 = vor.u32 %v3668_v1, %v3118_v16  ;;  %v3136_v39 = vld [vmem:[%s5819_s0 + $0x2d8] sm:$0xf]  ;;  %v3673_v63 = vld [vmem:[%s5819_s0 + $0x2dc] sm:$0xf]  ;;  %v3138_v1 = vld [vmem:[%s5819_s0 + $0x2ec] sm:$0xf0] }
 0x1a0   :  { %v2128_v19 = vpop.f32.mrf.mxu0 }
 0x1a1   :  { %v2126_v12 = vadd.f32 %v2125_v29, %v1957_v8  ;;  %1660 = vmatmul.bf16.gmra.mxu1 %v3093_v37  ;;  %1829 = vmatmul.bf16.gmra.mxu2 %v3097_v4  ;;  %v3117_v37 = vor.u32 %v3670_v20, %v3116_v55 }
 0x1a2   :  { %1998 = vmatmul.bf16.gmra.mxu3 %v3101_v49  ;;  %v3125_v49 = vor.u32 %v3671_v56, %v3124_v21 }
 0x1a3   :  { %3566 = vmatmul.msk.bf16.gmra.mxu0 %vm1306_vm0, %v3105_v23  ;;  %vm2264_vm1 = vcmp.ge.f32.partialorder %v2126_v12, 0.0  ;;  %v2329_v48 = vmul.f32 %v4874_v32, %v2126_v12 }
 0x1a4   :  { %v1790_v45 = vpop.f32.mrf.mxu2 }
 0x1a5   :  { %v2393_v42 = vsel %vm2264_vm1, %v2126_v12, %v2329_v48  ;;  %v1791_v9 = vadd.f32 %v1790_v45, %v1622_v7  ;;  %v1959_v53 = vpop.f32.mrf.mxu3  ;;  %v3812_v12 = vunpack.c.l.bf16 %v4073_v62  ;;  %v1463_v62 = vadd.f32 %v4840_v31, %v4591_v54 }
 0x1a6   :  { %v2585_v36 = vsub.f32 %v2393_v42, %v3809_v0  ;;  %v1623_v14 = vpop.f32.mrf.mxu1 }
 0x1a7   :  { %v1960_v57 = vadd.f32 %v1959_v53, %v1791_v9  ;;  %v1624_v61 = vadd.f32 %v1623_v14, %v1455_v17  ;;  %v3130_v17 = vld [vmem:[%s5819_s0 + $0x2e4] sm:$0xf0] }
 0x1a8   :  { %v2130_v29 = vpop.f32.mrf.mxu0  ;;  %v3944_v5 = vpack.c.bf16 %v2585_v36, %v2584_v43 }
 0x1a9   :  { %v2129_v51 = vadd.f32 %v2128_v19, %v1960_v57  ;;  %v1458_v19 = vadd.f32 %v4840_v31, %v4550_v34 }
 0x1aa   :  { %4103 = vst [vmem:[%s5822_s5 + $0x38] sm:$0xff] %v3944_v5   ;;  %v3672_v5 = vld [vmem:[%s5819_s0 + $0x2d4] sm:$0xf] }
 0x1ab   :  { %v2330_v23 = vmul.f32 %v4874_v32, %v2129_v51  ;;  %vm2265_vm2 = vcmp.ge.f32.partialorder %v2129_v51, 0.0 }
 0x1ac   :  { %v1792_v3 = vpop.f32.mrf.mxu2 }
 0x1ad   :  { %v1793_v13 = vadd.f32 %v1792_v3, %v1624_v61  ;;  %v1961_v46 = vpop.f32.mrf.mxu3  ;;  %v2394_v0 = vsel %vm2265_vm2, %v2129_v51, %v2330_v23  ;;  %v3144_v51 = vld [vmem:[%s5819_s0 + $0x2e0] sm:$0xf]  ;;  %v3676_v61 = vld [vmem:[%s5819_s0 + $0x2f0] sm:$0xf0]  ;;  %v3133_v3 = vor.u32 %v3672_v5, %v3130_v17  ;;  %v3158_v17 = vld [vmem:[%s5819_s0 + $0x314] sm:$0xf0] }
 0x1ae   :  { %v1626_v4 = vpop.f32.mrf.mxu1  ;;  %v2586_v53 = vsub.f32 %v2394_v0, %v3812_v12 }
 0x1af   :  { %v1962_v47 = vadd.f32 %v1961_v46, %v1793_v13  ;;  %v1627_v48 = vadd.f32 %v1626_v4, %v1458_v19 }
 0x1b0   :  { %v2133_v8 = vpop.f32.mrf.mxu0 }
 0x1b1   :  { %v2131_v35 = vadd.f32 %v2130_v29, %v1962_v47  ;;  %1665 = vmatmul.bf16.gmra.mxu1 %v3113_v33  ;;  %1834 = vmatmul.bf16.gmra.mxu2 %v3117_v37  ;;  %v1460_v29 = vadd.f32 %v4840_v31, %v4559_v40  ;;  %v3675_v40 = vld [vmem:[%s5819_s0 + $0x2e8] sm:$0xf0]  ;;  %v3141_v33 = vor.u32 %v3673_v63, %v3138_v1 }
 0x1b2   :  { %2003 = vmatmul.bf16.gmra.mxu3 %v3121_v26  ;;  %v3137_v13 = vor.u32 %v3675_v40, %v3136_v39  ;;  %v3145_v37 = vor.u32 %v3676_v61, %v3144_v51  ;;  %v4074_v26 = vld [vmem:[%s5821_s4 + $0x48] sm:$0xff]   ;;  %v3681_v40 = vld [vmem:[%s5819_s0 + $0x318] sm:$0xf0] }
 0x1b3   :  { %3567 = vmatmul.msk.bf16.gmra.mxu0 %vm1306_vm0, %v3125_v49  ;;  %vm2266_vm3 = vcmp.ge.f32.partialorder %v2131_v35, 0.0  ;;  %v2331_v25 = vmul.f32 %v4874_v32, %v2131_v35  ;;  %v3817_v19 = vunpack.c.h.bf16 %v4074_v26  ;;  %v3164_v39 = vld [vmem:[%s5819_s0 + $0x308] sm:$0xf] }
 0x1b4   :  { %v1795_v7 = vpop.f32.mrf.mxu2 }
 0x1b5   :  { %v2395_v45 = vsel %vm2266_vm3, %v2131_v35, %v2331_v25  ;;  %v1796_v42 = vadd.f32 %v1795_v7, %v1627_v48  ;;  %v1964_v9 = vpop.f32.mrf.mxu3 }
 0x1b6   :  { %v2587_v43 = vsub.f32 %v2395_v45, %v3813_v41  ;;  %v1628_v34 = vpop.f32.mrf.mxu1 }
 0x1b7   :  { %v1965_v36 = vadd.f32 %v1964_v9, %v1796_v42  ;;  %v1629_v20 = vadd.f32 %v1628_v34, %v1460_v29  ;;  %v1465_v34 = vadd.f32 %v4840_v31, %v4600_v60  ;;  %v3680_v31 = vld [vmem:[%s5819_s0 + $0x310] sm:$0xf0]  ;;  %v3678_v60 = vld [vmem:[%s5819_s0 + $0x304] sm:$0xf] }
 0x1b8   :  { %v2135_v14 = vpop.f32.mrf.mxu0  ;;  %v3949_v57 = vpack.c.bf16 %v2587_v43, %v2586_v53 }
 0x1b9   :  { %v2134_v55 = vadd.f32 %v2133_v8, %v1965_v36  ;;  %v3816_v8 = vunpack.c.l.bf16 %v4074_v26  ;;  %v3677_v36 = vld [vmem:[%s5819_s0 + $0x2fc] sm:$0xf] }
 0x1ba   :  { %4104 = vst [vmem:[%s5822_s5 + $0x40] sm:$0xff] %v3949_v57   ;;  %v3156_v57 = vld [vmem:[%s5819_s0 + $0x300] sm:$0xf] }
 0x1bb   :  { %v2332_v4 = vmul.f32 %v4874_v32, %v2134_v55  ;;  %vm2267_vm4 = vcmp.ge.f32.partialorder %v2134_v55, 0.0  ;;  %v3157_v51 = vor.u32 %v3680_v31, %v3156_v57  ;;  %v3686_v57 = vld [vmem:[%s5819_s0 + $0x340] sm:$0xf0] }
 0x1bc   :  { %v1797_v16 = vpop.f32.mrf.mxu2 }
 0x1bd   :  { %v1798_v21 = vadd.f32 %v1797_v16, %v1629_v20  ;;  %v1966_v56 = vpop.f32.mrf.mxu3  ;;  %v2396_v35 = vsel %vm2267_vm4, %v2134_v55, %v2332_v4  ;;  %v3161_v16 = vor.u32 %v3678_v60, %v3158_v17 }
 0x1be   :  { %v1631_v46 = vpop.f32.mrf.mxu1  ;;  %v2588_v45 = vsub.f32 %v2396_v35, %v3816_v8 }
 0x1bf   :  { %v1967_v49 = vadd.f32 %v1966_v56, %v1798_v21  ;;  %v1632_v41 = vadd.f32 %v1631_v46, %v1463_v62  ;;  %v3165_v21 = vor.u32 %v3681_v40, %v3164_v39 }
 0x1c0   :  { %v2138_v23 = vpop.f32.mrf.mxu0 }
 0x1c1   :  { %v2136_v47 = vadd.f32 %v2135_v14, %v1967_v49  ;;  %1670 = vmatmul.bf16.gmra.mxu1 %v3133_v3  ;;  %1839 = vmatmul.bf16.gmra.mxu2 %v3137_v13  ;;  %v3150_v14 = vld [vmem:[%s5819_s0 + $0x30c] sm:$0xf0] }
 0x1c2   :  { %2008 = vmatmul.bf16.gmra.mxu3 %v3141_v33  ;;  %v3153_v1 = vor.u32 %v3677_v36, %v3150_v14  ;;  %v4075_v3 = vld [vmem:[%s5821_s4 + $0x50] sm:$0xff]   ;;  %v5253_v33 = vld [vmem:[%s5818_s2] ss:$0 sm:$0xff] }
 0x1c3   :  { %3568 = vmatmul.msk.bf16.gmra.mxu0 %vm1306_vm0, %v3145_v37  ;;  %vm2268_vm5 = vcmp.ge.f32.partialorder %v2136_v47, 0.0  ;;  %v2333_v12 = vmul.f32 %v4874_v32, %v2136_v47  ;;  %v1468_v37 = vadd.f32 %v5253_v33, %v4632_v10  ;;  %v3820_v26 = vunpack.c.l.bf16 %v4075_v3  ;;  %v3178_v36 = vld [vmem:[%s5819_s0 + $0x33c] sm:$0xf0]  ;;  %v3184_v14 = vld [vmem:[%s5819_s0 + $0x330] sm:$0xf] }
 0x1c4   :  { %v1800_v0 = vpop.f32.mrf.mxu2  ;;  %v3821_v49 = vunpack.c.h.bf16 %v4075_v3 }
 0x1c5   :  { %v2397_v25 = vsel %vm2268_vm5, %v2136_v47, %v2333_v12  ;;  %v1801_v48 = vadd.f32 %v1800_v0, %v1632_v41  ;;  %v1969_v7 = vpop.f32.mrf.mxu3 }
 0x1c6   :  { %v2589_v42 = vsub.f32 %v2397_v25, %v3817_v19  ;;  %v1633_v54 = vpop.f32.mrf.mxu1 }
 0x1c7   :  { %v1970_v9 = vadd.f32 %v1969_v7, %v1801_v48  ;;  %v1634_v5 = vadd.f32 %v1633_v54, %v1465_v34  ;;  %v3170_v54 = vld [vmem:[%s5819_s0 + $0x334] sm:$0xf0] }
 0x1c8   :  { %v2140_v53 = vpop.f32.mrf.mxu0  ;;  %v3954_v43 = vpack.c.bf16 %v2589_v42, %v2588_v45  ;;  %v1470_v45 = vadd.f32 %v5253_v33, %v4641_v22  ;;  %v3682_v42 = vld [vmem:[%s5819_s0 + $0x324] sm:$0xf]  ;;  %v3685_v22 = vld [vmem:[%s5819_s0 + $0x338] sm:$0xf0] }
 0x1c9   :  { %v2139_v29 = vadd.f32 %v2138_v23, %v1970_v9  ;;  %v3176_v9 = vld [vmem:[%s5819_s0 + $0x328] sm:$0xf] }
 0x1ca   :  { %4105 = vst [vmem:[%s5822_s5 + $0x48] sm:$0xff] %v3954_v43   ;;  %v3177_v17 = vor.u32 %v3685_v22, %v3176_v9 }
 0x1cb   :  { %v2334_v56 = vmul.f32 %v4874_v32, %v2139_v29  ;;  %vm2269_vm6 = vcmp.ge.f32.partialorder %v2139_v29, 0.0 }
 0x1cc   :  { %v1802_v63 = vpop.f32.mrf.mxu2 }
 0x1cd   :  { %v1803_v55 = vadd.f32 %v1802_v63, %v1634_v5  ;;  %v1971_v20 = vpop.f32.mrf.mxu3  ;;  %v2398_v23 = vsel %vm2269_vm6, %v2139_v29, %v2334_v56  ;;  %v3173_v5 = vor.u32 %v3682_v42, %v3170_v54  ;;  %v3185_v63 = vor.u32 %v3686_v57, %v3184_v14  ;;  %v3691_v42 = vld [vmem:[%s5819_s0 + $0x368] sm:$0xf0] }
 0x1ce   :  { %v1636_v61 = vpop.f32.mrf.mxu1  ;;  %v2590_v41 = vsub.f32 %v2398_v23, %v3820_v26 }
 0x1cf   :  { %v1972_v13 = vadd.f32 %v1971_v20, %v1803_v55  ;;  %v1637_v47 = vadd.f32 %v1636_v61, %v1468_v37  ;;  %v4076_v20 = vld [vmem:[%s5821_s4 + $0x58] sm:$0xff]   ;;  %v1473_v61 = vadd.f32 %v5253_v33, %v4673_v44 }
 0x1d0   :  { %v2143_v46 = vpop.f32.mrf.mxu0  ;;  %v3825_v56 = vunpack.c.h.bf16 %v4076_v20 }
 0x1d1   :  { %v2141_v4 = vadd.f32 %v2140_v53, %v1972_v13  ;;  %1675 = vmatmul.bf16.gmra.mxu1 %v3153_v1  ;;  %1844 = vmatmul.bf16.gmra.mxu2 %v3157_v51  ;;  %v3683_v53 = vld [vmem:[%s5819_s0 + $0x32c] sm:$0xf] }
 0x1d2   :  { %2013 = vmatmul.bf16.gmra.mxu3 %v3161_v16  ;;  %v3181_v40 = vor.u32 %v3683_v53, %v3178_v36 }
 0x1d3   :  { %3569 = vmatmul.msk.bf16.gmra.mxu0 %vm1306_vm0, %v3165_v21  ;;  %vm2270_vm7 = vcmp.ge.f32.partialorder %v2141_v4, 0.0  ;;  %v2335_v62 = vmul.f32 %v4874_v32, %v2141_v4  ;;  %v3824_v21 = vunpack.c.l.bf16 %v4076_v20 }
 0x1d4   :  { %v1805_v8 = vpop.f32.mrf.mxu2 }
 0x1d5   :  { %v2399_v19 = vsel %vm2270_vm7, %v2141_v4, %v2335_v62  ;;  %v1806_v35 = vadd.f32 %v1805_v8, %v1637_v47  ;;  %v1974_v12 = vpop.f32.mrf.mxu3 }
 0x1d6   :  { %v2591_v0 = vsub.f32 %v2399_v19, %v3821_v49  ;;  %v1638_v10 = vpop.f32.mrf.mxu1 }
 0x1d7   :  { %v1975_v25 = vadd.f32 %v1974_v12, %v1806_v35  ;;  %v1639_v34 = vadd.f32 %v1638_v10, %v1470_v45  ;;  %v1475_v35 = vadd.f32 %v5253_v33, %v4682_v52  ;;  %v3687_v12 = vld [vmem:[%s5819_s0 + $0x34c] sm:$0xf]  ;;  %v3690_v52 = vld [vmem:[%s5819_s0 + $0x360] sm:$0xf0]  ;;  %v3688_v10 = vld [vmem:[%s5819_s0 + $0x354] sm:$0xf] }
 0x1d8   :  { %v2145_v48 = vpop.f32.mrf.mxu0  ;;  %v3959_v7 = vpack.c.bf16 %v2591_v0, %v2590_v41  ;;  %v3190_v41 = vld [vmem:[%s5819_s0 + $0x35c] sm:$0xf0]  ;;  %v3196_v0 = vld [vmem:[%s5819_s0 + $0x350] sm:$0xf]  ;;  %v3204_v45 = vld [vmem:[%s5819_s0 + $0x358] sm:$0xf] }
 0x1d9   :  { %v2144_v43 = vadd.f32 %v2143_v46, %v1975_v25  ;;  %v3193_v53 = vor.u32 %v3687_v12, %v3190_v41  ;;  %v3205_v14 = vor.u32 %v3691_v42, %v3204_v45  ;;  %v4078_v45 = vld [vmem:[%s5821_s4 + $0x68] sm:$0xff]  }
 0x1da   :  { %4106 = vst [vmem:[%s5822_s5 + $0x50] sm:$0xff] %v3959_v7   ;;  %v3198_v7 = vld [vmem:[%s5819_s0 + $0x364] sm:$0xf0] }
 0x1db   :  { %v2336_v55 = vmul.f32 %v4874_v32, %v2144_v43  ;;  %vm2271_vm8 = vcmp.ge.f32.partialorder %v2144_v43, 0.0  ;;  %v3201_v36 = vor.u32 %v3688_v10, %v3198_v7 }
 0x1dc   :  { %v1807_v31 = vpop.f32.mrf.mxu2 }
 0x1dd   :  { %v1808_v60 = vadd.f32 %v1807_v31, %v1639_v34  ;;  %v1976_v29 = vpop.f32.mrf.mxu3  ;;  %v2400_v3 = vsel %vm2271_vm8, %v2144_v43, %v2336_v55  ;;  %v3197_v43 = vor.u32 %v3690_v52, %v3196_v0  ;;  %v4077_v31 = vld [vmem:[%s5821_s4 + $0x60] sm:$0xff]  }
 0x1de   :  { %v1641_v39 = vpop.f32.mrf.mxu1  ;;  %v2592_v23 = vsub.f32 %v2400_v3, %v3824_v21 }
 0x1df   :  { %v1977_v1 = vadd.f32 %v1976_v29, %v1808_v60  ;;  %v1642_v46 = vadd.f32 %v1641_v39, %v1473_v61  ;;  %v3828_v39 = vunpack.c.l.bf16 %v4077_v31 }
 0x1e0   :  { %v2148_v51 = vpop.f32.mrf.mxu0 }
 0x1e1   :  { %v2146_v16 = vadd.f32 %v2145_v48, %v1977_v1  ;;  %1680 = vmatmul.bf16.gmra.mxu1 %v3173_v5  ;;  %1849 = vmatmul.bf16.gmra.mxu2 %v3177_v17  ;;  %v1478_v5 = vadd.f32 %v5253_v33, %v4714_v11 }
 0x1e2   :  { %2018 = vmatmul.bf16.gmra.mxu3 %v3181_v40  ;;  %v3829_v40 = vunpack.c.h.bf16 %v4077_v31 }
 0x1e3   :  { %3570 = vmatmul.msk.bf16.gmra.mxu0 %vm1306_vm0, %v3185_v63  ;;  %vm2272_vm9 = vcmp.ge.f32.partialorder %v2146_v16, 0.0  ;;  %v2337_v13 = vmul.f32 %v4874_v32, %v2146_v16 }
 0x1e4   :  { %v1810_v37 = vpop.f32.mrf.mxu2 }
 0x1e5   :  { %v2401_v4 = vsel %vm2272_vm9, %v2146_v16, %v2337_v13  ;;  %v1811_v26 = vadd.f32 %v1810_v37, %v1642_v46  ;;  %v1979_v49 = vpop.f32.mrf.mxu3  ;;  %v1480_v37 = vadd.f32 %v5253_v33, %v4723_v28  ;;  %v3695_v28 = vld [vmem:[%s5819_s0 + $0x388] sm:$0xf0] }
 0x1e6   :  { %v2593_v62 = vsub.f32 %v2401_v4, %v3825_v56  ;;  %v1643_v44 = vpop.f32.mrf.mxu1  ;;  %v3692_v4 = vld [vmem:[%s5819_s0 + $0x374] sm:$0xf] }
 0x1e7   :  { %v1980_v47 = vadd.f32 %v1979_v49, %v1811_v26  ;;  %v1644_v48 = vadd.f32 %v1643_v44, %v1475_v35  ;;  %v3210_v26 = vld [vmem:[%s5819_s0 + $0x384] sm:$0xf0]  ;;  %v3216_v49 = vld [vmem:[%s5819_s0 + $0x378] sm:$0xf] }
 0x1e8   :  { %v2150_v8 = vpop.f32.mrf.mxu0  ;;  %v3964_v19 = vpack.c.bf16 %v2593_v62, %v2592_v23  ;;  %v3693_v23 = vld [vmem:[%s5819_s0 + $0x37c] sm:$0xf]  ;;  %v3213_v0 = vor.u32 %v3692_v4, %v3210_v26  ;;  %v3217_v52 = vor.u32 %v3695_v28, %v3216_v49 }
 0x1e9   :  { %v2149_v25 = vadd.f32 %v2148_v51, %v1980_v47  ;;  %v3218_v47 = vld [vmem:[%s5819_s0 + $0x38c] sm:$0xf0] }
 0x1ea   :  { %4107 = vst [vmem:[%s5822_s5 + $0x58] sm:$0xff] %v3964_v19   ;;  %v3696_v19 = vld [vmem:[%s5819_s0 + $0x390] sm:$0xf0] }
 0x1eb   :  { %v2338_v57 = vmul.f32 %v4874_v32, %v2149_v25  ;;  %vm2273_vm10 = vcmp.ge.f32.partialorder %v2149_v25, 0.0 }
 0x1ec   :  { %v1812_v54 = vpop.f32.mrf.mxu2 }
 0x1ed   :  { %v1813_v9 = vadd.f32 %v1812_v54, %v1644_v48  ;;  %v1981_v22 = vpop.f32.mrf.mxu3  ;;  %v2402_v63 = vsel %vm2273_vm10, %v2149_v25, %v2338_v57  ;;  %v3221_v25 = vor.u32 %v3693_v23, %v3218_v47 }
 0x1ee   :  { %v1646_v34 = vpop.f32.mrf.mxu1  ;;  %v2594_v21 = vsub.f32 %v2402_v63, %v3828_v39 }
 0x1ef   :  { %v1982_v60 = vadd.f32 %v1981_v22, %v1813_v9  ;;  %v1647_v20 = vadd.f32 %v1646_v34, %v1478_v5  ;;  %v1483_v9 = vadd.f32 %v5253_v33, %v4755_v2 }
 0x1f0   :  { %v2153_v29 = vpop.f32.mrf.mxu0 }
 0x1f1   :  { %v2151_v17 = vadd.f32 %v2150_v8, %v1982_v60  ;;  %1685 = vmatmul.bf16.gmra.mxu1 %v3193_v53  ;;  %1854 = vmatmul.bf16.gmra.mxu2 %v3197_v43  ;;  %v3224_v8 = vld [vmem:[%s5819_s0 + $0x380] sm:$0xf]  ;;  %v3832_v53 = vunpack.c.l.bf16 %v4078_v45  ;;  %v3833_v43 = vunpack.c.h.bf16 %v4078_v45 }
 0x1f2   :  { %2023 = vmatmul.bf16.gmra.mxu3 %v3201_v36  ;;  %v3225_v48 = vor.u32 %v3696_v19, %v3224_v8  ;;  %v1488_v19 = vadd.f32 %v5253_v33, %v4796_v24 }
 0x1f3   :  { %3571 = vmatmul.msk.bf16.gmra.mxu0 %vm1306_vm0, %v3205_v14  ;;  %vm2274_vm11 = vcmp.ge.f32.partialorder %v2151_v17, 0.0  ;;  %v2339_v55 = vmul.f32 %v4874_v32, %v2151_v17 }
 0x1f4   :  { %v1815_v1 = vpop.f32.mrf.mxu2 }
 0x1f5   :  { %v2403_v51 = vsel %vm2274_vm11, %v2151_v17, %v2339_v55  ;;  %v1816_v61 = vadd.f32 %v1815_v1, %v1647_v20  ;;  %v1984_v16 = vpop.f32.mrf.mxu3  ;;  %v1485_v55 = vadd.f32 %v5253_v33, %v4764_v27  ;;  %v3697_v20 = vld [vmem:[%s5819_s0 + $0x39c] sm:$0xf]  ;;  %v3230_v1 = vld [vmem:[%s5819_s0 + $0x3ac] sm:$0xf0]  ;;  %v3700_v27 = vld [vmem:[%s5819_s0 + $0x3b0] sm:$0xf0] }
 0x1f6   :  { %v2595_v56 = vsub.f32 %v2403_v51, %v3829_v40  ;;  %v1648_v11 = vpop.f32.mrf.mxu1  ;;  %v3236_v51 = vld [vmem:[%s5819_s0 + $0x3a0] sm:$0xf]  ;;  %v3233_v4 = vor.u32 %v3697_v20, %v3230_v1 }
 0x1f7   :  { %v1985_v3 = vadd.f32 %v1984_v16, %v1816_v61  ;;  %v1649_v44 = vadd.f32 %v1648_v11, %v1480_v37  ;;  %v3698_v61 = vld [vmem:[%s5819_s0 + $0x3a4] sm:$0xf]  ;;  %v3244_v11 = vld [vmem:[%s5819_s0 + $0x3a8] sm:$0xf]  ;;  %v3237_v26 = vor.u32 %v3700_v27, %v3236_v51 }
 0x1f8   :  { %v2155_v13 = vpop.f32.mrf.mxu0  ;;  %v3969_v46 = vpack.c.bf16 %v2595_v56, %v2594_v21  ;;  %v3238_v56 = vld [vmem:[%s5819_s0 + $0x3b4] sm:$0xf0] }
 0x1f9   :  { %v2154_v62 = vadd.f32 %v2153_v29, %v1985_v3  ;;  %v3701_v3 = vld [vmem:[%s5819_s0 + $0x3b8] sm:$0xf0]  ;;  %v3241_v28 = vor.u32 %v3698_v61, %v3238_v56  ;;  %v1493_v56 = vadd.f32 %v5253_v33, %v4514_v18 }
 0x1fa   :  { %4108 = vst [vmem:[%s5822_s5 + $0x60] sm:$0xff] %v3969_v46   ;;  %v3245_v23 = vor.u32 %v3701_v3, %v3244_v11  ;;  %v4080_v61 = vld [vmem:[%s5821_s4 + $0x78] sm:$0xff]  }
 0x1fb   :  { %v2340_v7 = vmul.f32 %v4874_v32, %v2154_v62  ;;  %vm2275_vm12 = vcmp.ge.f32.partialorder %v2154_v62, 0.0  ;;  %v3840_v3 = vunpack.c.l.bf16 %v4080_v61 }
 0x1fc   :  { %v1817_v35 = vpop.f32.mrf.mxu2 }
 0x1fd   :  { %v1818_v12 = vadd.f32 %v1817_v35, %v1649_v44  ;;  %v1986_v41 = vpop.f32.mrf.mxu3  ;;  %v2404_v34 = vsel %vm2275_vm12, %v2154_v62, %v2340_v7  ;;  %v4079_v44 = vld [vmem:[%s5821_s4 + $0x70] sm:$0xff]  }
 0x1fe   :  { %v1651_v10 = vpop.f32.mrf.mxu1  ;;  %v2596_v5 = vsub.f32 %v2404_v34, %v3832_v53  ;;  %v3702_v34 = vld [vmem:[%s5819_s0 + $0x3c4] sm:$0xf] }
 0x1ff   :  { %v1987_v42 = vadd.f32 %v1986_v41, %v1818_v12  ;;  %v1652_v14 = vadd.f32 %v1651_v10, %v1483_v9  ;;  %v3836_v12 = vunpack.c.l.bf16 %v4079_v44  ;;  %v3837_v41 = vunpack.c.h.bf16 %v4079_v44 }
 0x200   :  { %v2158_v54 = vpop.f32.mrf.mxu0 }
 0x201   :  { %v2156_v22 = vadd.f32 %v2155_v13, %v1987_v42  ;;  %1690 = vmatmul.bf16.gmra.mxu1 %v3213_v0  ;;  %1859 = vmatmul.bf16.gmra.mxu2 %v3217_v52 }
 0x202   :  { %2028 = vmatmul.bf16.gmra.mxu3 %v3221_v25 }
 0x203   :  { %3572 = vmatmul.msk.bf16.gmra.mxu0 %vm1306_vm0, %v3225_v48  ;;  %vm2276_vm13 = vcmp.ge.f32.partialorder %v2156_v22, 0.0  ;;  %v2341_v36 = vmul.f32 %v4874_v32, %v2156_v22 }
 0x204   :  { %v1820_v57 = vpop.f32.mrf.mxu2 }
 0x205   :  { %v2405_v31 = vsel %vm2276_vm13, %v2156_v22, %v2341_v36  ;;  %v1821_v60 = vadd.f32 %v1820_v57, %v1652_v14  ;;  %v1989_v29 = vpop.f32.mrf.mxu3  ;;  %v3250_v36 = vld [vmem:[%s5819_s0 + $0x3d4] sm:$0xf0]  ;;  %v3256_v14 = vld [vmem:[%s5819_s0 + $0x3c8] sm:$0xf]  ;;  %v3703_v57 = vld [vmem:[%s5819_s0 + $0x3cc] sm:$0xf] }
 0x206   :  { %v2597_v17 = vsub.f32 %v2405_v31, %v3833_v43  ;;  %v1653_v2 = vpop.f32.mrf.mxu1  ;;  %v1490_v43 = vadd.f32 %v5253_v33, %v4805_v59  ;;  %v3705_v59 = vld [vmem:[%s5819_s0 + $0x3d8] sm:$0xf0] }
 0x207   :  { %v1990_v39 = vadd.f32 %v1989_v29, %v1821_v60  ;;  %v1654_v21 = vadd.f32 %v1653_v2, %v1485_v55  ;;  %v3258_v29 = vld [vmem:[%s5819_s0 + $0x3dc] sm:$0xf0]  ;;  %v3257_v55 = vor.u32 %v3705_v59, %v3256_v14 }
 0x208   :  { %v2160_v40 = vpop.f32.mrf.mxu0  ;;  %v3974_v63 = vpack.c.bf16 %v2597_v17, %v2596_v5  ;;  %v3264_v5 = vld [vmem:[%s5819_s0 + $0x3d0] sm:$0xf]  ;;  %v3706_v17 = vld [vmem:[%s5819_s0 + $0x3e0] sm:$0xf0]  ;;  %v3261_v1 = vor.u32 %v3703_v57, %v3258_v29 }
 0x209   :  { %v2159_v16 = vadd.f32 %v2158_v54, %v1990_v39  ;;  %v3265_v51 = vor.u32 %v3706_v17, %v3264_v5  ;;  %v4081_v14 = vld [vmem:[%s5821_s4 + $0x80] sm:$0xff]  }
 0x20a   :  { %4109 = vst [vmem:[%s5822_s5 + $0x68] sm:$0xff] %v3974_v63   ;;  %v3253_v63 = vor.u32 %v3702_v34, %v3250_v36  ;;  %v3844_v29 = vunpack.c.l.bf16 %v4081_v14  ;;  %v3845_v5 = vunpack.c.h.bf16 %v4081_v14  ;;  %v1505_v14 = vadd.f32 %v5253_v33, %v4628_v6  ;;  %v3720_v6 = vld [vmem:[%s5819_s0 + $0x450] sm:$0xf0] }
 0x20b   :  { %v2342_v62 = vmul.f32 %v4874_v32, %v2159_v16  ;;  %vm2277_vm14 = vcmp.ge.f32.partialorder %v2159_v16, 0.0 }
 0x20c   :  { %v1822_v13 = vpop.f32.mrf.mxu2 }
 0x20d   :  { %v1823_v46 = vadd.f32 %v1822_v13, %v1654_v21  ;;  %v1991_v37 = vpop.f32.mrf.mxu3  ;;  %v2406_v0 = vsel %vm2277_vm14, %v2159_v16, %v2342_v62  ;;  %v3841_v13 = vunpack.c.h.bf16 %v4080_v61 }
 0x20e   :  { %v1656_v49 = vpop.f32.mrf.mxu1  ;;  %v2598_v42 = vsub.f32 %v2406_v0, %v3836_v12  ;;  %v3707_v12 = vld [vmem:[%s5819_s0 + $0x3ec] sm:$0xf]  ;;  %v3276_v0 = vld [vmem:[%s5819_s0 + $0x3f0] sm:$0xf] }
 0x20f   :  { %v1992_v47 = vadd.f32 %v1991_v37, %v1823_v46  ;;  %v1657_v10 = vadd.f32 %v1656_v49, %v1488_v19 }
 0x210   :  { %v2163_v8 = vpop.f32.mrf.mxu0 }
 0x211   :  { %v2161_v35 = vadd.f32 %v2160_v40, %v1992_v47  ;;  %1695 = vmatmul.bf16.gmra.mxu1 %v3233_v4  ;;  %1864 = vmatmul.bf16.gmra.mxu2 %v3237_v26 }
 0x212   :  { %2033 = vmatmul.bf16.gmra.mxu3 %v3241_v28 }
 0x213   :  { %3573 = vmatmul.msk.bf16.gmra.mxu0 %vm1306_vm0, %v3245_v23  ;;  %vm2278_vm15 = vcmp.ge.f32.partialorder %v2161_v35, 0.0  ;;  %v2343_v52 = vmul.f32 %v4874_v32, %v2161_v35 }
 0x214   :  { %v1825_v25 = vpop.f32.mrf.mxu2 }
 0x215   :  { %v2407_v48 = vsel %vm2278_vm15, %v2161_v35, %v2343_v52  ;;  %v1826_v7 = vadd.f32 %v1825_v25, %v1657_v10  ;;  %v1994_v45 = vpop.f32.mrf.mxu3  ;;  %v1495_v35 = vadd.f32 %v5253_v33, %v4546_v30  ;;  %v3710_v30 = vld [vmem:[%s5819_s0 + $0x400] sm:$0xf0]  ;;  %v3708_v52 = vld [vmem:[%s5819_s0 + $0x3f4] sm:$0xf] }
 0x216   :  { %v2599_v54 = vsub.f32 %v2407_v48, %v3837_v41  ;;  %v1658_v24 = vpop.f32.mrf.mxu1  ;;  %v3270_v41 = vld [vmem:[%s5819_s0 + $0x3fc] sm:$0xf0]  ;;  %v3278_v48 = vld [vmem:[%s5819_s0 + $0x404] sm:$0xf0] }
 0x217   :  { %v1995_v9 = vadd.f32 %v1994_v45, %v1826_v7  ;;  %v1659_v60 = vadd.f32 %v1658_v24, %v1490_v43  ;;  %v3284_v7 = vld [vmem:[%s5819_s0 + $0x3f8] sm:$0xf]  ;;  %v3711_v45 = vld [vmem:[%s5819_s0 + $0x408] sm:$0xf0]  ;;  %v3281_v43 = vor.u32 %v3708_v52, %v3278_v48 }
 0x218   :  { %v2165_v22 = vpop.f32.mrf.mxu0  ;;  %v3979_v53 = vpack.c.bf16 %v2599_v54, %v2598_v42  ;;  %v3285_v34 = vor.u32 %v3711_v45, %v3284_v7 }
 0x219   :  { %v2164_v31 = vadd.f32 %v2163_v8, %v1995_v9  ;;  %v3273_v9 = vor.u32 %v3707_v12, %v3270_v41  ;;  %v4082_v12 = vld [vmem:[%s5821_s4 + $0x88] sm:$0xff]  }
 0x21a   :  { %4110 = vst [vmem:[%s5822_s5 + $0x70] sm:$0xff] %v3979_v53  }
 0x21b   :  { %v2344_v27 = vmul.f32 %v4874_v32, %v2164_v31  ;;  %vm2279_vm1 = vcmp.ge.f32.partialorder %v2164_v31, 0.0 }
 0x21c   :  { %v1827_v2 = vpop.f32.mrf.mxu2 }
 0x21d   :  { %v1828_v39 = vadd.f32 %v1827_v2, %v1659_v60  ;;  %v1996_v40 = vpop.f32.mrf.mxu3  ;;  %v2408_v46 = vsel %vm2279_vm1, %v2164_v31, %v2344_v27  ;;  %v1498_v31 = vadd.f32 %v5253_v33, %v4555_v38 }
 0x21e   :  { %v1661_v20 = vpop.f32.mrf.mxu1  ;;  %v2600_v62 = vsub.f32 %v2408_v46, %v3840_v3  ;;  %v3296_v3 = vld [vmem:[%s5819_s0 + $0x418] sm:$0xf] }
 0x21f   :  { %v1997_v16 = vadd.f32 %v1996_v40, %v1828_v39  ;;  %v1662_v4 = vadd.f32 %v1661_v20, %v1493_v56  ;;  %v3712_v56 = vld [vmem:[%s5819_s0 + $0x414] sm:$0xf] }
 0x220   :  { %v2168_v21 = vpop.f32.mrf.mxu0 }
 0x221   :  { %v2166_v11 = vadd.f32 %v2165_v22, %v1997_v16  ;;  %1700 = vmatmul.bf16.gmra.mxu1 %v3253_v63  ;;  %1869 = vmatmul.bf16.gmra.mxu2 %v3257_v55  ;;  %v3277_v22 = vor.u32 %v3710_v30, %v3276_v0  ;;  %v1503_v30 = vadd.f32 %v5253_v33, %v4596_v58 }
 0x222   :  { %2038 = vmatmul.bf16.gmra.mxu3 %v3261_v1 }
 0x223   :  { %3574 = vmatmul.msk.bf16.gmra.mxu0 %vm1306_vm0, %v3265_v51  ;;  %vm2280_vm2 = vcmp.ge.f32.partialorder %v2166_v11, 0.0  ;;  %v2345_v37 = vmul.f32 %v4874_v32, %v2166_v11 }
 0x224   :  { %v1830_v26 = vpop.f32.mrf.mxu2 }
 0x225   :  { %v2409_v49 = vsel %vm2280_vm2, %v2166_v11, %v2345_v37  ;;  %v1831_v28 = vadd.f32 %v1830_v26, %v1662_v4  ;;  %v1999_v23 = vpop.f32.mrf.mxu3  ;;  %v3290_v11 = vld [vmem:[%s5819_s0 + $0x424] sm:$0xf0]  ;;  %v3298_v4 = vld [vmem:[%s5819_s0 + $0x42c] sm:$0xf0]  ;;  %v3304_v26 = vld [vmem:[%s5819_s0 + $0x420] sm:$0xf] }
 0x226   :  { %v2601_v44 = vsub.f32 %v2409_v49, %v3841_v13  ;;  %v1663_v18 = vpop.f32.mrf.mxu1  ;;  %v3713_v13 = vld [vmem:[%s5819_s0 + $0x41c] sm:$0xf]  ;;  %v3716_v49 = vld [vmem:[%s5819_s0 + $0x430] sm:$0xf0] }
 0x227   :  { %v2000_v47 = vadd.f32 %v1999_v23, %v1831_v28  ;;  %v1664_v25 = vadd.f32 %v1663_v18, %v1495_v35 }
 0x228   :  { %v2170_v8 = vpop.f32.mrf.mxu0  ;;  %v3984_v19 = vpack.c.bf16 %v2601_v44, %v2600_v62  ;;  %v3293_v44 = vor.u32 %v3712_v56, %v3290_v11  ;;  %v1508_v11 = vadd.f32 %v5253_v33, %v4637_v15 }
 0x229   :  { %v2169_v10 = vadd.f32 %v2168_v21, %v2000_v47  ;;  %v1500_v21 = vadd.f32 %v5253_v33, %v4587_v50  ;;  %v3715_v50 = vld [vmem:[%s5819_s0 + $0x428] sm:$0xf0] }
 0x22a   :  { %4111 = vst [vmem:[%s5822_s5 + $0x78] sm:$0xff] %v3984_v19   ;;  %v3297_v18 = vor.u32 %v3715_v50, %v3296_v3  ;;  %v3305_v19 = vor.u32 %v3716_v49, %v3304_v26 }
 0x22b   :  { %v2346_v36 = vmul.f32 %v4874_v32, %v2169_v10  ;;  %vm2281_vm3 = vcmp.ge.f32.partialorder %v2169_v10, 0.0 }
 0x22c   :  { %v1832_v42 = vpop.f32.mrf.mxu2 }
 0x22d   :  { %v1833_v54 = vadd.f32 %v1832_v42, %v1664_v25  ;;  %v2001_v24 = vpop.f32.mrf.mxu3  ;;  %v2410_v17 = vsel %vm2281_vm3, %v2169_v10, %v2346_v36  ;;  %v3848_v10 = vunpack.c.l.bf16 %v4082_v12  ;;  %v3849_v25 = vunpack.c.h.bf16 %v4082_v12  ;;  %v3722_v12 = vld [vmem:[%s5819_s0 + $0x464] sm:$0xf] }
 0x22e   :  { %v1666_v53 = vpop.f32.mrf.mxu1  ;;  %v2602_v1 = vsub.f32 %v2410_v17, %v3844_v29  ;;  %v3318_v17 = vld [vmem:[%s5819_s0 + $0x454] sm:$0xf0] }
 0x22f   :  { %v2002_v59 = vadd.f32 %v2001_v24, %v1833_v54  ;;  %v1667_v39 = vadd.f32 %v1666_v53, %v1498_v31  ;;  %v3316_v31 = vld [vmem:[%s5819_s0 + $0x440] sm:$0xf] }
 0x230   :  { %v2173_v57 = vpop.f32.mrf.mxu0 }
 0x231   :  { %v2171_v60 = vadd.f32 %v2170_v8, %v2002_v59  ;;  %1705 = vmatmul.bf16.gmra.mxu1 %v3273_v9  ;;  %1874 = vmatmul.bf16.gmra.mxu2 %v3277_v22  ;;  %v3301_v8 = vor.u32 %v3713_v13, %v3298_v4  ;;  %v3717_v59 = vld [vmem:[%s5819_s0 + $0x43c] sm:$0xf] }
 0x232   :  { %2043 = vmatmul.bf16.gmra.mxu3 %v3281_v43 }
 0x233   :  { %3575 = vmatmul.msk.bf16.gmra.mxu0 %vm1306_vm0, %v3285_v34  ;;  %vm2282_vm4 = vcmp.ge.f32.partialorder %v2171_v60, 0.0  ;;  %v2347_v2 = vmul.f32 %v4874_v32, %v2171_v60 }
 0x234   :  { %v1835_v40 = vpop.f32.mrf.mxu2 }
 0x235   :  { %v2411_v63 = vsel %vm2282_vm4, %v2171_v60, %v2347_v2  ;;  %v1836_v55 = vadd.f32 %v1835_v40, %v1667_v39  ;;  %v2004_v20 = vpop.f32.mrf.mxu3  ;;  %v3718_v60 = vld [vmem:[%s5819_s0 + $0x444] sm:$0xf]  ;;  %v3324_v2 = vld [vmem:[%s5819_s0 + $0x448] sm:$0xf]  ;;  %v3721_v39 = vld [vmem:[%s5819_s0 + $0x458] sm:$0xf0] }
 0x236   :  { %v2603_v51 = vsub.f32 %v2411_v63, %v3845_v5  ;;  %v1668_v38 = vpop.f32.mrf.mxu1 }
 0x237   :  { %v2005_v27 = vadd.f32 %v2004_v20, %v1836_v55  ;;  %v1669_v37 = vadd.f32 %v1668_v38, %v1500_v21  ;;  %v3321_v38 = vor.u32 %v3718_v60, %v3318_v17 }
 0x238   :  { %v2175_v61 = vpop.f32.mrf.mxu0  ;;  %v3989_v16 = vpack.c.bf16 %v2603_v51, %v2602_v1  ;;  %v3317_v1 = vor.u32 %v3720_v6, %v3316_v31 }
 0x239   :  { %v2174_v46 = vadd.f32 %v2173_v57, %v2005_v27  ;;  %v3310_v57 = vld [vmem:[%s5819_s0 + $0x44c] sm:$0xf0]  ;;  %v3325_v27 = vor.u32 %v3721_v39, %v3324_v2 }
 0x23a   :  { %4112 = vst [vmem:[%s5822_s5 + $0x80] sm:$0xff] %v3989_v16   ;;  %v3313_v20 = vor.u32 %v3717_v59, %v3310_v57  ;;  %v4083_v16 = vld [vmem:[%s5821_s4 + $0x90] sm:$0xff]   ;;  %v5849_v57 = vld [vmem:[#allocation12_spill] sm:$0xff] }
 0x23b   :  { %v2348_v35 = vmul.f32 %v4874_v32, %v2174_v46  ;;  %vm2283_vm5 = vcmp.ge.f32.partialorder %v2174_v46, 0.0  ;;  %v3852_v50 = vunpack.c.l.bf16 %v4083_v16  ;;  %v3853_v13 = vunpack.c.h.bf16 %v4083_v16  ;;  %v5850_v16 = vld [vmem:[#allocation14_spill] sm:$0xff] }
 0x23c   :  { %v1837_v28 = vpop.f32.mrf.mxu2  ;;  %v1513_v31 = vadd.f32 %v5253_v33, %v5849_v57  ;;  %v3732_v57 = vld [vmem:[%s5819_s0 + $0x4b4] sm:$0xf] }
 0x23d   :  { %v1838_v23 = vadd.f32 %v1837_v28, %v1669_v37  ;;  %v2006_v62 = vpop.f32.mrf.mxu3  ;;  %v2412_v48 = vsel %vm2283_vm5, %v2174_v46, %v2348_v35 }
 0x23e   :  { %v1671_v47 = vpop.f32.mrf.mxu1  ;;  %v2604_v22 = vsub.f32 %v2412_v48, %v3848_v10  ;;  %v3338_v48 = vld [vmem:[%s5819_s0 + $0x47c] sm:$0xf0] }
 0x23f   :  { %v2007_v41 = vadd.f32 %v2006_v62, %v1838_v23  ;;  %v1672_v45 = vadd.f32 %v1671_v47, %v1503_v30  ;;  %v3725_v30 = vld [vmem:[%s5819_s0 + $0x478] sm:$0xf0] }
 0x240   :  { %v2178_v0 = vpop.f32.mrf.mxu0 }
 0x241   :  { %v2176_v52 = vadd.f32 %v2175_v61, %v2007_v41  ;;  %1710 = vmatmul.bf16.gmra.mxu1 %v3293_v44  ;;  %1879 = vmatmul.bf16.gmra.mxu2 %v3297_v18  ;;  %v3330_v41 = vld [vmem:[%s5819_s0 + $0x474] sm:$0xf0] }
 0x242   :  { %2048 = vmatmul.bf16.gmra.mxu3 %v3301_v8 }
 0x243   :  { %3576 = vmatmul.msk.bf16.gmra.mxu0 %vm1306_vm0, %v3305_v19  ;;  %vm2284_vm6 = vcmp.ge.f32.partialorder %v2176_v52, 0.0  ;;  %v2349_v7 = vmul.f32 %v4874_v32, %v2176_v52  ;;  %v5848_v19 = vld [vmem:[#allocation10_spill] sm:$0xff] }
 0x244   :  { %v1840_v42 = vpop.f32.mrf.mxu2  ;;  %v1510_v35 = vadd.f32 %v5253_v33, %v5848_v19 }
 0x245   :  { %v2413_v54 = vsel %vm2284_vm6, %v2176_v52, %v2349_v7  ;;  %v1841_v24 = vadd.f32 %v1840_v42, %v1672_v45  ;;  %v2009_v9 = vpop.f32.mrf.mxu3  ;;  %v3723_v52 = vld [vmem:[%s5819_s0 + $0x46c] sm:$0xf]  ;;  %v3344_v7 = vld [vmem:[%s5819_s0 + $0x470] sm:$0xf]  ;;  %v3726_v45 = vld [vmem:[%s5819_s0 + $0x480] sm:$0xf0] }
 0x246   :  { %v2605_v53 = vsub.f32 %v2413_v54, %v3849_v25  ;;  %v1673_v58 = vpop.f32.mrf.mxu1 }
 0x247   :  { %v2010_v43 = vadd.f32 %v2009_v9, %v1841_v24  ;;  %v1674_v5 = vadd.f32 %v1673_v58, %v1505_v14  ;;  %v3333_v9 = vor.u32 %v3722_v12, %v3330_v41  ;;  %v3341_v58 = vor.u32 %v3723_v52, %v3338_v48 }
 0x248   :  { %v2180_v34 = vpop.f32.mrf.mxu0  ;;  %v3994_v36 = vpack.c.bf16 %v2605_v53, %v2604_v22 }
 0x249   :  { %v2179_v29 = vadd.f32 %v2178_v0, %v2010_v43  ;;  %v3336_v0 = vld [vmem:[%s5819_s0 + $0x468] sm:$0xf]  ;;  %v3345_v43 = vor.u32 %v3726_v45, %v3344_v7 }
 0x24a   :  { %4113 = vst [vmem:[%s5822_s5 + $0x88] sm:$0xff] %v3994_v36   ;;  %v3337_v22 = vor.u32 %v3725_v30, %v3336_v0  ;;  %v4084_v36 = vld [vmem:[%s5821_s4 + $0x98] sm:$0xff]   ;;  %v5851_v0 = vld [vmem:[#allocation16_spill] sm:$0xff] }
 0x24b   :  { %v2350_v61 = vmul.f32 %v4874_v32, %v2179_v29  ;;  %vm2285_vm7 = vcmp.ge.f32.partialorder %v2179_v29, 0.0  ;;  %v3856_v60 = vunpack.c.l.bf16 %v4084_v36  ;;  %v1518_v30 = vadd.f32 %v5253_v33, %v5851_v0  ;;  %v3737_v0 = vld [vmem:[%s5819_s0 + $0x4dc] sm:$0xf] }
 0x24c   :  { %v1842_v40 = vpop.f32.mrf.mxu2 }
 0x24d   :  { %v1843_v63 = vadd.f32 %v1842_v40, %v1674_v5  ;;  %v2011_v55 = vpop.f32.mrf.mxu3  ;;  %v2414_v46 = vsel %vm2285_vm7, %v2179_v29, %v2350_v61  ;;  %v3857_v29 = vunpack.c.h.bf16 %v4084_v36 }
 0x24e   :  { %v1676_v51 = vpop.f32.mrf.mxu1  ;;  %v2606_v62 = vsub.f32 %v2414_v46, %v3852_v50  ;;  %v3730_v50 = vld [vmem:[%s5819_s0 + $0x4a0] sm:$0xf0] }
 0x24f   :  { %v2012_v21 = vadd.f32 %v2011_v55, %v1843_v63  ;;  %v1677_v4 = vadd.f32 %v1676_v51, %v1508_v11  ;;  %v3350_v11 = vld [vmem:[%s5819_s0 + $0x49c] sm:$0xf0] }
 0x250   :  { %v2183_v56 = vpop.f32.mrf.mxu0 }
 0x251   :  { %v2181_v3 = vadd.f32 %v2180_v34, %v2012_v21  ;;  %1715 = vmatmul.bf16.gmra.mxu1 %v3313_v20  ;;  %1884 = vmatmul.bf16.gmra.mxu2 %v3317_v1  ;;  %v1515_v21 = vadd.f32 %v5253_v33, %v5850_v16  ;;  %v4086_v16 = vld [vmem:[%s5821_s4 + $0xa8] sm:$0xff]  }
 0x252   :  { %2053 = vmatmul.bf16.gmra.mxu3 %v3321_v38 }
 0x253   :  { %3577 = vmatmul.msk.bf16.gmra.mxu0 %vm1306_vm0, %v3325_v27  ;;  %vm2286_vm8 = vcmp.ge.f32.partialorder %v2181_v3, 0.0  ;;  %v2351_v37 = vmul.f32 %v4874_v32, %v2181_v3 }
 0x254   :  { %v1845_v26 = vpop.f32.mrf.mxu2 }
 0x255   :  { %v2415_v49 = vsel %vm2286_vm8, %v2181_v3, %v2351_v37  ;;  %v1846_v28 = vadd.f32 %v1845_v26, %v1677_v4  ;;  %v2014_v23 = vpop.f32.mrf.mxu3  ;;  %v3356_v3 = vld [vmem:[%s5819_s0 + $0x490] sm:$0xf]  ;;  %v3358_v4 = vld [vmem:[%s5819_s0 + $0x4a4] sm:$0xf0]  ;;  %v3364_v26 = vld [vmem:[%s5819_s0 + $0x498] sm:$0xf] }
 0x256   :  { %v2607_v44 = vsub.f32 %v2415_v49, %v3853_v13  ;;  %v1678_v15 = vpop.f32.mrf.mxu1  ;;  %v3728_v13 = vld [vmem:[%s5819_s0 + $0x494] sm:$0xf]  ;;  %v3731_v49 = vld [vmem:[%s5819_s0 + $0x4a8] sm:$0xf0] }
 0x257   :  { %v2015_v18 = vadd.f32 %v2014_v23, %v1846_v28  ;;  %v1679_v25 = vadd.f32 %v1678_v15, %v1510_v35  ;;  %v3357_v15 = vor.u32 %v3730_v50, %v3356_v3  ;;  %v4085_v35 = vld [vmem:[%s5821_s4 + $0xa0] sm:$0xff]   ;;  %v5853_v3 = vld [vmem:[#allocation20_spill] sm:$0xff] }
 0x258   :  { %v2185_v47 = vpop.f32.mrf.mxu0  ;;  %v3999_v8 = vpack.c.bf16 %v2607_v44, %v2606_v62 }
 0x259   :  { %v2184_v10 = vadd.f32 %v2183_v56, %v2015_v18  ;;  %v3727_v56 = vld [vmem:[%s5819_s0 + $0x48c] sm:$0xf] }
 0x25a   :  { %4114 = vst [vmem:[%s5822_s5 + $0x90] sm:$0xff] %v3999_v8   ;;  %v3353_v44 = vor.u32 %v3727_v56, %v3350_v11  ;;  %v3365_v8 = vor.u32 %v3731_v49, %v3364_v26  ;;  %v5665_v11 = vld [vmem:[%s5818_s2] ss:$0 sm:$0xff] }
 0x25b   :  { %v2352_v34 = vmul.f32 %v4874_v32, %v2184_v10  ;;  %vm2287_vm9 = vcmp.ge.f32.partialorder %v2184_v10, 0.0  ;;  %v1523_v50 = vadd.f32 %v5665_v11, %v5853_v3 }
 0x25c   :  { %v1847_v42 = vpop.f32.mrf.mxu2 }
 0x25d   :  { %v1848_v54 = vadd.f32 %v1847_v42, %v1679_v25  ;;  %v2016_v24 = vpop.f32.mrf.mxu3  ;;  %v2416_v5 = vsel %vm2287_vm9, %v2184_v10, %v2352_v34  ;;  %v3860_v10 = vunpack.c.l.bf16 %v4085_v35  ;;  %v3861_v25 = vunpack.c.h.bf16 %v4085_v35 }
 0x25e   :  { %v1681_v53 = vpop.f32.mrf.mxu1  ;;  %v2608_v20 = vsub.f32 %v2416_v5, %v3856_v60  ;;  %v3733_v60 = vld [vmem:[%s5819_s0 + $0x4bc] sm:$0xf] }
 0x25f   :  { %v2017_v14 = vadd.f32 %v2016_v24, %v1848_v54  ;;  %v1682_v2 = vadd.f32 %v1681_v53, %v1513_v31  ;;  %v3370_v31 = vld [vmem:[%s5819_s0 + $0x4c4] sm:$0xf0] }
 0x260   :  { %v2188_v59 = vpop.f32.mrf.mxu0 }
 0x261   :  { %v2186_v6 = vadd.f32 %v2185_v47, %v2017_v14  ;;  %1720 = vmatmul.bf16.gmra.mxu1 %v3333_v9  ;;  %1889 = vmatmul.bf16.gmra.mxu2 %v3337_v22  ;;  %v3361_v47 = vor.u32 %v3728_v13, %v3358_v4  ;;  %v5852_v14 = vld [vmem:[#allocation18_spill] sm:$0xff] }
 0x262   :  { %2058 = vmatmul.bf16.gmra.mxu3 %v3341_v58 }
 0x263   :  { %3578 = vmatmul.msk.bf16.gmra.mxu0 %vm1306_vm0, %v3345_v43  ;;  %vm2288_vm10 = vcmp.ge.f32.partialorder %v2186_v6, 0.0  ;;  %v2353_v17 = vmul.f32 %v4874_v32, %v2186_v6 }
 0x264   :  { %v1850_v39 = vpop.f32.mrf.mxu2 }
 0x265   :  { %v2417_v40 = vsel %vm2288_vm10, %v2186_v6, %v2353_v17  ;;  %v1851_v63 = vadd.f32 %v1850_v39, %v1682_v2  ;;  %v2019_v55 = vpop.f32.mrf.mxu3  ;;  %v3376_v6 = vld [vmem:[%s5819_s0 + $0x4b8] sm:$0xf]  ;;  %v3378_v17 = vld [vmem:[%s5819_s0 + $0x4cc] sm:$0xf0]  ;;  %v3384_v2 = vld [vmem:[%s5819_s0 + $0x4c0] sm:$0xf] }
 0x266   :  { %v2609_v1 = vsub.f32 %v2417_v40, %v3857_v29  ;;  %v1683_v51 = vpop.f32.mrf.mxu1  ;;  %v3736_v39 = vld [vmem:[%s5819_s0 + $0x4d0] sm:$0xf0] }
 0x267   :  { %v2020_v38 = vadd.f32 %v2019_v55, %v1851_v63  ;;  %v1684_v37 = vadd.f32 %v1683_v51, %v1515_v21 }
 0x268   :  { %v2190_v27 = vpop.f32.mrf.mxu0  ;;  %v4004_v61 = vpack.c.bf16 %v2609_v1, %v2608_v20  ;;  %v3373_v20 = vor.u32 %v3732_v57, %v3370_v31 }
 0x269   :  { %v2189_v46 = vadd.f32 %v2188_v59, %v2020_v38  ;;  %v1520_v59 = vadd.f32 %v5253_v33, %v5852_v14  ;;  %v3735_v33 = vld [vmem:[%s5819_s0 + $0x4c8] sm:$0xf0]  ;;  %v3381_v38 = vor.u32 %v3733_v60, %v3378_v17 }
 0x26a   :  { %4115 = vst [vmem:[%s5822_s5 + $0x98] sm:$0xff] %v4004_v61   ;;  %v3377_v1 = vor.u32 %v3735_v33, %v3376_v6  ;;  %v5855_v6 = vld [vmem:[#allocation24_spill] sm:$0xff] }
 0x26b   :  { %v2354_v19 = vmul.f32 %v4874_v32, %v2189_v46  ;;  %vm2289_vm11 = vcmp.ge.f32.partialorder %v2189_v46, 0.0  ;;  %v1528_v33 = vadd.f32 %v5665_v11, %v5855_v6 }
 0x26c   :  { %v1852_v28 = vpop.f32.mrf.mxu2 }
 0x26d   :  { %v1853_v23 = vadd.f32 %v1852_v28, %v1684_v37  ;;  %v2021_v62 = vpop.f32.mrf.mxu3  ;;  %v2418_v48 = vsel %vm2289_vm11, %v2189_v46, %v2354_v19  ;;  %v3864_v46 = vunpack.c.l.bf16 %v4086_v16  ;;  %v3865_v37 = vunpack.c.h.bf16 %v4086_v16 }
 0x26e   :  { %v1686_v18 = vpop.f32.mrf.mxu1  ;;  %v2610_v22 = vsub.f32 %v2418_v48, %v3860_v10  ;;  %v3740_v10 = vld [vmem:[%s5819_s0 + $0x4f0] sm:$0xf0] }
 0x26f   :  { %v2022_v12 = vadd.f32 %v2021_v62, %v1853_v23  ;;  %v1687_v45 = vadd.f32 %v1686_v18, %v1518_v30  ;;  %v3390_v30 = vld [vmem:[%s5819_s0 + $0x4ec] sm:$0xf0] }
 0x270   :  { %v2193_v41 = vpop.f32.mrf.mxu0 }
 0x271   :  { %v2191_v52 = vadd.f32 %v2190_v27, %v2022_v12  ;;  %1725 = vmatmul.bf16.gmra.mxu1 %v3353_v44  ;;  %1894 = vmatmul.bf16.gmra.mxu2 %v3357_v15  ;;  %v3385_v27 = vor.u32 %v3736_v39, %v3384_v2  ;;  %v5854_v12 = vld [vmem:[#allocation22_spill] sm:$0xff] }
 0x272   :  { %2063 = vmatmul.bf16.gmra.mxu3 %v3361_v47 }
 0x273   :  { %3579 = vmatmul.msk.bf16.gmra.mxu0 %vm1306_vm0, %v3365_v8  ;;  %vm2290_vm12 = vcmp.ge.f32.partialorder %v2191_v52, 0.0  ;;  %v2355_v7 = vmul.f32 %v4874_v32, %v2191_v52 }
 0x274   :  { %v1855_v42 = vpop.f32.mrf.mxu2 }
 0x275   :  { %v2419_v54 = vsel %vm2290_vm12, %v2191_v52, %v2355_v7  ;;  %v1856_v24 = vadd.f32 %v1855_v42, %v1687_v45  ;;  %v2024_v9 = vpop.f32.mrf.mxu3  ;;  %v3396_v52 = vld [vmem:[%s5819_s0 + $0x4e0] sm:$0xf]  ;;  %v3398_v45 = vld [vmem:[%s5819_s0 + $0x4f4] sm:$0xf0]  ;;  %v3404_v42 = vld [vmem:[%s5819_s0 + $0x4e8] sm:$0xf] }
 0x276   :  { %v2611_v53 = vsub.f32 %v2419_v54, %v3861_v25  ;;  %v1688_v58 = vpop.f32.mrf.mxu1  ;;  %v3738_v25 = vld [vmem:[%s5819_s0 + $0x4e4] sm:$0xf]  ;;  %v3741_v54 = vld [vmem:[%s5819_s0 + $0x4f8] sm:$0xf0] }
 0x277   :  { %v2025_v43 = vadd.f32 %v2024_v9, %v1856_v24  ;;  %v1689_v5 = vadd.f32 %v1688_v58, %v1520_v59  ;;  %v3397_v58 = vor.u32 %v3740_v10, %v3396_v52  ;;  %v4087_v59 = vld [vmem:[%s5821_s4 + $0xb0] sm:$0xff]  }
 0x278   :  { %v2195_v34 = vpop.f32.mrf.mxu0  ;;  %v4009_v36 = vpack.c.bf16 %v2611_v53, %v2610_v22  ;;  %v3393_v53 = vor.u32 %v3737_v0, %v3390_v30 }
 0x279   :  { %v2194_v29 = vadd.f32 %v2193_v41, %v2025_v43  ;;  %v1525_v41 = vadd.f32 %v5665_v11, %v5854_v12 }
 0x27a   :  { %4116 = vst [vmem:[%s5822_s5 + $0xa0] sm:$0xff] %v4009_v36   ;;  %v3405_v36 = vor.u32 %v3741_v54, %v3404_v42  ;;  %v5858_v42 = vld [vmem:[#allocation4_spill] sm:$0xff] }
 0x27b   :  { %v2356_v61 = vmul.f32 %v4874_v32, %v2194_v29  ;;  %vm2291_vm13 = vcmp.ge.f32.partialorder %v2194_v29, 0.0  ;;  %v1535_v54 = vadd.f32 %v5665_v11, %v5858_v42 }
 0x27c   :  { %v1857_v40 = vpop.f32.mrf.mxu2 }
 0x27d   :  { %v1858_v63 = vadd.f32 %v1857_v40, %v1689_v5  ;;  %v2026_v55 = vpop.f32.mrf.mxu3  ;;  %v2420_v4 = vsel %vm2291_vm13, %v2194_v29, %v2356_v61  ;;  %v3868_v29 = vunpack.c.l.bf16 %v4087_v59  ;;  %v3869_v5 = vunpack.c.h.bf16 %v4087_v59 }
 0x27e   :  { %v1691_v51 = vpop.f32.mrf.mxu1  ;;  %v2612_v15 = vsub.f32 %v2420_v4, %v3864_v46 }
 0x27f   :  { %v2027_v21 = vadd.f32 %v2026_v55, %v1858_v63  ;;  %v1692_v49 = vadd.f32 %v1691_v51, %v1523_v50 }
 0x280   :  { %v2198_v56 = vpop.f32.mrf.mxu0 }
 0x281   :  { %v2196_v13 = vadd.f32 %v2195_v34, %v2027_v21  ;;  %1730 = vmatmul.bf16.gmra.mxu1 %v3373_v20  ;;  %1899 = vmatmul.bf16.gmra.mxu2 %v3377_v1  ;;  %v3401_v34 = vor.u32 %v3738_v25, %v3398_v45  ;;  %v5856_v21 = vld [vmem:[#allocation26_spill] sm:$0xff] }
 0x282   :  { %2068 = vmatmul.bf16.gmra.mxu3 %v3381_v38 }
 0x283   :  { %3580 = vmatmul.msk.bf16.gmra.mxu0 %vm1306_vm0, %v3385_v27  ;;  %vm2292_vm14 = vcmp.ge.f32.partialorder %v2196_v13, 0.0  ;;  %v2357_v26 = vmul.f32 %v4874_v32, %v2196_v13 }
 0x284   :  { %v1860_v28 = vpop.f32.mrf.mxu2 }
 0x285   :  { %v2421_v23 = vsel %vm2292_vm14, %v2196_v13, %v2357_v26  ;;  %v1861_v62 = vadd.f32 %v1860_v28, %v1692_v49  ;;  %v2029_v44 = vpop.f32.mrf.mxu3  ;;  %v4088_v49 = vld [vmem:[%s5821_s4 + $0xb8] sm:$0xff]  }
 0x286   :  { %v2613_v18 = vsub.f32 %v2421_v23, %v3865_v37  ;;  %v1693_v47 = vpop.f32.mrf.mxu1 }
 0x287   :  { %v2030_v8 = vadd.f32 %v2029_v44, %v1861_v62  ;;  %v1694_v7 = vadd.f32 %v1693_v47, %v1525_v41  ;;  %v5857_v62 = vld [vmem:[#allocation3_spill] sm:$0xff]  ;;  %v3873_v47 = vunpack.c.h.bf16 %v4088_v49 }
 0x288   :  { %v2200_v19 = vpop.f32.mrf.mxu0  ;;  %v4014_v35 = vpack.c.bf16 %v2613_v18, %v2612_v15  ;;  %v1533_v44 = vadd.f32 %v5665_v11, %v5857_v62  ;;  %v3872_v18 = vunpack.c.l.bf16 %v4088_v49 }
 0x289   :  { %v2199_v48 = vadd.f32 %v2198_v56, %v2030_v8  ;;  %v1530_v56 = vadd.f32 %v5665_v11, %v5856_v21 }
 0x28a   :  { %4117 = vst [vmem:[%s5822_s5 + $0xa8] sm:$0xff] %v4014_v35  }
 0x28b   :  { %v2358_v14 = vmul.f32 %v4874_v32, %v2199_v48  ;;  %vm2293_vm15 = vcmp.ge.f32.partialorder %v2199_v48, 0.0 }
 0x28c   :  { %v1862_v24 = vpop.f32.mrf.mxu2 }
 0x28d   :  { %v1863_v9 = vadd.f32 %v1862_v24, %v1694_v7  ;;  %v2031_v22 = vpop.f32.mrf.mxu3  ;;  %v2422_v17 = vsel %vm2293_vm15, %v2199_v48, %v2358_v14 }
 0x28e   :  { %v1696_v43 = vpop.f32.mrf.mxu1  ;;  %v2614_v1 = vsub.f32 %v2422_v17, %v3868_v29 }
 0x28f   :  { %v2032_v57 = vadd.f32 %v2031_v22, %v1863_v9  ;;  %v1697_v39 = vadd.f32 %v1696_v43, %v1528_v33 }
 0x290   :  { %v2203_v31 = vpop.f32.mrf.mxu0 }
 0x291   :  { %v2201_v60 = vadd.f32 %v2200_v19, %v2032_v57  ;;  %1735 = vmatmul.bf16.gmra.mxu1 %v3393_v53  ;;  %1904 = vmatmul.bf16.gmra.mxu2 %v3397_v58  ;;  %v5859_v57 = vld [vmem:[#allocation5_spill] sm:$0xff] }
 0x292   :  { %2073 = vmatmul.bf16.gmra.mxu3 %v3401_v34 }
 0x293   :  { %3581 = vmatmul.msk.bf16.gmra.mxu0 %vm1306_vm0, %v3405_v36  ;;  %vm2294_vm1 = vcmp.ge.f32.partialorder %v2201_v60, 0.0  ;;  %v2359_v2 = vmul.f32 %v4874_v32, %v2201_v60  ;;  %v4089_v36 = vld [vmem:[%s5821_s4 + $0xc0] sm:$0xff]  }
 0x294   :  { %v1865_v40 = vpop.f32.mrf.mxu2  ;;  %v3876_v33 = vunpack.c.l.bf16 %v4089_v36 }
 0x295   :  { %v2423_v63 = vsel %vm2294_vm1, %v2201_v60, %v2359_v2  ;;  %v1866_v55 = vadd.f32 %v1865_v40, %v1697_v39  ;;  %v2034_v20 = vpop.f32.mrf.mxu3  ;;  %v3877_v60 = vunpack.c.h.bf16 %v4089_v36 }
 0x296   :  { %v2615_v51 = vsub.f32 %v2423_v63, %v3869_v5  ;;  %v1698_v38 = vpop.f32.mrf.mxu1 }
 0x297   :  { %v2035_v27 = vadd.f32 %v2034_v20, %v1866_v55  ;;  %v1699_v50 = vadd.f32 %v1698_v38, %v1530_v56 }
 0x298   :  { %v2205_v61 = vpop.f32.mrf.mxu0  ;;  %v4019_v16 = vpack.c.bf16 %v2615_v51, %v2614_v1 }
 0x299   :  { %v2204_v3 = vadd.f32 %v2203_v31, %v2035_v27  ;;  %v1538_v31 = vadd.f32 %v5665_v11, %v5859_v57 }
 0x29a   :  { %4118 = vst [vmem:[%s5822_s5 + $0xb0] sm:$0xff] %v4019_v16  }
 0x29b   :  { %v2360_v26 = vmul.f32 %v4874_v32, %v2204_v3  ;;  %vm2295_vm0 = vcmp.ge.f32.partialorder %v2204_v3, 0.0 }
 0x29c   :  { %v1867_v13 = vpop.f32.mrf.mxu2 }
 0x29d   :  { %v1868_v46 = vadd.f32 %v1867_v13, %v1699_v50  ;;  %v2036_v37 = vpop.f32.mrf.mxu3  ;;  %v2424_v8 = vsel %vm2295_vm0, %v2204_v3, %v2360_v26 }
 0x29e   :  { %v1701_v4 = vpop.f32.mrf.mxu1  ;;  %v2616_v52 = vsub.f32 %v2424_v8, %v3872_v18 }
 0x29f   :  { %v2037_v28 = vadd.f32 %v2036_v37, %v1868_v46  ;;  %v1702_v35 = vadd.f32 %v1701_v4, %v1533_v44  ;;  %v4090_v4 = vld [vmem:[%s5821_s4 + $0xc8] sm:$0xff]  }
 0x2a0   :  { %v2208_v23 = vpop.f32.mrf.mxu0  ;;  %v3880_v44 = vunpack.c.l.bf16 %v4090_v4 }
 0x2a1   :  { %v2206_v15 = vadd.f32 %v2205_v61, %v2037_v28  ;;  %v5860_v61 = vld [vmem:[#allocation6_spill] sm:$0xff]  ;;  %v5861_v28 = vld [vmem:[#allocation7_spill] sm:$0xff] }
 0x2a2   :  { %v1540_v16 = vadd.f32 %v5665_v11, %v5860_v61 }
 0x2a3   :  { %vm2296_vm2 = vcmp.ge.f32.partialorder %v2206_v15, 0.0  ;;  %v2361_v19 = vmul.f32 %v4874_v32, %v2206_v15 }
 0x2a4   :  { %v1870_v12 = vpop.f32.mrf.mxu2 }
 0x2a5   :  { %v2425_v41 = vsel %vm2296_vm2, %v2206_v15, %v2361_v19  ;;  %v1871_v0 = vadd.f32 %v1870_v12, %v1702_v35  ;;  %v2039_v30 = vpop.f32.mrf.mxu3  ;;  %v3881_v15 = vunpack.c.h.bf16 %v4090_v4 }
 0x2a6   :  { %v2617_v10 = vsub.f32 %v2425_v41, %v3873_v47  ;;  %v1703_v25 = vpop.f32.mrf.mxu1 }
 0x2a7   :  { %v2040_v48 = vadd.f32 %v2039_v30, %v1871_v0  ;;  %v1704_v9 = vadd.f32 %v1703_v25, %v1535_v54 }
 0x2a8   :  { %v2210_v7 = vpop.f32.mrf.mxu0  ;;  %v4024_v45 = vpack.c.bf16 %v2617_v10, %v2616_v52 }
 0x2a9   :  { %v2209_v24 = vadd.f32 %v2208_v23, %v2040_v48  ;;  %v1543_v23 = vadd.f32 %v5665_v11, %v5861_v28 }
 0x2aa   :  { %4119 = vst [vmem:[%s5822_s5 + $0xb8] sm:$0xff] %v4024_v45  }
 0x2ab   :  { %v2362_v34 = vmul.f32 %v4874_v32, %v2209_v24  ;;  %vm2297_vm3 = vcmp.ge.f32.partialorder %v2209_v24, 0.0 }
 0x2ac   :  { %v1872_v22 = vpop.f32.mrf.mxu2 }
 0x2ad   :  { %v1873_v53 = vadd.f32 %v1872_v22, %v1704_v9  ;;  %v2041_v58 = vpop.f32.mrf.mxu3  ;;  %v2426_v29 = vsel %vm2297_vm3, %v2209_v24, %v2362_v34 }
 0x2ae   :  { %v1706_v43 = vpop.f32.mrf.mxu1  ;;  %v2618_v55 = vsub.f32 %v2426_v29, %v3876_v33 }
 0x2af   :  { %v2042_v14 = vadd.f32 %v2041_v58, %v1873_v53  ;;  %v1707_v17 = vadd.f32 %v1706_v43, %v1538_v31  ;;  %v4091_v43 = vld [vmem:[%s5821_s4 + $0xd0] sm:$0xff]  }
 0x2b0   :  { %v2213_v59 = vpop.f32.mrf.mxu0  ;;  %v3884_v31 = vunpack.c.l.bf16 %v4091_v43 }
 0x2b1   :  { %v2211_v6 = vadd.f32 %v2210_v7, %v2042_v14  ;;  %v5862_v7 = vld [vmem:[#allocation8_spill] sm:$0xff]  ;;  %v5863_v14 = vld [vmem:[#allocation9_spill] sm:$0xff] }
 0x2b2   :  { %v1545_v45 = vadd.f32 %v5665_v11, %v5862_v7 }
 0x2b3   :  { %vm2298_vm4 = vcmp.ge.f32.partialorder %v2211_v6, 0.0  ;;  %v2363_v5 = vmul.f32 %v4874_v32, %v2211_v6 }
 0x2b4   :  { %v1875_v2 = vpop.f32.mrf.mxu2 }
 0x2b5   :  { %v2427_v39 = vsel %vm2298_vm4, %v2211_v6, %v2363_v5  ;;  %v1876_v40 = vadd.f32 %v1875_v2, %v1707_v17  ;;  %v2044_v63 = vpop.f32.mrf.mxu3  ;;  %v3885_v6 = vunpack.c.h.bf16 %v4091_v43 }
 0x2b6   :  { %v2619_v20 = vsub.f32 %v2427_v39, %v3877_v60  ;;  %v1708_v1 = vpop.f32.mrf.mxu1 }
 0x2b7   :  { %v2045_v51 = vadd.f32 %v2044_v63, %v1876_v40  ;;  %v1709_v56 = vadd.f32 %v1708_v1, %v1540_v16 }
 0x2b8   :  { %v2215_v38 = vpop.f32.mrf.mxu0  ;;  %v4029_v27 = vpack.c.bf16 %v2619_v20, %v2618_v55 }
 0x2b9   :  { %v2214_v21 = vadd.f32 %v2213_v59, %v2045_v51  ;;  %v1548_v59 = vadd.f32 %v5665_v11, %v5863_v14 }
 0x2ba   :  { %4120 = vst [vmem:[%s5822_s5 + $0xc0] sm:$0xff] %v4029_v27  }
 0x2bb   :  { %v2364_v37 = vmul.f32 %v4874_v32, %v2214_v21  ;;  %vm2299_vm5 = vcmp.ge.f32.partialorder %v2214_v21, 0.0 }
 0x2bc   :  { %v1877_v3 = vpop.f32.mrf.mxu2 }
 0x2bd   :  { %v1878_v50 = vadd.f32 %v1877_v3, %v1709_v56  ;;  %v2046_v13 = vpop.f32.mrf.mxu3  ;;  %v2428_v18 = vsel %vm2299_vm5, %v2214_v21, %v2364_v37 }
 0x2be   :  { %v1711_v46 = vpop.f32.mrf.mxu1  ;;  %v2620_v0 = vsub.f32 %v2428_v18, %v3880_v44 }
 0x2bf   :  { %v2047_v26 = vadd.f32 %v2046_v13, %v1878_v50  ;;  %v1712_v8 = vadd.f32 %v1711_v46, %v1543_v23  ;;  %v4092_v46 = vld [vmem:[%s5821_s4 + $0xd8] sm:$0xff]  }
 0x2c0   :  { %v2218_v49 = vpop.f32.mrf.mxu0  ;;  %v3888_v23 = vunpack.c.l.bf16 %v4092_v46 }
 0x2c1   :  { %v2216_v62 = vadd.f32 %v2215_v38, %v2047_v26  ;;  %v5864_v38 = vld [vmem:[#allocation11_spill] sm:$0xff]  ;;  %v5865_v26 = vld [vmem:[#allocation13_spill] sm:$0xff] }
 0x2c2   :  { %v1550_v27 = vadd.f32 %v5665_v11, %v5864_v38 }
 0x2c3   :  { %vm2300_vm6 = vcmp.ge.f32.partialorder %v2216_v62, 0.0  ;;  %v2365_v47 = vmul.f32 %v4874_v32, %v2216_v62 }
 0x2c4   :  { %v1880_v19 = vpop.f32.mrf.mxu2 }
 0x2c5   :  { %v2429_v35 = vsel %vm2300_vm6, %v2216_v62, %v2365_v47  ;;  %v1881_v12 = vadd.f32 %v1880_v19, %v1712_v8  ;;  %v2049_v41 = vpop.f32.mrf.mxu3  ;;  %v3889_v62 = vunpack.c.h.bf16 %v4092_v46  ;;  %v5869_v46 = vld [vmem:[#allocation21_spill] sm:$0xff] }
 0x2c6   :  { %v2621_v30 = vsub.f32 %v2429_v35, %v3881_v15  ;;  %v1713_v52 = vpop.f32.mrf.mxu1 }
 0x2c7   :  { %v2050_v10 = vadd.f32 %v2049_v41, %v1881_v12  ;;  %v1714_v54 = vadd.f32 %v1713_v52, %v1545_v45 }
 0x2c8   :  { %v2220_v25 = vpop.f32.mrf.mxu0  ;;  %v4034_v48 = vpack.c.bf16 %v2621_v30, %v2620_v0 }
 0x2c9   :  { %v2219_v42 = vadd.f32 %v2218_v49, %v2050_v10  ;;  %v1553_v49 = vadd.f32 %v5665_v11, %v5865_v26 }
 0x2ca   :  { %4121 = vst [vmem:[%s5822_s5 + $0xc8] sm:$0xff] %v4034_v48  }
 0x2cb   :  { %v2366_v58 = vmul.f32 %v4874_v32, %v2219_v42  ;;  %vm2301_vm7 = vcmp.ge.f32.partialorder %v2219_v42, 0.0 }
 0x2cc   :  { %v1882_v24 = vpop.f32.mrf.mxu2 }
 0x2cd   :  { %v1883_v9 = vadd.f32 %v1882_v24, %v1714_v54  ;;  %v2051_v22 = vpop.f32.mrf.mxu3  ;;  %v2430_v33 = vsel %vm2301_vm7, %v2219_v42, %v2366_v58 }
 0x2ce   :  { %v1716_v53 = vpop.f32.mrf.mxu1  ;;  %v2622_v40 = vsub.f32 %v2430_v33, %v3884_v31 }
 0x2cf   :  { %v2052_v34 = vadd.f32 %v2051_v22, %v1883_v9  ;;  %v1717_v29 = vadd.f32 %v1716_v53, %v1548_v59  ;;  %v4093_v53 = vld [vmem:[%s5821_s4 + $0xe0] sm:$0xff]  }
 0x2d0   :  { %v2223_v36 = vpop.f32.mrf.mxu0  ;;  %v3892_v59 = vunpack.c.l.bf16 %v4093_v53 }
 0x2d1   :  { %v2221_v57 = vadd.f32 %v2220_v25, %v2052_v34  ;;  %v5866_v25 = vld [vmem:[#allocation15_spill] sm:$0xff]  ;;  %v5867_v34 = vld [vmem:[#allocation17_spill] sm:$0xff] }
 0x2d2   :  { %v1555_v48 = vadd.f32 %v5665_v11, %v5866_v25 }
 0x2d3   :  { %vm2302_vm8 = vcmp.ge.f32.partialorder %v2221_v57, 0.0  ;;  %v2367_v60 = vmul.f32 %v4874_v32, %v2221_v57 }
 0x2d4   :  { %v1885_v5 = vpop.f32.mrf.mxu2 }
 0x2d5   :  { %v2431_v17 = vsel %vm2302_vm8, %v2221_v57, %v2367_v60  ;;  %v1886_v2 = vadd.f32 %v1885_v5, %v1717_v29  ;;  %v2054_v39 = vpop.f32.mrf.mxu3  ;;  %v3893_v57 = vunpack.c.h.bf16 %v4093_v53  ;;  %v5871_v53 = vld [vmem:[#allocation25_spill] sm:$0xff] }
 0x2d6   :  { %v2623_v63 = vsub.f32 %v2431_v17, %v3885_v6  ;;  %v1718_v55 = vpop.f32.mrf.mxu1 }
 0x2d7   :  { %v2055_v20 = vadd.f32 %v2054_v39, %v1886_v2  ;;  %v1719_v16 = vadd.f32 %v1718_v55, %v1550_v27 }
 0x2d8   :  { %v2225_v1 = vpop.f32.mrf.mxu0  ;;  %v4039_v51 = vpack.c.bf16 %v2623_v63, %v2622_v40 }
 0x2d9   :  { %v2224_v61 = vadd.f32 %v2223_v36, %v2055_v20  ;;  %v1558_v36 = vadd.f32 %v5665_v11, %v5867_v34 }
 0x2da   :  { %4122 = vst [vmem:[%s5822_s5 + $0xd0] sm:$0xff] %v4039_v51  }
 0x2db   :  { %v2368_v13 = vmul.f32 %v4874_v32, %v2224_v61  ;;  %vm2303_vm9 = vcmp.ge.f32.partialorder %v2224_v61, 0.0 }
 0x2dc   :  { %v1887_v21 = vpop.f32.mrf.mxu2 }
 0x2dd   :  { %v1888_v56 = vadd.f32 %v1887_v21, %v1719_v16  ;;  %v2056_v3 = vpop.f32.mrf.mxu3  ;;  %v2432_v44 = vsel %vm2303_vm9, %v2224_v61, %v2368_v13 }
 0x2de   :  { %v1721_v50 = vpop.f32.mrf.mxu1  ;;  %v2624_v12 = vsub.f32 %v2432_v44, %v3888_v23 }
 0x2df   :  { %v2057_v37 = vadd.f32 %v2056_v3, %v1888_v56  ;;  %v1722_v18 = vadd.f32 %v1721_v50, %v1553_v49  ;;  %v4094_v50 = vld [vmem:[%s5821_s4 + $0xe8] sm:$0xff]  }
 0x2e0   :  { %v2228_v4 = vpop.f32.mrf.mxu0  ;;  %v3896_v26 = vunpack.c.l.bf16 %v4094_v50  ;;  %v3897_v49 = vunpack.c.h.bf16 %v4094_v50 }
 0x2e1   :  { %v2226_v28 = vadd.f32 %v2225_v1, %v2057_v37  ;;  %v5868_v1 = vld [vmem:[#allocation19_spill] sm:$0xff]  ;;  %v1563_v37 = vadd.f32 %v5665_v11, %v5869_v46 }
 0x2e2   :  { %v1560_v51 = vadd.f32 %v5665_v11, %v5868_v1 }
 0x2e3   :  { %vm2304_vm10 = vcmp.ge.f32.partialorder %v2226_v28, 0.0  ;;  %v2369_v15 = vmul.f32 %v4874_v32, %v2226_v28 }
 0x2e4   :  { %v1890_v47 = vpop.f32.mrf.mxu2 }
 0x2e5   :  { %v2433_v8 = vsel %vm2304_vm10, %v2226_v28, %v2369_v15  ;;  %v1891_v19 = vadd.f32 %v1890_v47, %v1722_v18  ;;  %v2059_v35 = vpop.f32.mrf.mxu3 }
 0x2e6   :  { %v2625_v41 = vsub.f32 %v2433_v8, %v3889_v62  ;;  %v1723_v0 = vpop.f32.mrf.mxu1 }
 0x2e7   :  { %v2060_v30 = vadd.f32 %v2059_v35, %v1891_v19  ;;  %v1724_v45 = vadd.f32 %v1723_v0, %v1555_v48 }
 0x2e8   :  { %v2230_v52 = vpop.f32.mrf.mxu0  ;;  %v4044_v10 = vpack.c.bf16 %v2625_v41, %v2624_v12 }
 0x2e9   :  { %v2229_v7 = vadd.f32 %v2228_v4, %v2060_v30  ;;  %v5870_v30 = vld [vmem:[#allocation23_spill] sm:$0xff] }
 0x2ea   :  { %4123 = vst [vmem:[%s5822_s5 + $0xd8] sm:$0xff] %v4044_v10  }
 0x2eb   :  { %v2370_v22 = vmul.f32 %v4874_v32, %v2229_v7  ;;  %vm2305_vm11 = vcmp.ge.f32.partialorder %v2229_v7, 0.0 }
 0x2ec   :  { %v1892_v42 = vpop.f32.mrf.mxu2 }
 0x2ed   :  { %v1893_v54 = vadd.f32 %v1892_v42, %v1724_v45  ;;  %v2061_v24 = vpop.f32.mrf.mxu3  ;;  %v2434_v31 = vsel %vm2305_vm11, %v2229_v7, %v2370_v22 }
 0x2ee   :  { %v1726_v9 = vpop.f32.mrf.mxu1  ;;  %v2626_v2 = vsub.f32 %v2434_v31, %v3892_v59 }
 0x2ef   :  { %v2062_v58 = vadd.f32 %v2061_v24, %v1893_v54  ;;  %v1727_v33 = vadd.f32 %v1726_v9, %v1558_v36  ;;  %v4095_v9 = vld [vmem:[%s5821_s4 + $0xf0] sm:$0xff]  }
 0x2f0   :  { %v2233_v43 = vpop.f32.mrf.mxu0  ;;  %v3900_v34 = vunpack.c.l.bf16 %v4095_v9  ;;  %v3901_v36 = vunpack.c.h.bf16 %v4095_v9 }
 0x2f1   :  { %v2231_v14 = vadd.f32 %v2230_v52, %v2062_v58  ;;  %v1565_v52 = vadd.f32 %v5665_v11, %v5870_v30  ;;  %v1568_v58 = vadd.f32 %v5665_v11, %v5871_v53 }
 0x2f3   :  { %vm2306_vm12 = vcmp.ge.f32.partialorder %v2231_v14, 0.0  ;;  %v2371_v6 = vmul.f32 %v4874_v32, %v2231_v14 }
 0x2f4   :  { %v1895_v60 = vpop.f32.mrf.mxu2 }
 0x2f5   :  { %v2435_v29 = vsel %vm2306_vm12, %v2231_v14, %v2371_v6  ;;  %v1896_v5 = vadd.f32 %v1895_v60, %v1727_v33  ;;  %v2064_v17 = vpop.f32.mrf.mxu3 }
 0x2f6   :  { %v2627_v39 = vsub.f32 %v2435_v29, %v3893_v57  ;;  %v1728_v40 = vpop.f32.mrf.mxu1 }
 0x2f7   :  { %v2065_v63 = vadd.f32 %v2064_v17, %v1896_v5  ;;  %v1729_v27 = vadd.f32 %v1728_v40, %v1560_v51 }
 0x2f8   :  { %v4049_v55 = vpack.c.bf16 %v2627_v39, %v2626_v2  ;;  %v2235_v20 = vpop.f32.mrf.mxu0 }
 0x2f9   :  { %v2234_v38 = vadd.f32 %v2233_v43, %v2065_v63  ;;  %v5872_v63 = vld [vmem:[#allocation27_spill] sm:$0xff] }
 0x2fa   :  { %4124 = vst [vmem:[%s5822_s5 + $0xe0] sm:$0xff] %v4049_v55   ;;  %v1570_v55 = vadd.f32 %v5665_v11, %v5872_v63 }
 0x2fb   :  { %v2372_v3 = vmul.f32 %v4874_v32, %v2234_v38  ;;  %vm2307_vm13 = vcmp.ge.f32.partialorder %v2234_v38, 0.0 }
 0x2fc   :  { %v1897_v61 = vpop.f32.mrf.mxu2 }
 0x2fd   :  { %v1898_v16 = vadd.f32 %v1897_v61, %v1729_v27  ;;  %v2066_v21 = vpop.f32.mrf.mxu3  ;;  %v2436_v23 = vsel %vm2307_vm13, %v2234_v38, %v2372_v3 }
 0x2fe   :  { %v1731_v56 = vpop.f32.mrf.mxu1  ;;  %v2628_v19 = vsub.f32 %v2436_v23, %v3896_v26 }
 0x2ff   :  { %v2067_v13 = vadd.f32 %v2066_v21, %v1898_v16  ;;  %v1732_v44 = vadd.f32 %v1731_v56, %v1563_v37  ;;  %v4096_v16 = vld [vmem:[%s5821_s4 + $0xf8] sm:$0xff]  }
 0x300   :  { %v2238_v28 = vpop.f32.mrf.mxu0  ;;  %v3904_v11 = vunpack.c.l.bf16 %v4096_v16  ;;  %v3905_v50 = vunpack.c.h.bf16 %v4096_v16 }
 0x301   :  { %v2236_v4 = vadd.f32 %v2235_v20, %v2067_v13 }
 0x303   :  { %vm2308_vm14 = vcmp.ge.f32.partialorder %v2236_v4, 0.0  ;;  %v2373_v62 = vmul.f32 %v4874_v32, %v2236_v4 }
 0x304   :  { %v1900_v15 = vpop.f32.mrf.mxu2 }
 0x305   :  { %v2437_v18 = vsel %vm2308_vm14, %v2236_v4, %v2373_v62  ;;  %v1901_v47 = vadd.f32 %v1900_v15, %v1732_v44  ;;  %v2069_v8 = vpop.f32.mrf.mxu3 }
 0x306   :  { %v2629_v35 = vsub.f32 %v2437_v18, %v3897_v49  ;;  %v1733_v12 = vpop.f32.mrf.mxu1 }
 0x307   :  { %v2070_v41 = vadd.f32 %v2069_v8, %v1901_v47  ;;  %v1734_v25 = vadd.f32 %v1733_v12, %v1565_v52 }
 0x308   :  { %v4054_v0 = vpack.c.bf16 %v2629_v35, %v2628_v19  ;;  %v2240_v48 = vpop.f32.mrf.mxu0 }
 0x309   :  { %v2239_v10 = vadd.f32 %v2238_v28, %v2070_v41 }
 0x30a   :  { %4125 = vst [vmem:[%s5822_s5 + $0xe8] sm:$0xff] %v4054_v0  }
 0x30b   :  { %v2374_v24 = vmul.f32 %v4874_v32, %v2239_v10  ;;  %vm2309_vm15 = vcmp.ge.f32.partialorder %v2239_v10, 0.0 }
 0x30c   :  { %v1902_v7 = vpop.f32.mrf.mxu2 }
 0x30d   :  { %v1903_v45 = vadd.f32 %v1902_v7, %v1734_v25  ;;  %v2071_v42 = vpop.f32.mrf.mxu3  ;;  %v2438_v14 = vsel %vm2309_vm15, %v2239_v10, %v2374_v24 }
 0x30e   :  { %v1736_v54 = vpop.f32.mrf.mxu1  ;;  %v2630_v29 = vsub.f32 %v2438_v14, %v3900_v34 }
 0x30f   :  { %v2072_v22 = vadd.f32 %v2071_v42, %v1903_v45  ;;  %v1737_v57 = vadd.f32 %v1736_v54, %v1568_v58 }
 0x310   :  { %v2243_v17 = vpop.f32.mrf.mxu0 }
 0x311   :  { %v2241_v43 = vadd.f32 %v2240_v48, %v2072_v22 }
 0x313   :  { %vm2310_vm1 = vcmp.ge.f32.partialorder %v2241_v43, 0.0  ;;  %v2375_v59 = vmul.f32 %v4874_v32, %v2241_v43 }
 0x314   :  { %v1905_v31 = vpop.f32.mrf.mxu2 }
 0x315   :  { %v2439_v6 = vsel %vm2310_vm1, %v2241_v43, %v2375_v59  ;;  %v1906_v33 = vadd.f32 %v1905_v31, %v1737_v57  ;;  %v2074_v60 = vpop.f32.mrf.mxu3 }
 0x316   :  { %v2631_v5 = vsub.f32 %v2439_v6, %v3901_v36  ;;  %v1738_v40 = vpop.f32.mrf.mxu1 }
 0x317   :  { %v2075_v2 = vadd.f32 %v2074_v60, %v1906_v33  ;;  %v1739_v1 = vadd.f32 %v1738_v40, %v1570_v55 }
 0x318   :  { %v4059_v39 = vpack.c.bf16 %v2631_v5, %v2630_v29  ;;  %v2245_v56 = vpop.f32.mrf.mxu0 }
 0x319   :  { %v2244_v20 = vadd.f32 %v2243_v17, %v2075_v2 }
 0x31a   :  { %4126 = vst [vmem:[%s5822_s5 + $0xf0] sm:$0xff] %v4059_v39  }
 0x31b   :  { %v2376_v61 = vmul.f32 %v4874_v32, %v2244_v20  ;;  %vm2311_vm0 = vcmp.ge.f32.partialorder %v2244_v20, 0.0 }
 0x31c   :  { %v1907_v51 = vpop.f32.mrf.mxu2 }
 0x31d   :  { %v1908_v38 = vadd.f32 %v1907_v51, %v1739_v1  ;;  %v2076_v27 = vpop.f32.mrf.mxu3  ;;  %v2440_v13 = vsel %vm2311_vm0, %v2244_v20, %v2376_v61 }
 0x31e   :  { %v2632_v4 = vsub.f32 %v2440_v13, %v3904_v11 }
 0x31f   :  { %v2077_v21 = vadd.f32 %v2076_v27, %v1908_v38 }
 0x321   :  { %v2246_v3 = vadd.f32 %v2245_v56, %v2077_v21 }
 0x323   :  { %vm2312_vm2 = vcmp.ge.f32.partialorder %v2246_v3, 0.0  ;;  %v2377_v46 = vmul.f32 %v4874_v32, %v2246_v3 }
 0x325   :  { %v2441_v37 = vsel %vm2312_vm2, %v2246_v3, %v2377_v46 }
 0x326   :  { %v2633_v26 = vsub.f32 %v2441_v37, %v3905_v50 }
 0x328   :  { %v4064_v49 = vpack.c.bf16 %v2633_v26, %v2632_v4 }
 0x32a   :  { %4127 = vst [vmem:[%s5822_s5 + $0xf8] sm:$0xff] %v4064_v49  }

// kernel: upblock1_forward.5
= control target key start
LH: loop header
LB: loop body
LE: loop exit
PB: predicated region body
PF: predicated region fallthrough
CT: control target
= control target key end

     0   :  { %vm370_vm0 = vcmask 1045504   ;;  %vm371_vm1 = vcmask 1046528   ;;  %v1378_v2 = vmov 65535   ;;  %vm273_vm2 = vcmask 367616   ;;  %s2088_s1 = inlined_call_operand.vmem [shape: bf16[45,128], index: 1, kind: input, shape index: {}]   ;;  %s2089_s2 = inlined_call_operand.vmem [shape: f32[1,128], index: 2, kind: input, shape index: {}]   ;;  %s2090_s0 = inlined_call_operand.vmem [shape: bf16[512,45], index: 0, kind: input, shape index: {}]   ;;  %s2091_s4 = inlined_call_operand.vmem [shape: bf16[512,128], index: 4, kind: input, shape index: {}]   ;;  %s2092_s3 = inlined_call_operand.<no memory space> [shape: f32[1,1], index: 3, kind: input, shape index: {}]   ;;  %s2093_s5 = inlined_call_operand.vmem [shape: f32[512,128], index: 5, kind: output, shape index: {}]  }
   0x1   :  { %v1138_v0 = vld [vmem:[%s2088_s1 + $0x10] sm:$0xf]  ;;  %v1206_v1 = vld [vmem:[%s2088_s1 + $0x10] sm:$0x70]  ;;  %v372_v3 = vsel %vm370_vm0, 4294967295, %v1378_v2  ;;  %v1205_v7 = vld [vmem:[%s2088_s1 + $0x8] sm:$0xff]  ;;  %v1563_v45 = vstv %s2092_s3 }
   0x2   :  { %v1139_v4 = vor.u32 %v1206_v1, %v1138_v0  ;;  %v373_v5 = vsel %vm371_vm1, %v372_v3, 0  ;;  %v1204_v8 = vld [vmem:[%s2088_s1] sm:$0xff]  ;;  %v1173_v13 = vld [vmem:[%s2090_s0 + $0x8] sm:$0xff]  ;;  %v1174_v17 = vld [vmem:[%s2090_s0 + $0x10] sm:$0xff] }
   0x3   :  { %v1172_v9 = vld [vmem:[%s2090_s0] sm:$0xff]  ;;  %v1181_v14 = vld [vmem:[%s2090_s0 + $0x48] sm:$0xff]  ;;  %v1182_v18 = vld [vmem:[%s2090_s0 + $0x50] sm:$0xff] }
   0x4   :  { %v375_v6 = vand.u32 %v1139_v4, %v373_v5  ;;  %v1180_v10 = vld [vmem:[%s2090_s0 + $0x40] sm:$0xff]  ;;  %v1189_v15 = vld [vmem:[%s2090_s0 + $0x88] sm:$0xff]  ;;  %v1190_v19 = vld [vmem:[%s2090_s0 + $0x90] sm:$0xff] }
   0x5   :  { %v1188_v11 = vld [vmem:[%s2090_s0 + $0x80] sm:$0xff]  ;;  %v1197_v16 = vld [vmem:[%s2090_s0 + $0xc8] sm:$0xff]  ;;  %v1198_v20 = vld [vmem:[%s2090_s0 + $0xd0] sm:$0xff] }
   0x6   :  { %382 = vmatpush.bf16.msra.mxu0 %v375_v6  ;;  %1366 = vmatpush.bf16.msra.mxu1 %v375_v6  ;;  %v1196_v12 = vld [vmem:[%s2090_s0 + $0xc0] sm:$0xff]  ;;  %v1175_v21 = vld [vmem:[%s2090_s0 + $0x18] sm:$0xff]  ;;  %v1177_v29 = vld [vmem:[%s2090_s0 + $0x28] sm:$0xff] }
   0x7   :  { %1367 = vmatpush.bf16.msra.mxu2 %v375_v6  ;;  %1368 = vmatpush.bf16.msra.mxu3 %v375_v6  ;;  %v1183_v22 = vld [vmem:[%s2090_s0 + $0x58] sm:$0xff]  ;;  %v1176_v25 = vld [vmem:[%s2090_s0 + $0x20] sm:$0xff]  ;;  %v1185_v30 = vld [vmem:[%s2090_s0 + $0x68] sm:$0xff] }
   0x8   :  { %v1191_v23 = vld [vmem:[%s2090_s0 + $0x98] sm:$0xff]  ;;  %v1184_v26 = vld [vmem:[%s2090_s0 + $0x60] sm:$0xff]  ;;  %v1193_v31 = vld [vmem:[%s2090_s0 + $0xa8] sm:$0xff] }
   0x9   :  { %v1199_v24 = vld [vmem:[%s2090_s0 + $0xd8] sm:$0xff]  ;;  %v1192_v27 = vld [vmem:[%s2090_s0 + $0xa0] sm:$0xff]  ;;  %v1201_v32 = vld [vmem:[%s2090_s0 + $0xe8] sm:$0xff] }
   0xa   :  { %383 = vmatpush.bf16.msra.mxu0 %v1205_v7  ;;  %1369 = vmatpush.bf16.msra.mxu1 %v1205_v7  ;;  %v1200_v28 = vld [vmem:[%s2090_s0 + $0xe0] sm:$0xff]  ;;  %v1178_v33 = vld [vmem:[%s2090_s0 + $0x30] sm:$0xff]  ;;  %v1179_v37 = vld [vmem:[%s2090_s0 + $0x38] sm:$0xff] }
   0xb   :  { %1370 = vmatpush.bf16.msra.mxu2 %v1205_v7  ;;  %1371 = vmatpush.bf16.msra.mxu3 %v1205_v7  ;;  %v1186_v34 = vld [vmem:[%s2090_s0 + $0x70] sm:$0xff]  ;;  %v1187_v38 = vld [vmem:[%s2090_s0 + $0x78] sm:$0xff]  ;;  %v1552_v41 = vld [vmem:[%s2089_s2] ss:$0 sm:$0xff] }
   0xc   :  { %v1194_v35 = vld [vmem:[%s2090_s0 + $0xb0] sm:$0xff]  ;;  %v1195_v39 = vld [vmem:[%s2090_s0 + $0xb8] sm:$0xff]  ;;  %v1208_v42 = vld [vmem:[%s2091_s4] sm:$0xff]  }
   0xd   :  { %v1202_v36 = vld [vmem:[%s2090_s0 + $0xf0] sm:$0xff]  ;;  %v1203_v40 = vld [vmem:[%s2090_s0 + $0xf8] sm:$0xff]  ;;  %v1342_v43 = vld [vmem:[%s2091_s4 + $0x40] sm:$0xff]   ;;  %v1209_v49 = vunpack.c.l.bf16 %v1208_v42  ;;  %v1210_v4 = vunpack.c.h.bf16 %v1208_v42 }
   0xe   :  { %384 = vmatpush.bf16.msra.mxu0 %v1204_v8  ;;  %1372 = vmatpush.bf16.msra.mxu1 %v1204_v8  ;;  %v1241_v50 = vunpack.c.l.bf16 %v1342_v43  ;;  %v1572_v55 = vld [vmem:[%s2091_s4 + $0x80] sm:$0xff]   ;;  %v1242_v6 = vunpack.c.h.bf16 %v1342_v43 }
   0xf   :  { %1373 = vmatpush.bf16.msra.mxu2 %v1204_v8  ;;  %1374 = vmatpush.bf16.msra.mxu3 %v1204_v8  ;;  %v1577_v56 = vld [vmem:[%s2091_s4 + $0xc0] sm:$0xff]   ;;  %v1273_v62 = vunpack.c.l.bf16 %v1572_v55 }
  0x10   :  { %v1305_v0 = vunpack.c.l.bf16 %v1577_v56 }
  0x11   :  { %1140 = vmatmul.msk.bf16.vlgmr.msra.gmra.mxu0 %vm273_vm2, %v1172_v9  ;;  %1148 = vmatmul.msk.bf16.vlgmr.msra.gmra.mxu1 %vm273_vm2, %v1180_v10 }
  0x12   :  { %1156 = vmatmul.msk.bf16.vlgmr.msra.gmra.mxu2 %vm273_vm2, %v1188_v11  ;;  %1164 = vmatmul.msk.bf16.vlgmr.msra.gmra.mxu3 %vm273_vm2, %v1196_v12 }
  0x21   :  { %1141 = vmatmul.msk.bf16.gmra.mxu0 %vm273_vm2, %v1173_v13  ;;  %1149 = vmatmul.msk.bf16.gmra.mxu1 %vm273_vm2, %v1181_v14 }
  0x22   :  { %1157 = vmatmul.msk.bf16.gmra.mxu2 %vm273_vm2, %v1189_v15  ;;  %1165 = vmatmul.msk.bf16.gmra.mxu3 %vm273_vm2, %v1197_v16 }
  0x31   :  { %1142 = vmatmul.msk.bf16.gmra.mxu0 %vm273_vm2, %v1174_v17  ;;  %1150 = vmatmul.msk.bf16.gmra.mxu1 %vm273_vm2, %v1182_v18 }
  0x32   :  { %1158 = vmatmul.msk.bf16.gmra.mxu2 %vm273_vm2, %v1190_v19  ;;  %1166 = vmatmul.msk.bf16.gmra.mxu3 %vm273_vm2, %v1198_v20  ;;  %v1598_v19 = vld [vmem:[%s2091_s4 + $0x8] sm:$0xff]  }
  0x33   :  { %v1603_v20 = vld [vmem:[%s2091_s4 + $0x48] sm:$0xff]  }
  0x41   :  { %1143 = vmatmul.msk.bf16.gmra.mxu0 %vm273_vm2, %v1175_v21  ;;  %1151 = vmatmul.msk.bf16.gmra.mxu1 %vm273_vm2, %v1183_v22 }
  0x42   :  { %1159 = vmatmul.msk.bf16.gmra.mxu2 %vm273_vm2, %v1191_v23  ;;  %1167 = vmatmul.msk.bf16.gmra.mxu3 %vm273_vm2, %v1199_v24  ;;  %v1274_v24 = vunpack.c.h.bf16 %v1572_v55 }
  0x51   :  { %1144 = vmatmul.msk.bf16.gmra.mxu0 %vm273_vm2, %v1176_v25  ;;  %1152 = vmatmul.msk.bf16.gmra.mxu1 %vm273_vm2, %v1184_v26  ;;  %v1306_v26 = vunpack.c.h.bf16 %v1577_v56 }
  0x52   :  { %1160 = vmatmul.msk.bf16.gmra.mxu2 %vm273_vm2, %v1192_v27  ;;  %1168 = vmatmul.msk.bf16.gmra.mxu3 %vm273_vm2, %v1200_v28 }
  0x61   :  { %1145 = vmatmul.msk.bf16.gmra.mxu0 %vm273_vm2, %v1177_v29  ;;  %1153 = vmatmul.msk.bf16.gmra.mxu1 %vm273_vm2, %v1185_v30  ;;  %v1213_v30 = vunpack.c.l.bf16 %v1598_v19 }
  0x62   :  { %1161 = vmatmul.msk.bf16.gmra.mxu2 %vm273_vm2, %v1193_v31  ;;  %1169 = vmatmul.msk.bf16.gmra.mxu3 %vm273_vm2, %v1201_v32  ;;  %v1245_v32 = vunpack.c.l.bf16 %v1603_v20 }
  0x71   :  { %1146 = vmatmul.msk.bf16.gmra.mxu0 %vm273_vm2, %v1178_v33  ;;  %1154 = vmatmul.msk.bf16.gmra.mxu1 %vm273_vm2, %v1186_v34 }
  0x72   :  { %1162 = vmatmul.msk.bf16.gmra.mxu2 %vm273_vm2, %v1194_v35  ;;  %1170 = vmatmul.msk.bf16.gmra.mxu3 %vm273_vm2, %v1202_v36 }
  0x81   :  { %1147 = vmatmul.msk.bf16.gmra.mxu0 %vm273_vm2, %v1179_v37  ;;  %1155 = vmatmul.msk.bf16.gmra.mxu1 %vm273_vm2, %v1187_v38 }
  0x82   :  { %1163 = vmatmul.msk.bf16.gmra.mxu2 %vm273_vm2, %v1195_v39  ;;  %1171 = vmatmul.msk.bf16.gmra.mxu3 %vm273_vm2, %v1203_v40 }
  0x8e   :  { %v386_v44 = vpop.f32.mrf.mxu0  ;;  %v426_v46 = vpop.f32.mrf.mxu1 }
  0x8f   :  { %v387_v47 = vadd.f32 %v1552_v41, %v386_v44  ;;  %v427_v48 = vadd.f32 %v1552_v41, %v426_v46  ;;  %v1632_v44 = vld [vmem:[%s2091_s4 + $0x88] sm:$0xff]  }
  0x90   :  { %v1637_v46 = vld [vmem:[%s2091_s4 + $0xc8] sm:$0xff]  }
  0x91   :  { %vm547_vm3 = vcmp.ge.f32.partialorder %v387_v47, 0.0  ;;  %v612_v51 = vmul.f32 %v1563_v45, %v387_v47  ;;  %vm563_vm4 = vcmp.ge.f32.partialorder %v427_v48, 0.0  ;;  %v628_v52 = vmul.f32 %v1563_v45, %v427_v48 }
  0x93   :  { %v676_v53 = vsel %vm547_vm3, %v387_v47, %v612_v51  ;;  %v692_v54 = vsel %vm563_vm4, %v427_v48, %v628_v52  ;;  %v1277_v52 = vunpack.c.l.bf16 %v1632_v44 }
  0x94   :  { %v868_v57 = vadd.f32 %v1209_v49, %v676_v53  ;;  %v884_v58 = vadd.f32 %v1241_v50, %v692_v54  ;;  %v1309_v54 = vunpack.c.l.bf16 %v1637_v46 }
  0x95   :  { %v466_v59 = vpop.f32.mrf.mxu2  ;;  %v506_v60 = vpop.f32.mrf.mxu3 }
  0x96   :  { %932 = vst [vmem:[%s2093_s5] sm:$0xff] %v868_v57  ;;  %v467_v61 = vadd.f32 %v1552_v41, %v466_v59  ;;  %v507_v63 = vadd.f32 %v1552_v41, %v506_v60  ;;  %v388_v1 = vpop.f32.mrf.mxu0  ;;  %v428_v2 = vpop.f32.mrf.mxu1  ;;  %v1246_v60 = vunpack.c.h.bf16 %v1603_v20 }
  0x97   :  { %948 = vst [vmem:[%s2093_s5 + $0x80] sm:$0xff] %v884_v58  ;;  %v389_v3 = vadd.f32 %v1552_v41, %v388_v1  ;;  %v429_v5 = vadd.f32 %v1552_v41, %v428_v2  ;;  %v1214_v58 = vunpack.c.h.bf16 %v1598_v19 }
  0x98   :  { %vm579_vm5 = vcmp.ge.f32.partialorder %v467_v61, 0.0  ;;  %v644_v7 = vmul.f32 %v1563_v45, %v467_v61  ;;  %vm595_vm6 = vcmp.ge.f32.partialorder %v507_v63, 0.0  ;;  %v660_v8 = vmul.f32 %v1563_v45, %v507_v63 }
  0x99   :  { %vm548_vm7 = vcmp.ge.f32.partialorder %v389_v3, 0.0  ;;  %v613_v9 = vmul.f32 %v1563_v45, %v389_v3  ;;  %vm564_vm8 = vcmp.ge.f32.partialorder %v429_v5, 0.0  ;;  %v629_v10 = vmul.f32 %v1563_v45, %v429_v5 }
  0x9a   :  { %v708_v11 = vsel %vm579_vm5, %v467_v61, %v644_v7  ;;  %v724_v12 = vsel %vm595_vm6, %v507_v63, %v660_v8 }
  0x9b   :  { %v900_v13 = vadd.f32 %v1273_v62, %v708_v11  ;;  %v916_v14 = vadd.f32 %v1305_v0, %v724_v12  ;;  %v677_v15 = vsel %vm548_vm7, %v389_v3, %v613_v9  ;;  %v693_v16 = vsel %vm564_vm8, %v429_v5, %v629_v10  ;;  %v1666_v9 = vld [vmem:[%s2091_s4 + $0x10] sm:$0xff]  }
  0x9c   :  { %v869_v17 = vadd.f32 %v1210_v4, %v677_v15  ;;  %v885_v18 = vadd.f32 %v1242_v6, %v693_v16  ;;  %v1671_v10 = vld [vmem:[%s2091_s4 + $0x50] sm:$0xff]   ;;  %v1310_v16 = vunpack.c.h.bf16 %v1637_v46  ;;  %v1217_v20 = vunpack.c.l.bf16 %v1666_v9 }
  0x9d   :  { %964 = vst [vmem:[%s2093_s5 + $0x100] sm:$0xff] %v900_v13  ;;  %v468_v21 = vpop.f32.mrf.mxu2  ;;  %v508_v22 = vpop.f32.mrf.mxu3 }
  0x9e   :  { %980 = vst [vmem:[%s2093_s5 + $0x180] sm:$0xff] %v916_v14  ;;  %v469_v23 = vadd.f32 %v1552_v41, %v468_v21  ;;  %v509_v25 = vadd.f32 %v1552_v41, %v508_v22  ;;  %v391_v27 = vpop.f32.mrf.mxu0  ;;  %v431_v28 = vpop.f32.mrf.mxu1  ;;  %v1278_v14 = vunpack.c.h.bf16 %v1632_v44  ;;  %v1249_v22 = vunpack.c.l.bf16 %v1671_v10 }
  0x9f   :  { %933 = vst [vmem:[%s2093_s5 + $0x8] sm:$0xff] %v869_v17  ;;  %v392_v29 = vadd.f32 %v1552_v41, %v391_v27  ;;  %v432_v31 = vadd.f32 %v1552_v41, %v431_v28 }
  0xa0   :  { %949 = vst [vmem:[%s2093_s5 + $0x88] sm:$0xff] %v885_v18  ;;  %vm580_vm9 = vcmp.ge.f32.partialorder %v469_v23, 0.0  ;;  %v645_v33 = vmul.f32 %v1563_v45, %v469_v23  ;;  %vm596_vm10 = vcmp.ge.f32.partialorder %v509_v25, 0.0  ;;  %v661_v34 = vmul.f32 %v1563_v45, %v509_v25 }
  0xa1   :  { %vm549_vm11 = vcmp.ge.f32.partialorder %v392_v29, 0.0  ;;  %v614_v35 = vmul.f32 %v1563_v45, %v392_v29  ;;  %vm565_vm12 = vcmp.ge.f32.partialorder %v432_v31, 0.0  ;;  %v630_v36 = vmul.f32 %v1563_v45, %v432_v31 }
  0xa2   :  { %v709_v37 = vsel %vm580_vm9, %v469_v23, %v645_v33  ;;  %v725_v38 = vsel %vm596_vm10, %v509_v25, %v661_v34  ;;  %v1700_v33 = vld [vmem:[%s2091_s4 + $0x90] sm:$0xff]  }
  0xa3   :  { %v901_v39 = vadd.f32 %v1274_v24, %v709_v37  ;;  %v917_v40 = vadd.f32 %v1306_v26, %v725_v38  ;;  %v678_v42 = vsel %vm549_vm11, %v392_v29, %v614_v35  ;;  %v694_v43 = vsel %vm565_vm12, %v432_v31, %v630_v36  ;;  %v1705_v34 = vld [vmem:[%s2091_s4 + $0xd0] sm:$0xff]  }
  0xa4   :  { %v870_v47 = vadd.f32 %v1213_v30, %v678_v42  ;;  %v886_v48 = vadd.f32 %v1245_v32, %v694_v43  ;;  %v1313_v43 = vunpack.c.l.bf16 %v1705_v34 }
  0xa5   :  { %965 = vst [vmem:[%s2093_s5 + $0x108] sm:$0xff] %v901_v39  ;;  %v471_v49 = vpop.f32.mrf.mxu2  ;;  %v511_v50 = vpop.f32.mrf.mxu3 }
  0xa6   :  { %981 = vst [vmem:[%s2093_s5 + $0x188] sm:$0xff] %v917_v40  ;;  %v472_v51 = vadd.f32 %v1552_v41, %v471_v49  ;;  %v512_v53 = vadd.f32 %v1552_v41, %v511_v50  ;;  %v393_v55 = vpop.f32.mrf.mxu0  ;;  %v433_v56 = vpop.f32.mrf.mxu1  ;;  %v1281_v40 = vunpack.c.l.bf16 %v1700_v33  ;;  %v1250_v50 = vunpack.c.h.bf16 %v1671_v10 }
  0xa7   :  { %934 = vst [vmem:[%s2093_s5 + $0x10] sm:$0xff] %v870_v47  ;;  %v394_v57 = vadd.f32 %v1552_v41, %v393_v55  ;;  %v434_v59 = vadd.f32 %v1552_v41, %v433_v56 }
  0xa8   :  { %950 = vst [vmem:[%s2093_s5 + $0x90] sm:$0xff] %v886_v48  ;;  %vm581_vm13 = vcmp.ge.f32.partialorder %v472_v51, 0.0  ;;  %v646_v61 = vmul.f32 %v1563_v45, %v472_v51  ;;  %vm597_vm14 = vcmp.ge.f32.partialorder %v512_v53, 0.0  ;;  %v662_v62 = vmul.f32 %v1563_v45, %v512_v53 }
  0xa9   :  { %vm550_vm15 = vcmp.ge.f32.partialorder %v394_v57, 0.0  ;;  %v615_v63 = vmul.f32 %v1563_v45, %v394_v57  ;;  %vm566_vm0 = vcmp.ge.f32.partialorder %v434_v59, 0.0  ;;  %v631_v0 = vmul.f32 %v1563_v45, %v434_v59 }
  0xaa   :  { %v710_v1 = vsel %vm581_vm13, %v472_v51, %v646_v61  ;;  %v726_v2 = vsel %vm597_vm14, %v512_v53, %v662_v62  ;;  %v1218_v48 = vunpack.c.h.bf16 %v1666_v9 }
  0xab   :  { %v902_v3 = vadd.f32 %v1277_v52, %v710_v1  ;;  %v918_v4 = vadd.f32 %v1309_v54, %v726_v2  ;;  %v679_v5 = vsel %vm550_vm15, %v394_v57, %v615_v63  ;;  %v695_v6 = vsel %vm566_vm0, %v434_v59, %v631_v0  ;;  %v1734_v63 = vld [vmem:[%s2091_s4 + $0x18] sm:$0xff]  }
  0xac   :  { %v871_v7 = vadd.f32 %v1214_v58, %v679_v5  ;;  %v887_v8 = vadd.f32 %v1246_v60, %v695_v6  ;;  %v1739_v0 = vld [vmem:[%s2091_s4 + $0x58] sm:$0xff]   ;;  %v1314_v6 = vunpack.c.h.bf16 %v1705_v34  ;;  %v1221_v10 = vunpack.c.l.bf16 %v1734_v63 }
  0xad   :  { %966 = vst [vmem:[%s2093_s5 + $0x110] sm:$0xff] %v902_v3  ;;  %v473_v11 = vpop.f32.mrf.mxu2  ;;  %v513_v12 = vpop.f32.mrf.mxu3 }
  0xae   :  { %982 = vst [vmem:[%s2093_s5 + $0x190] sm:$0xff] %v918_v4  ;;  %v474_v13 = vadd.f32 %v1552_v41, %v473_v11  ;;  %v514_v15 = vadd.f32 %v1552_v41, %v513_v12  ;;  %v396_v17 = vpop.f32.mrf.mxu0  ;;  %v436_v18 = vpop.f32.mrf.mxu1  ;;  %v1282_v4 = vunpack.c.h.bf16 %v1700_v33  ;;  %v1253_v12 = vunpack.c.l.bf16 %v1739_v0 }
  0xaf   :  { %935 = vst [vmem:[%s2093_s5 + $0x18] sm:$0xff] %v871_v7  ;;  %v397_v19 = vadd.f32 %v1552_v41, %v396_v17  ;;  %v437_v21 = vadd.f32 %v1552_v41, %v436_v18 }
  0xb0   :  { %951 = vst [vmem:[%s2093_s5 + $0x98] sm:$0xff] %v887_v8  ;;  %vm582_vm1 = vcmp.ge.f32.partialorder %v474_v13, 0.0  ;;  %v647_v23 = vmul.f32 %v1563_v45, %v474_v13  ;;  %vm598_vm2 = vcmp.ge.f32.partialorder %v514_v15, 0.0  ;;  %v663_v24 = vmul.f32 %v1563_v45, %v514_v15 }
  0xb1   :  { %vm551_vm3 = vcmp.ge.f32.partialorder %v397_v19, 0.0  ;;  %v616_v25 = vmul.f32 %v1563_v45, %v397_v19  ;;  %vm567_vm4 = vcmp.ge.f32.partialorder %v437_v21, 0.0  ;;  %v632_v26 = vmul.f32 %v1563_v45, %v437_v21 }
  0xb2   :  { %v711_v27 = vsel %vm582_vm1, %v474_v13, %v647_v23  ;;  %v727_v28 = vsel %vm598_vm2, %v514_v15, %v663_v24  ;;  %v1768_v23 = vld [vmem:[%s2091_s4 + $0x98] sm:$0xff]  }
  0xb3   :  { %v903_v29 = vadd.f32 %v1278_v14, %v711_v27  ;;  %v919_v30 = vadd.f32 %v1310_v16, %v727_v28  ;;  %v680_v31 = vsel %vm551_vm3, %v397_v19, %v616_v25  ;;  %v696_v32 = vsel %vm567_vm4, %v437_v21, %v632_v26  ;;  %v1773_v24 = vld [vmem:[%s2091_s4 + $0xd8] sm:$0xff]  }
  0xb4   :  { %v872_v35 = vadd.f32 %v1217_v20, %v680_v31  ;;  %v888_v36 = vadd.f32 %v1249_v22, %v696_v32  ;;  %v1317_v32 = vunpack.c.l.bf16 %v1773_v24 }
  0xb5   :  { %967 = vst [vmem:[%s2093_s5 + $0x118] sm:$0xff] %v903_v29  ;;  %v476_v37 = vpop.f32.mrf.mxu2  ;;  %v516_v38 = vpop.f32.mrf.mxu3 }
  0xb6   :  { %983 = vst [vmem:[%s2093_s5 + $0x198] sm:$0xff] %v919_v30  ;;  %v477_v39 = vadd.f32 %v1552_v41, %v476_v37  ;;  %v517_v42 = vadd.f32 %v1552_v41, %v516_v38  ;;  %v398_v44 = vpop.f32.mrf.mxu0  ;;  %v438_v46 = vpop.f32.mrf.mxu1  ;;  %v1285_v30 = vunpack.c.l.bf16 %v1768_v23  ;;  %v1254_v38 = vunpack.c.h.bf16 %v1739_v0 }
  0xb7   :  { %936 = vst [vmem:[%s2093_s5 + $0x20] sm:$0xff] %v872_v35  ;;  %v399_v47 = vadd.f32 %v1552_v41, %v398_v44  ;;  %v439_v49 = vadd.f32 %v1552_v41, %v438_v46 }
  0xb8   :  { %952 = vst [vmem:[%s2093_s5 + $0xa0] sm:$0xff] %v888_v36  ;;  %vm583_vm5 = vcmp.ge.f32.partialorder %v477_v39, 0.0  ;;  %v648_v51 = vmul.f32 %v1563_v45, %v477_v39  ;;  %vm599_vm6 = vcmp.ge.f32.partialorder %v517_v42, 0.0  ;;  %v664_v52 = vmul.f32 %v1563_v45, %v517_v42 }
  0xb9   :  { %vm552_vm7 = vcmp.ge.f32.partialorder %v399_v47, 0.0  ;;  %v617_v53 = vmul.f32 %v1563_v45, %v399_v47  ;;  %vm568_vm8 = vcmp.ge.f32.partialorder %v439_v49, 0.0  ;;  %v633_v54 = vmul.f32 %v1563_v45, %v439_v49 }
  0xba   :  { %v712_v55 = vsel %vm583_vm5, %v477_v39, %v648_v51  ;;  %v728_v56 = vsel %vm599_vm6, %v517_v42, %v664_v52  ;;  %v1222_v36 = vunpack.c.h.bf16 %v1734_v63 }
  0xbb   :  { %v904_v57 = vadd.f32 %v1281_v40, %v712_v55  ;;  %v920_v58 = vadd.f32 %v1313_v43, %v728_v56  ;;  %v681_v59 = vsel %vm552_vm7, %v399_v47, %v617_v53  ;;  %v697_v60 = vsel %vm568_vm8, %v439_v49, %v633_v54  ;;  %v1802_v53 = vld [vmem:[%s2091_s4 + $0x20] sm:$0xff]  }
  0xbc   :  { %v873_v61 = vadd.f32 %v1218_v48, %v681_v59  ;;  %v889_v62 = vadd.f32 %v1250_v50, %v697_v60  ;;  %v1807_v54 = vld [vmem:[%s2091_s4 + $0x60] sm:$0xff]   ;;  %v1318_v60 = vunpack.c.h.bf16 %v1773_v24  ;;  %v1225_v0 = vunpack.c.l.bf16 %v1802_v53 }
  0xbd   :  { %968 = vst [vmem:[%s2093_s5 + $0x120] sm:$0xff] %v904_v57  ;;  %v478_v1 = vpop.f32.mrf.mxu2  ;;  %v518_v2 = vpop.f32.mrf.mxu3 }
  0xbe   :  { %984 = vst [vmem:[%s2093_s5 + $0x1a0] sm:$0xff] %v920_v58  ;;  %v479_v3 = vadd.f32 %v1552_v41, %v478_v1  ;;  %v519_v5 = vadd.f32 %v1552_v41, %v518_v2  ;;  %v401_v7 = vpop.f32.mrf.mxu0  ;;  %v441_v8 = vpop.f32.mrf.mxu1  ;;  %v1286_v58 = vunpack.c.h.bf16 %v1768_v23  ;;  %v1257_v2 = vunpack.c.l.bf16 %v1807_v54 }
  0xbf   :  { %937 = vst [vmem:[%s2093_s5 + $0x28] sm:$0xff] %v873_v61  ;;  %v402_v9 = vadd.f32 %v1552_v41, %v401_v7  ;;  %v442_v11 = vadd.f32 %v1552_v41, %v441_v8 }
  0xc0   :  { %953 = vst [vmem:[%s2093_s5 + $0xa8] sm:$0xff] %v889_v62  ;;  %vm584_vm9 = vcmp.ge.f32.partialorder %v479_v3, 0.0  ;;  %v649_v13 = vmul.f32 %v1563_v45, %v479_v3  ;;  %vm600_vm10 = vcmp.ge.f32.partialorder %v519_v5, 0.0  ;;  %v665_v14 = vmul.f32 %v1563_v45, %v519_v5 }
  0xc1   :  { %vm553_vm11 = vcmp.ge.f32.partialorder %v402_v9, 0.0  ;;  %v618_v15 = vmul.f32 %v1563_v45, %v402_v9  ;;  %vm569_vm12 = vcmp.ge.f32.partialorder %v442_v11, 0.0  ;;  %v634_v16 = vmul.f32 %v1563_v45, %v442_v11 }
  0xc2   :  { %v713_v17 = vsel %vm584_vm9, %v479_v3, %v649_v13  ;;  %v729_v18 = vsel %vm600_vm10, %v519_v5, %v665_v14  ;;  %v1836_v13 = vld [vmem:[%s2091_s4 + $0xa0] sm:$0xff]  }
  0xc3   :  { %v905_v19 = vadd.f32 %v1282_v4, %v713_v17  ;;  %v921_v20 = vadd.f32 %v1314_v6, %v729_v18  ;;  %v682_v21 = vsel %vm553_vm11, %v402_v9, %v618_v15  ;;  %v698_v22 = vsel %vm569_vm12, %v442_v11, %v634_v16  ;;  %v1841_v14 = vld [vmem:[%s2091_s4 + $0xe0] sm:$0xff]  }
  0xc4   :  { %v874_v25 = vadd.f32 %v1221_v10, %v682_v21  ;;  %v890_v26 = vadd.f32 %v1253_v12, %v698_v22  ;;  %v1321_v22 = vunpack.c.l.bf16 %v1841_v14 }
  0xc5   :  { %969 = vst [vmem:[%s2093_s5 + $0x128] sm:$0xff] %v905_v19  ;;  %v481_v27 = vpop.f32.mrf.mxu2  ;;  %v521_v28 = vpop.f32.mrf.mxu3 }
  0xc6   :  { %985 = vst [vmem:[%s2093_s5 + $0x1a8] sm:$0xff] %v921_v20  ;;  %v482_v29 = vadd.f32 %v1552_v41, %v481_v27  ;;  %v522_v31 = vadd.f32 %v1552_v41, %v521_v28  ;;  %v403_v33 = vpop.f32.mrf.mxu0  ;;  %v443_v34 = vpop.f32.mrf.mxu1  ;;  %v1289_v20 = vunpack.c.l.bf16 %v1836_v13  ;;  %v1258_v28 = vunpack.c.h.bf16 %v1807_v54 }
  0xc7   :  { %938 = vst [vmem:[%s2093_s5 + $0x30] sm:$0xff] %v874_v25  ;;  %v404_v35 = vadd.f32 %v1552_v41, %v403_v33  ;;  %v444_v37 = vadd.f32 %v1552_v41, %v443_v34 }
  0xc8   :  { %954 = vst [vmem:[%s2093_s5 + $0xb0] sm:$0xff] %v890_v26  ;;  %vm585_vm13 = vcmp.ge.f32.partialorder %v482_v29, 0.0  ;;  %v650_v39 = vmul.f32 %v1563_v45, %v482_v29  ;;  %vm601_vm14 = vcmp.ge.f32.partialorder %v522_v31, 0.0  ;;  %v666_v40 = vmul.f32 %v1563_v45, %v522_v31 }
  0xc9   :  { %vm554_vm15 = vcmp.ge.f32.partialorder %v404_v35, 0.0  ;;  %v619_v42 = vmul.f32 %v1563_v45, %v404_v35  ;;  %vm570_vm0 = vcmp.ge.f32.partialorder %v444_v37, 0.0  ;;  %v635_v43 = vmul.f32 %v1563_v45, %v444_v37 }
  0xca   :  { %v714_v44 = vsel %vm585_vm13, %v482_v29, %v650_v39  ;;  %v730_v46 = vsel %vm601_vm14, %v522_v31, %v666_v40  ;;  %v1226_v26 = vunpack.c.h.bf16 %v1802_v53 }
  0xcb   :  { %v906_v47 = vadd.f32 %v1285_v30, %v714_v44  ;;  %v922_v48 = vadd.f32 %v1317_v32, %v730_v46  ;;  %v683_v49 = vsel %vm554_vm15, %v404_v35, %v619_v42  ;;  %v699_v50 = vsel %vm570_vm0, %v444_v37, %v635_v43  ;;  %v1870_v42 = vld [vmem:[%s2091_s4 + $0x28] sm:$0xff]  }
  0xcc   :  { %v875_v51 = vadd.f32 %v1222_v36, %v683_v49  ;;  %v891_v52 = vadd.f32 %v1254_v38, %v699_v50  ;;  %v1875_v43 = vld [vmem:[%s2091_s4 + $0x68] sm:$0xff]   ;;  %v1322_v50 = vunpack.c.h.bf16 %v1841_v14  ;;  %v1229_v54 = vunpack.c.l.bf16 %v1870_v42 }
  0xcd   :  { %970 = vst [vmem:[%s2093_s5 + $0x130] sm:$0xff] %v906_v47  ;;  %v483_v55 = vpop.f32.mrf.mxu2  ;;  %v523_v56 = vpop.f32.mrf.mxu3 }
  0xce   :  { %986 = vst [vmem:[%s2093_s5 + $0x1b0] sm:$0xff] %v922_v48  ;;  %v484_v57 = vadd.f32 %v1552_v41, %v483_v55  ;;  %v524_v59 = vadd.f32 %v1552_v41, %v523_v56  ;;  %v406_v61 = vpop.f32.mrf.mxu0  ;;  %v446_v62 = vpop.f32.mrf.mxu1  ;;  %v1290_v48 = vunpack.c.h.bf16 %v1836_v13  ;;  %v1261_v56 = vunpack.c.l.bf16 %v1875_v43 }
  0xcf   :  { %939 = vst [vmem:[%s2093_s5 + $0x38] sm:$0xff] %v875_v51  ;;  %v407_v63 = vadd.f32 %v1552_v41, %v406_v61  ;;  %v447_v1 = vadd.f32 %v1552_v41, %v446_v62 }
  0xd0   :  { %955 = vst [vmem:[%s2093_s5 + $0xb8] sm:$0xff] %v891_v52  ;;  %vm586_vm1 = vcmp.ge.f32.partialorder %v484_v57, 0.0  ;;  %v651_v3 = vmul.f32 %v1563_v45, %v484_v57  ;;  %vm602_vm2 = vcmp.ge.f32.partialorder %v524_v59, 0.0  ;;  %v667_v4 = vmul.f32 %v1563_v45, %v524_v59 }
  0xd1   :  { %vm555_vm3 = vcmp.ge.f32.partialorder %v407_v63, 0.0  ;;  %v620_v5 = vmul.f32 %v1563_v45, %v407_v63  ;;  %vm571_vm4 = vcmp.ge.f32.partialorder %v447_v1, 0.0  ;;  %v636_v6 = vmul.f32 %v1563_v45, %v447_v1 }
  0xd2   :  { %v715_v7 = vsel %vm586_vm1, %v484_v57, %v651_v3  ;;  %v731_v8 = vsel %vm602_vm2, %v524_v59, %v667_v4  ;;  %v1904_v3 = vld [vmem:[%s2091_s4 + $0xa8] sm:$0xff]  }
  0xd3   :  { %v907_v9 = vadd.f32 %v1286_v58, %v715_v7  ;;  %v923_v10 = vadd.f32 %v1318_v60, %v731_v8  ;;  %v684_v11 = vsel %vm555_vm3, %v407_v63, %v620_v5  ;;  %v700_v12 = vsel %vm571_vm4, %v447_v1, %v636_v6  ;;  %v1909_v4 = vld [vmem:[%s2091_s4 + $0xe8] sm:$0xff]  }
  0xd4   :  { %v876_v15 = vadd.f32 %v1225_v0, %v684_v11  ;;  %v892_v16 = vadd.f32 %v1257_v2, %v700_v12  ;;  %v1325_v12 = vunpack.c.l.bf16 %v1909_v4 }
  0xd5   :  { %971 = vst [vmem:[%s2093_s5 + $0x138] sm:$0xff] %v907_v9  ;;  %v486_v17 = vpop.f32.mrf.mxu2  ;;  %v526_v18 = vpop.f32.mrf.mxu3 }
  0xd6   :  { %987 = vst [vmem:[%s2093_s5 + $0x1b8] sm:$0xff] %v923_v10  ;;  %v487_v19 = vadd.f32 %v1552_v41, %v486_v17  ;;  %v527_v21 = vadd.f32 %v1552_v41, %v526_v18  ;;  %v408_v23 = vpop.f32.mrf.mxu0  ;;  %v448_v24 = vpop.f32.mrf.mxu1  ;;  %v1293_v10 = vunpack.c.l.bf16 %v1904_v3  ;;  %v1262_v18 = vunpack.c.h.bf16 %v1875_v43 }
  0xd7   :  { %940 = vst [vmem:[%s2093_s5 + $0x40] sm:$0xff] %v876_v15  ;;  %v409_v25 = vadd.f32 %v1552_v41, %v408_v23  ;;  %v449_v27 = vadd.f32 %v1552_v41, %v448_v24 }
  0xd8   :  { %956 = vst [vmem:[%s2093_s5 + $0xc0] sm:$0xff] %v892_v16  ;;  %vm587_vm5 = vcmp.ge.f32.partialorder %v487_v19, 0.0  ;;  %v652_v29 = vmul.f32 %v1563_v45, %v487_v19  ;;  %vm603_vm6 = vcmp.ge.f32.partialorder %v527_v21, 0.0  ;;  %v668_v30 = vmul.f32 %v1563_v45, %v527_v21 }
  0xd9   :  { %vm556_vm7 = vcmp.ge.f32.partialorder %v409_v25, 0.0  ;;  %v621_v31 = vmul.f32 %v1563_v45, %v409_v25  ;;  %vm572_vm8 = vcmp.ge.f32.partialorder %v449_v27, 0.0  ;;  %v637_v32 = vmul.f32 %v1563_v45, %v449_v27 }
  0xda   :  { %v716_v33 = vsel %vm587_vm5, %v487_v19, %v652_v29  ;;  %v732_v34 = vsel %vm603_vm6, %v527_v21, %v668_v30  ;;  %v1230_v16 = vunpack.c.h.bf16 %v1870_v42 }
  0xdb   :  { %v908_v35 = vadd.f32 %v1289_v20, %v716_v33  ;;  %v924_v36 = vadd.f32 %v1321_v22, %v732_v34  ;;  %v685_v37 = vsel %vm556_vm7, %v409_v25, %v621_v31  ;;  %v701_v38 = vsel %vm572_vm8, %v449_v27, %v637_v32  ;;  %v1938_v31 = vld [vmem:[%s2091_s4 + $0x30] sm:$0xff]  }
  0xdc   :  { %v877_v39 = vadd.f32 %v1226_v26, %v685_v37  ;;  %v893_v40 = vadd.f32 %v1258_v28, %v701_v38  ;;  %v1943_v32 = vld [vmem:[%s2091_s4 + $0x70] sm:$0xff]   ;;  %v1326_v38 = vunpack.c.h.bf16 %v1909_v4  ;;  %v1233_v43 = vunpack.c.l.bf16 %v1938_v31 }
  0xdd   :  { %972 = vst [vmem:[%s2093_s5 + $0x140] sm:$0xff] %v908_v35  ;;  %v488_v44 = vpop.f32.mrf.mxu2  ;;  %v528_v46 = vpop.f32.mrf.mxu3 }
  0xde   :  { %988 = vst [vmem:[%s2093_s5 + $0x1c0] sm:$0xff] %v924_v36  ;;  %v489_v47 = vadd.f32 %v1552_v41, %v488_v44  ;;  %v529_v49 = vadd.f32 %v1552_v41, %v528_v46  ;;  %v411_v51 = vpop.f32.mrf.mxu0  ;;  %v451_v52 = vpop.f32.mrf.mxu1  ;;  %v1294_v36 = vunpack.c.h.bf16 %v1904_v3  ;;  %v1265_v46 = vunpack.c.l.bf16 %v1943_v32 }
  0xdf   :  { %941 = vst [vmem:[%s2093_s5 + $0x48] sm:$0xff] %v877_v39  ;;  %v412_v53 = vadd.f32 %v1552_v41, %v411_v51  ;;  %v452_v55 = vadd.f32 %v1552_v41, %v451_v52 }
  0xe0   :  { %957 = vst [vmem:[%s2093_s5 + $0xc8] sm:$0xff] %v893_v40  ;;  %vm588_vm9 = vcmp.ge.f32.partialorder %v489_v47, 0.0  ;;  %v653_v57 = vmul.f32 %v1563_v45, %v489_v47  ;;  %vm604_vm10 = vcmp.ge.f32.partialorder %v529_v49, 0.0  ;;  %v669_v58 = vmul.f32 %v1563_v45, %v529_v49 }
  0xe1   :  { %vm557_vm11 = vcmp.ge.f32.partialorder %v412_v53, 0.0  ;;  %v622_v59 = vmul.f32 %v1563_v45, %v412_v53  ;;  %vm573_vm12 = vcmp.ge.f32.partialorder %v452_v55, 0.0  ;;  %v638_v60 = vmul.f32 %v1563_v45, %v452_v55 }
  0xe2   :  { %v717_v61 = vsel %vm588_vm9, %v489_v47, %v653_v57  ;;  %v733_v62 = vsel %vm604_vm10, %v529_v49, %v669_v58  ;;  %v1972_v57 = vld [vmem:[%s2091_s4 + $0xb0] sm:$0xff]  }
  0xe3   :  { %v909_v63 = vadd.f32 %v1290_v48, %v717_v61  ;;  %v925_v0 = vadd.f32 %v1322_v50, %v733_v62  ;;  %v686_v1 = vsel %vm557_vm11, %v412_v53, %v622_v59  ;;  %v702_v2 = vsel %vm573_vm12, %v452_v55, %v638_v60  ;;  %v1977_v58 = vld [vmem:[%s2091_s4 + $0xf0] sm:$0xff]  }
  0xe4   :  { %v878_v5 = vadd.f32 %v1229_v54, %v686_v1  ;;  %v894_v6 = vadd.f32 %v1261_v56, %v702_v2  ;;  %v1329_v2 = vunpack.c.l.bf16 %v1977_v58 }
  0xe5   :  { %973 = vst [vmem:[%s2093_s5 + $0x148] sm:$0xff] %v909_v63  ;;  %v491_v7 = vpop.f32.mrf.mxu2  ;;  %v531_v8 = vpop.f32.mrf.mxu3 }
  0xe6   :  { %989 = vst [vmem:[%s2093_s5 + $0x1c8] sm:$0xff] %v925_v0  ;;  %v492_v9 = vadd.f32 %v1552_v41, %v491_v7  ;;  %v532_v11 = vadd.f32 %v1552_v41, %v531_v8  ;;  %v413_v13 = vpop.f32.mrf.mxu0  ;;  %v453_v14 = vpop.f32.mrf.mxu1  ;;  %v1297_v0 = vunpack.c.l.bf16 %v1972_v57  ;;  %v1266_v8 = vunpack.c.h.bf16 %v1943_v32 }
  0xe7   :  { %942 = vst [vmem:[%s2093_s5 + $0x50] sm:$0xff] %v878_v5  ;;  %v414_v15 = vadd.f32 %v1552_v41, %v413_v13  ;;  %v454_v17 = vadd.f32 %v1552_v41, %v453_v14 }
  0xe8   :  { %958 = vst [vmem:[%s2093_s5 + $0xd0] sm:$0xff] %v894_v6  ;;  %vm589_vm13 = vcmp.ge.f32.partialorder %v492_v9, 0.0  ;;  %v654_v19 = vmul.f32 %v1563_v45, %v492_v9  ;;  %vm605_vm14 = vcmp.ge.f32.partialorder %v532_v11, 0.0  ;;  %v670_v20 = vmul.f32 %v1563_v45, %v532_v11 }
  0xe9   :  { %vm558_vm15 = vcmp.ge.f32.partialorder %v414_v15, 0.0  ;;  %v623_v21 = vmul.f32 %v1563_v45, %v414_v15  ;;  %vm574_vm0 = vcmp.ge.f32.partialorder %v454_v17, 0.0  ;;  %v639_v22 = vmul.f32 %v1563_v45, %v454_v17 }
  0xea   :  { %v718_v23 = vsel %vm589_vm13, %v492_v9, %v654_v19  ;;  %v734_v24 = vsel %vm605_vm14, %v532_v11, %v670_v20  ;;  %v1234_v6 = vunpack.c.h.bf16 %v1938_v31 }
  0xeb   :  { %v910_v25 = vadd.f32 %v1293_v10, %v718_v23  ;;  %v926_v26 = vadd.f32 %v1325_v12, %v734_v24  ;;  %v687_v27 = vsel %vm558_vm15, %v414_v15, %v623_v21  ;;  %v703_v28 = vsel %vm574_vm0, %v454_v17, %v639_v22  ;;  %v2006_v21 = vld [vmem:[%s2091_s4 + $0x38] sm:$0xff]  }
  0xec   :  { %v879_v29 = vadd.f32 %v1230_v16, %v687_v27  ;;  %v895_v30 = vadd.f32 %v1262_v18, %v703_v28  ;;  %v2011_v22 = vld [vmem:[%s2091_s4 + $0x78] sm:$0xff]   ;;  %v1330_v28 = vunpack.c.h.bf16 %v1977_v58  ;;  %v1237_v32 = vunpack.c.l.bf16 %v2006_v21 }
  0xed   :  { %974 = vst [vmem:[%s2093_s5 + $0x150] sm:$0xff] %v910_v25  ;;  %v493_v33 = vpop.f32.mrf.mxu2  ;;  %v533_v34 = vpop.f32.mrf.mxu3 }
  0xee   :  { %990 = vst [vmem:[%s2093_s5 + $0x1d0] sm:$0xff] %v926_v26  ;;  %v494_v35 = vadd.f32 %v1552_v41, %v493_v33  ;;  %v534_v37 = vadd.f32 %v1552_v41, %v533_v34  ;;  %v416_v39 = vpop.f32.mrf.mxu0  ;;  %v456_v40 = vpop.f32.mrf.mxu1  ;;  %v1298_v26 = vunpack.c.h.bf16 %v1972_v57  ;;  %v1269_v34 = vunpack.c.l.bf16 %v2011_v22 }
  0xef   :  { %943 = vst [vmem:[%s2093_s5 + $0x58] sm:$0xff] %v879_v29  ;;  %v417_v42 = vadd.f32 %v1552_v41, %v416_v39  ;;  %v457_v44 = vadd.f32 %v1552_v41, %v456_v40 }
  0xf0   :  { %959 = vst [vmem:[%s2093_s5 + $0xd8] sm:$0xff] %v895_v30  ;;  %vm590_vm1 = vcmp.ge.f32.partialorder %v494_v35, 0.0  ;;  %v655_v47 = vmul.f32 %v1563_v45, %v494_v35  ;;  %vm606_vm2 = vcmp.ge.f32.partialorder %v534_v37, 0.0  ;;  %v671_v48 = vmul.f32 %v1563_v45, %v534_v37 }
  0xf1   :  { %vm559_vm3 = vcmp.ge.f32.partialorder %v417_v42, 0.0  ;;  %v624_v49 = vmul.f32 %v1563_v45, %v417_v42  ;;  %vm575_vm4 = vcmp.ge.f32.partialorder %v457_v44, 0.0  ;;  %v640_v50 = vmul.f32 %v1563_v45, %v457_v44 }
  0xf2   :  { %v719_v51 = vsel %vm590_vm1, %v494_v35, %v655_v47  ;;  %v735_v52 = vsel %vm606_vm2, %v534_v37, %v671_v48  ;;  %v1357_v47 = vld [vmem:[%s2091_s4 + $0xb8] sm:$0xff]  }
  0xf3   :  { %v911_v53 = vadd.f32 %v1294_v36, %v719_v51  ;;  %v927_v54 = vadd.f32 %v1326_v38, %v735_v52  ;;  %v688_v55 = vsel %vm559_vm3, %v417_v42, %v624_v49  ;;  %v704_v56 = vsel %vm575_vm4, %v457_v44, %v640_v50  ;;  %v1365_v48 = vld [vmem:[%s2091_s4 + $0xf8] sm:$0xff]  }
  0xf4   :  { %v880_v59 = vadd.f32 %v1233_v43, %v688_v55  ;;  %v896_v60 = vadd.f32 %v1265_v46, %v704_v56  ;;  %v1333_v56 = vunpack.c.l.bf16 %v1365_v48 }
  0xf5   :  { %975 = vst [vmem:[%s2093_s5 + $0x158] sm:$0xff] %v911_v53  ;;  %v496_v61 = vpop.f32.mrf.mxu2  ;;  %v536_v62 = vpop.f32.mrf.mxu3 }
  0xf6   :  { %991 = vst [vmem:[%s2093_s5 + $0x1d8] sm:$0xff] %v927_v54  ;;  %v497_v63 = vadd.f32 %v1552_v41, %v496_v61  ;;  %v537_v1 = vadd.f32 %v1552_v41, %v536_v62  ;;  %v418_v3 = vpop.f32.mrf.mxu0  ;;  %v458_v4 = vpop.f32.mrf.mxu1  ;;  %v1301_v54 = vunpack.c.l.bf16 %v1357_v47  ;;  %v1270_v62 = vunpack.c.h.bf16 %v2011_v22 }
  0xf7   :  { %944 = vst [vmem:[%s2093_s5 + $0x60] sm:$0xff] %v880_v59  ;;  %v419_v5 = vadd.f32 %v1552_v41, %v418_v3  ;;  %v459_v7 = vadd.f32 %v1552_v41, %v458_v4 }
  0xf8   :  { %960 = vst [vmem:[%s2093_s5 + $0xe0] sm:$0xff] %v896_v60  ;;  %vm591_vm5 = vcmp.ge.f32.partialorder %v497_v63, 0.0  ;;  %v656_v9 = vmul.f32 %v1563_v45, %v497_v63  ;;  %vm607_vm6 = vcmp.ge.f32.partialorder %v537_v1, 0.0  ;;  %v672_v10 = vmul.f32 %v1563_v45, %v537_v1 }
  0xf9   :  { %vm560_vm7 = vcmp.ge.f32.partialorder %v419_v5, 0.0  ;;  %v625_v11 = vmul.f32 %v1563_v45, %v419_v5  ;;  %vm576_vm8 = vcmp.ge.f32.partialorder %v459_v7, 0.0  ;;  %v641_v12 = vmul.f32 %v1563_v45, %v459_v7 }
  0xfa   :  { %v720_v13 = vsel %vm591_vm5, %v497_v63, %v656_v9  ;;  %v736_v14 = vsel %vm607_vm6, %v537_v1, %v672_v10  ;;  %v1238_v60 = vunpack.c.h.bf16 %v2006_v21 }
  0xfb   :  { %v912_v15 = vadd.f32 %v1297_v0, %v720_v13  ;;  %v928_v16 = vadd.f32 %v1329_v2, %v736_v14  ;;  %v689_v17 = vsel %vm560_vm7, %v419_v5, %v625_v11  ;;  %v705_v18 = vsel %vm576_vm8, %v459_v7, %v641_v12  ;;  %v1377_v12 = vld [vmem:[%s2089_s2] ss:$0 sm:$0xff] }
  0xfc   :  { %v881_v19 = vadd.f32 %v1234_v6, %v689_v17  ;;  %v897_v20 = vadd.f32 %v1266_v8, %v705_v18 }
  0xfd   :  { %976 = vst [vmem:[%s2093_s5 + $0x160] sm:$0xff] %v912_v15  ;;  %v498_v23 = vpop.f32.mrf.mxu2  ;;  %v538_v24 = vpop.f32.mrf.mxu3  ;;  %v1302_v15 = vunpack.c.h.bf16 %v1357_v47 }
  0xfe   :  { %992 = vst [vmem:[%s2093_s5 + $0x1e0] sm:$0xff] %v928_v16  ;;  %v499_v25 = vadd.f32 %v1552_v41, %v498_v23  ;;  %v539_v27 = vadd.f32 %v1552_v41, %v538_v24  ;;  %v421_v29 = vpop.f32.mrf.mxu0  ;;  %v461_v30 = vpop.f32.mrf.mxu1  ;;  %v1334_v16 = vunpack.c.h.bf16 %v1365_v48 }
  0xff   :  { %945 = vst [vmem:[%s2093_s5 + $0x68] sm:$0xff] %v881_v19  ;;  %v422_v31 = vadd.f32 %v1552_v41, %v421_v29  ;;  %v462_v33 = vadd.f32 %v1552_v41, %v461_v30 }
 0x100   :  { %961 = vst [vmem:[%s2093_s5 + $0xe8] sm:$0xff] %v897_v20  ;;  %vm592_vm9 = vcmp.ge.f32.partialorder %v499_v25, 0.0  ;;  %v657_v35 = vmul.f32 %v1563_v45, %v499_v25  ;;  %vm608_vm10 = vcmp.ge.f32.partialorder %v539_v27, 0.0  ;;  %v673_v36 = vmul.f32 %v1563_v45, %v539_v27 }
 0x101   :  { %vm561_vm11 = vcmp.ge.f32.partialorder %v422_v31, 0.0  ;;  %v626_v37 = vmul.f32 %v1563_v45, %v422_v31  ;;  %vm577_vm12 = vcmp.ge.f32.partialorder %v462_v33, 0.0  ;;  %v642_v38 = vmul.f32 %v1563_v45, %v462_v33 }
 0x102   :  { %v721_v39 = vsel %vm592_vm9, %v499_v25, %v657_v35  ;;  %v737_v40 = vsel %vm608_vm10, %v539_v27, %v673_v36 }
 0x103   :  { %v913_v42 = vadd.f32 %v1298_v26, %v721_v39  ;;  %v929_v43 = vadd.f32 %v1330_v28, %v737_v40  ;;  %v690_v44 = vsel %vm561_vm11, %v422_v31, %v626_v37  ;;  %v706_v46 = vsel %vm577_vm12, %v462_v33, %v642_v38 }
 0x104   :  { %v882_v49 = vadd.f32 %v1237_v32, %v690_v44  ;;  %v898_v50 = vadd.f32 %v1269_v34, %v706_v46 }
 0x105   :  { %977 = vst [vmem:[%s2093_s5 + $0x168] sm:$0xff] %v913_v42  ;;  %v501_v51 = vpop.f32.mrf.mxu2  ;;  %v541_v52 = vpop.f32.mrf.mxu3 }
 0x106   :  { %993 = vst [vmem:[%s2093_s5 + $0x1e8] sm:$0xff] %v929_v43  ;;  %v502_v53 = vadd.f32 %v1552_v41, %v501_v51  ;;  %v542_v55 = vadd.f32 %v1552_v41, %v541_v52  ;;  %v423_v57 = vpop.f32.mrf.mxu0  ;;  %v463_v58 = vpop.f32.mrf.mxu1 }
 0x107   :  { %946 = vst [vmem:[%s2093_s5 + $0x70] sm:$0xff] %v882_v49  ;;  %v424_v59 = vadd.f32 %v1552_v41, %v423_v57  ;;  %v464_v61 = vadd.f32 %v1552_v41, %v463_v58 }
 0x108   :  { %962 = vst [vmem:[%s2093_s5 + $0xf0] sm:$0xff] %v898_v50  ;;  %vm593_vm13 = vcmp.ge.f32.partialorder %v502_v53, 0.0  ;;  %v658_v63 = vmul.f32 %v1563_v45, %v502_v53  ;;  %vm609_vm14 = vcmp.ge.f32.partialorder %v542_v55, 0.0  ;;  %v674_v0 = vmul.f32 %v1563_v45, %v542_v55 }
 0x109   :  { %vm562_vm15 = vcmp.ge.f32.partialorder %v424_v59, 0.0  ;;  %v627_v1 = vmul.f32 %v1563_v45, %v424_v59  ;;  %vm578_vm0 = vcmp.ge.f32.partialorder %v464_v61, 0.0  ;;  %v643_v2 = vmul.f32 %v1563_v45, %v464_v61 }
 0x10a   :  { %v722_v3 = vsel %vm593_vm13, %v502_v53, %v658_v63  ;;  %v738_v41 = vsel %vm609_vm14, %v542_v55, %v674_v0 }
 0x10b   :  { %v914_v4 = vadd.f32 %v1301_v54, %v722_v3  ;;  %v930_v5 = vadd.f32 %v1333_v56, %v738_v41  ;;  %v691_v6 = vsel %vm562_vm15, %v424_v59, %v627_v1  ;;  %v707_v7 = vsel %vm578_vm0, %v464_v61, %v643_v2 }
 0x10c   :  { %v883_v8 = vadd.f32 %v1238_v60, %v691_v6  ;;  %v899_v9 = vadd.f32 %v1270_v62, %v707_v7 }
 0x10d   :  { %978 = vst [vmem:[%s2093_s5 + $0x170] sm:$0xff] %v914_v4  ;;  %v503_v10 = vpop.f32.mrf.mxu2  ;;  %v543_v11 = vpop.f32.mrf.mxu3 }
 0x10e   :  { %994 = vst [vmem:[%s2093_s5 + $0x1f0] sm:$0xff] %v930_v5  ;;  %v504_v13 = vadd.f32 %v1377_v12, %v503_v10  ;;  %v544_v14 = vadd.f32 %v1377_v12, %v543_v11 }
 0x10f   :  { %947 = vst [vmem:[%s2093_s5 + $0x78] sm:$0xff] %v883_v8 }
 0x110   :  { %963 = vst [vmem:[%s2093_s5 + $0xf8] sm:$0xff] %v899_v9  ;;  %vm594_vm1 = vcmp.ge.f32.partialorder %v504_v13, 0.0  ;;  %v659_v17 = vmul.f32 %v1563_v45, %v504_v13  ;;  %vm610_vm2 = vcmp.ge.f32.partialorder %v544_v14, 0.0  ;;  %v675_v18 = vmul.f32 %v1563_v45, %v544_v14 }
 0x112   :  { %v723_v19 = vsel %vm594_vm1, %v504_v13, %v659_v17  ;;  %v739_v20 = vsel %vm610_vm2, %v544_v14, %v675_v18 }
 0x113   :  { %v915_v21 = vadd.f32 %v1302_v15, %v723_v19  ;;  %v931_v22 = vadd.f32 %v1334_v16, %v739_v20 }
 0x115   :  { %979 = vst [vmem:[%s2093_s5 + $0x178] sm:$0xff] %v915_v21 }
 0x116   :  { %995 = vst [vmem:[%s2093_s5 + $0x1f8] sm:$0xff] %v931_v22 }

</bundles_post_ra>
